<compile_context>
chip_gen: v7x
topology: tpu7x:2x2x1
jax: 0.10.0
libtpu: 0.0.40
codegen_flags: <defaults>
</compile_context>

<pallas_src>
import jax
import jax.numpy as jnp
from jax.experimental import pallas as pl
from jax.experimental.pallas import tpu as pltpu

LANE = 128
SUBLANE = 8
VOCAB_PAD = 512          # vocab padding unit == minimum lane-dense vocab tile


def round_up(x, m):
    return ((x + m - 1) // m) * m


# ---------------------------------------------------------------------------
# Kernel: grid = (T decode steps, NV vocab tiles)
# ---------------------------------------------------------------------------
def decoder_kernel(emb_ref, encp_ref, enc_ref, h0_ref, c0_ref,
                   wah_ref, va_ref, w0_ref, b0_ref, w1_ref, b1_ref,
                   wfc_ref, bfc_ref,
                   pred_ref, hout_ref, cout_ref,
                   h_sc, c_sc, h1b_sc):
    f32 = jnp.float32
    bf16 = jnp.bfloat16
    Hp = h0_ref.shape[2]
    t = pl.program_id(0)
    j = pl.program_id(1)

    @pl.when(jnp.logical_and(t == 0, j == 0))
    def _load_initial_state():
        h_sc[...] = h0_ref[...]
        c_sc[...] = c0_ref[...]

    # Attention + 2-layer LSTM state update: once per decode step (first vocab
    # tile).  State is carried in VMEM scratch across the time grid axis.
    @pl.when(j == 0)
    def _state_update():
        h_prev0 = h_sc[0]
        h_prev1 = h_sc[1]
        c_prev0 = c_sc[0]
        c_prev1 = c_sc[1]

        # ---- additive (Bahdanau) attention; encoder projection was hoisted ----
        e_h = jnp.dot(h_prev1.astype(bf16), wah_ref[...],
                      preferred_element_type=f32)                       # (Bp, Hp)
        energy = jnp.tanh(encp_ref[...].astype(f32) + e_h[:, None, :])  # (Bp,S,Hp)
        scores = jnp.sum(energy * va_ref[...][None, :, :], axis=-1)     # (Bp, S)
        scores = scores - jnp.max(scores, axis=-1, keepdims=True)
        exps = jnp.exp(scores)
        attn = exps / jnp.sum(exps, axis=-1, keepdims=True)             # (Bp, S)
        enc_f32 = enc_ref[...].astype(f32)                              # (Bp,S,2Hp)
        weighted = jnp.sum(attn[:, :, None] * enc_f32, axis=1)          # (Bp, 2Hp)

        # ---- LSTM layer 0: single fused matmul, K = Ep + 2Hp + Hp ----
        x0 = jnp.concatenate([emb_ref[0], weighted, h_prev0], axis=-1)
        gates0 = (jnp.dot(x0.astype(bf16), w0_ref[...],
                          preferred_element_type=f32) + b0_ref[...])    # (Bp, 4Hp)
        i0 = jax.nn.sigmoid(gates0[:, 0:Hp])
        f0 = jax.nn.sigmoid(gates0[:, Hp:2 * Hp])
        g0 = jnp.tanh(gates0[:, 2 * Hp:3 * Hp])
        o0 = jax.nn.sigmoid(gates0[:, 3 * Hp:4 * Hp])
        c0n = f0 * c_prev0 + i0 * g0
        h0n = o0 * jnp.tanh(c0n)

        # ---- LSTM layer 1 (inter-layer dropout = eval identity), K = 2Hp ----
        x1 = jnp.concatenate([h0n, h_prev1], axis=-1)
        gates1 = (jnp.dot(x1.astype(bf16), w1_ref[...],
                          preferred_element_type=f32) + b1_ref[...])
        i1 = jax.nn.sigmoid(gates1[:, 0:Hp])
        f1 = jax.nn.sigmoid(gates1[:, Hp:2 * Hp])
        g1 = jnp.tanh(gates1[:, 2 * Hp:3 * Hp])
        o1 = jax.nn.sigmoid(gates1[:, 3 * Hp:4 * Hp])
        c1n = f1 * c_prev1 + i1 * g1
        h1n = o1 * jnp.tanh(c1n)

        # carry state across time; padded H lanes stay exactly zero (invariant:
        # padded lanes of hidden/cell are zero on entry).
        h_sc[0] = h0n
        h_sc[1] = h1n
        c_sc[0] = c0n
        c_sc[1] = c1n
        h1b_sc[...] = h1n.astype(bf16)       # cast once, reused by all vocab tiles
        # resident output blocks (constant index map -> flushed once at grid end)
        hout_ref[0] = h0n
        hout_ref[1] = h1n
        cout_ref[0] = c0n
        cout_ref[1] = c1n

    # ---- output projection for this (decode step, vocab tile) ----
    pred_ref[0] = (jnp.dot(h1b_sc[...], wfc_ref[...],
                           preferred_element_type=f32) + bfc_ref[...])


# ---------------------------------------------------------------------------
# Parameters (raw, PyTorch-like) and packing (padded / fused / bf16)
# ---------------------------------------------------------------------------
def init_params(key, input_size, output_size, embedding_size, hidden_size):
    E, H, V = embedding_size, hidden_size, output_size
    ks = jax.random.split(key, 14)

    def u(k, shape, scale=0.08):
        return jax.random.uniform(k, shape, jnp.float32, -scale, scale)

    return dict(
        embedding=u(ks[0], (input_size, E)),
        # attention: Linear(2H + H -> H) split into h-part / enc-part, plus v
        w_ah=u(ks[1], (H, H)),
        w_ae=u(ks[2], (2 * H, H)),
        b_a=u(ks[3], (1, H)),
        v_a=u(ks[4], (1, H)),
        # LSTM layer 0: W_ih (E+2H, 4H) split into embedding/context halves
        wih0e=u(ks[5], (E, 4 * H)),
        wih0c=u(ks[6], (2 * H, 4 * H)),
        whh0=u(ks[7], (H, 4 * H)),
        b0=u(ks[8], (1, 4 * H)),          # b_ih0 + b_hh0 combined
        # LSTM layer 1
        wih1=u(ks[9], (H, 4 * H)),
        whh1=u(ks[10], (H, 4 * H)),
        b1=u(ks[11], (1, 4 * H)),
        # fc
        wfc=u(ks[12], (H, V)),
        bfc=u(ks[13], (1, V)),
    )


def pack_params(params, E, H, V):
    """Pad to (8,128)-friendly shapes, fuse LSTM weights, cast weights to bf16."""
    Ep, Hp = round_up(E, LANE), round_up(H, LANE)
    Vp = round_up(V, VOCAB_PAD)          # multiple of the vocab tile unit
    bf16 = jnp.bfloat16

    def pad2(x, rows, cols):
        return jnp.pad(x, ((0, rows - x.shape[0]), (0, cols - x.shape[1])))

    def pad_gate_cols(w):
        # w: (K, 4H); pad each gate block (i,f,g,o) to Hp columns -> (K, 4Hp)
        parts = jnp.split(w, 4, axis=1)
        return jnp.concatenate(
            [jnp.pad(p, ((0, 0), (0, Hp - p.shape[1]))) for p in parts], axis=1)

    # fused LSTM layer-0 weight: rows [E | 2H | H] -> [Ep | 2Hp | Hp]
    w0 = jnp.concatenate([
        pad2(pad_gate_cols(params['wih0e']), Ep, 4 * Hp),
        pad2(pad_gate_cols(params['wih0c']), 2 * Hp, 4 * Hp),
        pad2(pad_gate_cols(params['whh0']), Hp, 4 * Hp)], axis=0).astype(bf16)
    b0 = pad_gate_cols(params['b0']).astype(jnp.float32)

    # fused LSTM layer-1 weight: rows [H | H] -> [Hp | Hp]
    w1 = jnp.concatenate([
        pad2(pad_gate_cols(params['wih1']), Hp, 4 * Hp),
        pad2(pad_gate_cols(params['whh1']), Hp, 4 * Hp)], axis=0).astype(bf16)
    b1 = pad_gate_cols(params['b1']).astype(jnp.float32)

    packed = dict(
        embedding=params['embedding'],
        w_ah=pad2(params['w_ah'], Hp, Hp).astype(bf16),
        w_ae=pad2(params['w_ae'], 2 * Hp, Hp),            # used in hoisted precompute
        b_a=pad2(params['b_a'], 1, Hp),
        v_a=pad2(params['v_a'], 1, Hp),
        w0=w0, b0=b0, w1=w1, b1=b1,
        wfc=pad2(params['wfc'], Hp, Vp).astype(bf16),
        bfc=pad2(params['bfc'], 1, Vp).astype(jnp.float32),
    )
    dims = dict(E=E, H=H, V=V, Ep=Ep, Hp=Hp, Vp=Vp)
    return packed, dims


def precompute_encoder(enc_outputs, packed, dims):
    """Run once per source sentence (constant across decode steps). bf16 out."""
    S, B, twoH = enc_outputs.shape
    Bp, Hp = round_up(B, SUBLANE), dims['Hp']
    enc_bt = jnp.transpose(enc_outputs, (1, 0, 2))                   # (B, S, 2H)
    enc_pad = jnp.pad(enc_bt, ((0, Bp - B), (0, 0), (0, 2 * Hp - twoH)))
    enc_proj = (jnp.einsum('bsk,kh->bsh', enc_pad, packed['w_ae'])
                + packed['b_a'][None])                               # (Bp, S, Hp)
    return enc_pad.astype(jnp.bfloat16), enc_proj.astype(jnp.bfloat16)


# ---------------------------------------------------------------------------
# Pallas wrapper: T fused decode steps (T=1 reproduces Decoder.forward exactly)
# ---------------------------------------------------------------------------
def decoder_forward(emb_seq_pad, hidden_pad, cell_pad, enc_pad, enc_proj_pad,
                    packed, *, vmem_budget_bytes=40 << 20):
    T, Bp, Ep = emb_seq_pad.shape
    L, _, Hp = hidden_pad.shape
    Vp = packed['wfc'].shape[1]

    # Vocab tile: whole bf16 wfc resident in VMEM when it fits the budget
    # (v5e/v6e, 128 MiB physical); otherwise stream lane-dense tiles (v7x).
    if Hp * Vp * 2 <= vmem_budget_bytes // 2:
        TV = Vp
    else:
        TV = VOCAB_PAD
        for cand in (2048, 1024):
            if Vp % cand == 0 and 4 * Hp * cand <= vmem_budget_bytes // 4:
                TV = cand
                break
    NV = Vp // TV

    consts = (enc_proj_pad, enc_pad, hidden_pad, cell_pad,
              packed['w_ah'], packed['v_a'], packed['w0'], packed['b0'],
              packed['w1'], packed['b1'])
    inputs = (emb_seq_pad,) + consts + (packed['wfc'], packed['bfc'])

    # Explicit scoped-VMEM limit (defaults 16/32 MiB are well below physical).
    def nbytes(a):
        return int(a.size) * a.dtype.itemsize
    est = (2 * sum(nbytes(a) for a in consts)                 # worst case 2x
           + (1 if NV == 1 else 2) * (Hp * TV * 2 + TV * 4)   # wfc/bfc tiles
           + 2 * Bp * Ep * 4                                  # emb tile
           + 2 * Bp * TV * 4                                  # pred tile
           + 2 * 2 * L * Bp * Hp * 4                          # hout / cout
           + 2 * L * Bp * Hp * 4 + Bp * Hp * 2)               # scratch
    vmem_limit = int(min(max(32 << 20, int(est * 1.5) + (4 << 20)), 100 << 20))

    def build(single_buffer_constants):
        const_kw = ({'pipeline_mode': pl.Buffered(1)}
                    if single_buffer_constants else {})

        def const_spec(arr):
            if arr.ndim == 2:
                return pl.BlockSpec(arr.shape, lambda t, j: (0, 0), **const_kw)
            return pl.BlockSpec(arr.shape, lambda t, j: (0, 0, 0), **const_kw)

        wfc_kw = const_kw if NV == 1 else {}        # resident wfc => constant too
        in_specs = (
            [pl.BlockSpec((1, Bp, Ep), lambda t, j: (t, 0, 0))]
            + [const_spec(a) for a in consts]
            + [pl.BlockSpec((Hp, TV), lambda t, j: (0, j), **wfc_kw),
               pl.BlockSpec((1, TV), lambda t, j: (0, j), **wfc_kw)])
        out_specs = (
            pl.BlockSpec((1, Bp, TV), lambda t, j: (t, 0, j)),
            pl.BlockSpec((L, Bp, Hp), lambda t, j: (0, 0, 0)),
            pl.BlockSpec((L, Bp, Hp), lambda t, j: (0, 0, 0)),
        )
        out_shape = (
            jax.ShapeDtypeStruct((T, Bp, Vp), jnp.float32),
            jax.ShapeDtypeStruct((L, Bp, Hp), jnp.float32),
            jax.ShapeDtypeStruct((L, Bp, Hp), jnp.float32),
        )
        return pl.pallas_call(
            decoder_kernel,
            grid=(T, NV),
            in_specs=in_specs,
            out_specs=out_specs,
            out_shape=out_shape,
            scratch_shapes=[pltpu.VMEM((L, Bp, Hp), jnp.float32),   # h carry
                            pltpu.VMEM((L, Bp, Hp), jnp.float32),   # c carry
                            pltpu.VMEM((Bp, Hp), jnp.bfloat16)],    # h1 bf16
            # recurrent state outputs alias the initial-state inputs
            input_output_aliases={3: 1, 4: 2},
            compiler_params=pltpu.CompilerParams(
                dimension_semantics=("arbitrary", "arbitrary"),
                vmem_limit_bytes=vmem_limit),
        )

    try:
        return build(True)(*inputs)
    except Exception:
        # pl.Buffered(1) single-buffering not supported -> default buffering
        return build(False)(*inputs)


# ---------------------------------------------------------------------------
# Pure-JAX reference (same padded/fused/bf16 weights) for correctness checking
# ---------------------------------------------------------------------------
def reference_step(emb_pad, hidden_pad, cell_pad, enc_pad, enc_proj_pad, packed):
    f32 = jnp.float32
    bf16 = jnp.bfloat16
    Hp = hidden_pad.shape[2]
    h_prev0, h_prev1 = hidden_pad[0], hidden_pad[1]
    c_prev0, c_prev1 = cell_pad[0], cell_pad[1]

    e_h = jnp.dot(h_prev1.astype(bf16), packed['w_ah'], preferred_element_type=f32)
    energy = jnp.tanh(enc_proj_pad.astype(f32) + e_h[:, None, :])
    scores = jnp.sum(energy * packed['v_a'][None, :, :], axis=-1)
    attn = jax.nn.softmax(scores, axis=-1)
    weighted = jnp.sum(attn[:, :, None] * enc_pad.astype(f32), axis=1)

    x0 = jnp.concatenate([emb_pad, weighted, h_prev0], axis=-1).astype(bf16)
    g0 = jnp.dot(x0, packed['w0'], preferred_element_type=f32) + packed['b0']
    i0 = jax.nn.sigmoid(g0[:, :Hp]); f0 = jax.nn.sigmoid(g0[:, Hp:2 * Hp])
    gg0 = jnp.tanh(g0[:, 2 * Hp:3 * Hp]); o0 = jax.nn.sigmoid(g0[:, 3 * Hp:])
    c0n = f0 * c_prev0 + i0 * gg0
    h0n = o0 * jnp.tanh(c0n)

    x1 = jnp.concatenate([h0n, h_prev1], axis=-1).astype(bf16)
    g1 = jnp.dot(x1, packed['w1'], preferred_element_type=f32) + packed['b1']
    i1 = jax.nn.sigmoid(g1[:, :Hp]); f1 = jax.nn.sigmoid(g1[:, Hp:2 * Hp])
    gg1 = jnp.tanh(g1[:, 2 * Hp:3 * Hp]); o1 = jax.nn.sigmoid(g1[:, 3 * Hp:])
    c1n = f1 * c_prev1 + i1 * gg1
    h1n = o1 * jnp.tanh(c1n)

    pred = (jnp.dot(h1n.astype(bf16), packed['wfc'], preferred_element_type=f32)
            + packed['bfc'])
    return pred, jnp.stack([h0n, h1n]), jnp.stack([c0n, c1n])


# ---------------------------------------------------------------------------
if __name__ == "__main__":
    # small synthetic shapes consistent with the module
    B, S = 4, 8          # batch, source sequence length
    E, H = 32, 32        # embedding_size, hidden_size
    L = 2                # num_layers
    V = 300              # output_size (synthetic vocab) -> Vp = 512
    T = 3                # fused (teacher-forced) decode steps; T=1 == one forward
    input_size = V

    key = jax.random.PRNGKey(0)
    kp, kx, kh, kc, ke = jax.random.split(key, 5)

    params = init_params(kp, input_size, V, E, H)
    packed, dims = pack_params(params, E, H, V)
    Ep, Hp, Vp = dims['Ep'], dims['Hp'], dims['Vp']
    Bp = round_up(B, SUBLANE)

    x_ids = jax.random.randint(kx, (T, B), 0, input_size, dtype=jnp.int32)
    hidden = jax.random.normal(kh, (L, B, H), jnp.float32)
    cell = jax.random.normal(kc, (L, B, H), jnp.float32)
    enc_outputs = jax.random.normal(ke, (S, B, 2 * H), jnp.float32)

    # pad recurrent state once (padded lanes MUST be zero; they stay zero)
    hidden_pad = jnp.pad(hidden, ((0, 0), (0, Bp - B), (0, Hp - H)))
    cell_pad = jnp.pad(cell, ((0, 0), (0, Bp - B), (0, Hp - H)))

    # hoisted encoder projection: once per source sentence (bf16)
    enc_pad, enc_proj_pad = precompute_encoder(enc_outputs, packed, dims)

    # embedding gather + eval-mode dropout (identity) in the XLA wrapper
    emb = jnp.take(packed['embedding'], x_ids, axis=0)            # (T, B, E)
    emb_seq_pad = jnp.pad(emb, ((0, 0), (0, Bp - B), (0, Ep - E)))

    # reference FIRST (state inputs are donated to the kernel via aliasing)
    h_r, c_r = hidden_pad, cell_pad
    preds_r = []
    for t in range(T):
        p_r, h_r, c_r = reference_step(emb_seq_pad[t], h_r, c_r,
                                       enc_pad, enc_proj_pad, packed)
        preds_r.append(p_r)
    preds_r = jnp.stack(preds_r)
    jax.block_until_ready((preds_r, h_r, c_r))

    pred_pad, h_state, c_state = decoder_forward(emb_seq_pad, hidden_pad, cell_pad,
                                                 enc_pad, enc_proj_pad, packed)
    jax.block_until_ready((pred_pad, h_state, c_state))

    predict = pred_pad[:, :B, :V]
    assert predict.shape == (T, B, V)
    assert h_state.shape == (L, Bp, Hp)
    assert c_state.shape == (L, Bp, Hp)
    assert bool(jnp.all(jnp.isfinite(predict)))
    assert bool(jnp.allclose(predict, preds_r[:, :B, :V], atol=1e-2, rtol=1e-2))
    assert bool(jnp.allclose(h_state[:, :B, :H], h_r[:, :B, :H], atol=1e-2, rtol=1e-2))
    assert bool(jnp.allclose(c_state[:, :B, :H], c_r[:, :B, :H], atol=1e-2, rtol=1e-2))
    print("KERNEL_OK")
</pallas_src>

<mosaic_0001>
module attributes {stable_mosaic.version = 11 : i64} {
  func.func @decoder_kernel(%arg0: i32, %arg1: i32, %arg2: memref<1x8x128xf32, #tpu.memory_space<vmem>>, %arg3: memref<8x8x128xbf16, #tpu.memory_space<vmem>>, %arg4: memref<8x8x256xbf16, #tpu.memory_space<vmem>>, %arg5: memref<2x8x128xf32, #tpu.memory_space<vmem>>, %arg6: memref<2x8x128xf32, #tpu.memory_space<vmem>>, %arg7: memref<128x128xbf16, #tpu.memory_space<vmem>>, %arg8: memref<1x128xf32, #tpu.memory_space<vmem>>, %arg9: memref<512x512xbf16, #tpu.memory_space<vmem>>, %arg10: memref<1x512xf32, #tpu.memory_space<vmem>>, %arg11: memref<256x512xbf16, #tpu.memory_space<vmem>>, %arg12: memref<1x512xf32, #tpu.memory_space<vmem>>, %arg13: memref<128x512xbf16, #tpu.memory_space<vmem>>, %arg14: memref<1x512xf32, #tpu.memory_space<vmem>>, %arg15: memref<1x8x512xf32, #tpu.memory_space<vmem>>, %arg16: memref<2x8x128xf32, #tpu.memory_space<vmem>>, %arg17: memref<2x8x128xf32, #tpu.memory_space<vmem>>, %arg18: memref<2x8x128xf32, #tpu.memory_space<vmem>>, %arg19: memref<2x8x128xf32, #tpu.memory_space<vmem>>, %arg20: memref<8x128xbf16, #tpu.memory_space<vmem>>) attributes {dimension_semantics = [#tpu.dimension_semantics<arbitrary>, #tpu.dimension_semantics<arbitrary>], iteration_bounds = array<i64: 3, 1>, scalar_prefetch = 0 : i64, scratch_operands = 3 : i64, tpu.core_type = #tpu.core_type<tc>, window_params = [{transform_indices = @transform_0, window_bounds = array<i64: 1, 8, 128>}, {pipeline_mode = #tpu.pipeline_mode<synchronous>, transform_indices = @transform_1, window_bounds = array<i64: 8, 8, 128>}, {pipeline_mode = #tpu.pipeline_mode<synchronous>, transform_indices = @transform_2, window_bounds = array<i64: 8, 8, 256>}, {pipeline_mode = #tpu.pipeline_mode<synchronous>, transform_indices = @transform_3, window_bounds = array<i64: 2, 8, 128>}, {pipeline_mode = #tpu.pipeline_mode<synchronous>, transform_indices = @transform_4, window_bounds = array<i64: 2, 8, 128>}, {pipeline_mode = #tpu.pipeline_mode<synchronous>, transform_indices = @transform_5, window_bounds = array<i64: 128, 128>}, {pipeline_mode = #tpu.pipeline_mode<synchronous>, transform_indices = @transform_6, window_bounds = array<i64: 1, 128>}, {pipeline_mode = #tpu.pipeline_mode<synchronous>, transform_indices = @transform_7, window_bounds = array<i64: 512, 512>}, {pipeline_mode = #tpu.pipeline_mode<synchronous>, transform_indices = @transform_8, window_bounds = array<i64: 1, 512>}, {pipeline_mode = #tpu.pipeline_mode<synchronous>, transform_indices = @transform_9, window_bounds = array<i64: 256, 512>}, {pipeline_mode = #tpu.pipeline_mode<synchronous>, transform_indices = @transform_10, window_bounds = array<i64: 1, 512>}, {pipeline_mode = #tpu.pipeline_mode<synchronous>, transform_indices = @transform_11, window_bounds = array<i64: 128, 512>}, {pipeline_mode = #tpu.pipeline_mode<synchronous>, transform_indices = @transform_12, window_bounds = array<i64: 1, 512>}, {transform_indices = @transform_13, window_bounds = array<i64: 1, 8, 512>}, {pipeline_mode = #tpu.pipeline_mode<synchronous>, transform_indices = @transform_14, window_bounds = array<i64: 2, 8, 128>}, {pipeline_mode = #tpu.pipeline_mode<synchronous>, transform_indices = @transform_15, window_bounds = array<i64: 2, 8, 128>}]} {
    %c0_i32 = arith.constant 0 : i32
    %0 = arith.cmpi eq, %arg0, %c0_i32 : i32
    %c0_i32_0 = arith.constant 0 : i32
    %1 = arith.cmpi eq, %arg1, %c0_i32_0 : i32
    %2 = arith.andi %0, %1 : i1
    %3 = arith.extui %2 : i1 to i32
    %c0_i32_1 = arith.constant 0 : i32
    %4 = arith.cmpi ne, %3, %c0_i32_1 : i32
    scf.if %4 {
      %c0_12 = arith.constant 0 : index
      %c0_13 = arith.constant 0 : index
      %c0_14 = arith.constant 0 : index
      %17 = vector.load %arg5[%c0_12, %c0_13, %c0_14] : memref<2x8x128xf32, #tpu.memory_space<vmem>>, vector<2x8x128xf32>
      %c0_15 = arith.constant 0 : index
      %c0_16 = arith.constant 0 : index
      %c0_17 = arith.constant 0 : index
      %18 = vector.load %arg18[%c0_15, %c0_16, %c0_17] : memref<2x8x128xf32, #tpu.memory_space<vmem>>, vector<2x8x128xf32>
      tpu.vector_store %arg18[%c0_15, %c0_16, %c0_17], %17 {strides = array<i32>} : memref<2x8x128xf32, #tpu.memory_space<vmem>>, vector<2x8x128xf32>,
      %c0_18 = arith.constant 0 : index
      %c0_19 = arith.constant 0 : index
      %c0_20 = arith.constant 0 : index
      %19 = vector.load %arg6[%c0_18, %c0_19, %c0_20] : memref<2x8x128xf32, #tpu.memory_space<vmem>>, vector<2x8x128xf32>
      %c0_21 = arith.constant 0 : index
      %c0_22 = arith.constant 0 : index
      %c0_23 = arith.constant 0 : index
      %20 = vector.load %arg19[%c0_21, %c0_22, %c0_23] : memref<2x8x128xf32, #tpu.memory_space<vmem>>, vector<2x8x128xf32>
      tpu.vector_store %arg19[%c0_21, %c0_22, %c0_23], %19 {strides = array<i32>} : memref<2x8x128xf32, #tpu.memory_space<vmem>>, vector<2x8x128xf32>,
    } else {
    }
    %c0_i32_2 = arith.constant 0 : i32
    %5 = arith.cmpi eq, %arg1, %c0_i32_2 : i32
    %6 = arith.extui %5 : i1 to i32
    %c0_i32_3 = arith.constant 0 : i32
    %7 = arith.cmpi ne, %6, %c0_i32_3 : i32
    scf.if %7 {
      %c0_12 = arith.constant 0 : index
      %c0_13 = arith.constant 0 : index
      %c0_14 = arith.constant 0 : index
      %17 = vector.load %arg18[%c0_12, %c0_13, %c0_14] : memref<2x8x128xf32, #tpu.memory_space<vmem>>, vector<1x8x128xf32>
      %18 = vector.shape_cast %17 : vector<1x8x128xf32> to vector<8x128xf32>
      %c1 = arith.constant 1 : index
      %c0_15 = arith.constant 0 : index
      %c0_16 = arith.constant 0 : index
      %19 = vector.load %arg18[%c1, %c0_15, %c0_16] : memref<2x8x128xf32, #tpu.memory_space<vmem>>, vector<1x8x128xf32>
      %20 = vector.shape_cast %19 : vector<1x8x128xf32> to vector<8x128xf32>
      %c0_17 = arith.constant 0 : index
      %c0_18 = arith.constant 0 : index
      %c0_19 = arith.constant 0 : index
      %21 = vector.load %arg19[%c0_17, %c0_18, %c0_19] : memref<2x8x128xf32, #tpu.memory_space<vmem>>, vector<1x8x128xf32>
      %22 = vector.shape_cast %21 : vector<1x8x128xf32> to vector<8x128xf32>
      %c1_20 = arith.constant 1 : index
      %c0_21 = arith.constant 0 : index
      %c0_22 = arith.constant 0 : index
      %23 = vector.load %arg19[%c1_20, %c0_21, %c0_22] : memref<2x8x128xf32, #tpu.memory_space<vmem>>, vector<1x8x128xf32>
      %24 = vector.shape_cast %23 : vector<1x8x128xf32> to vector<8x128xf32>
      %25 = arith.truncf %20 : vector<8x128xf32> to vector<8x128xbf16>
      %c0_23 = arith.constant 0 : index
      %c0_24 = arith.constant 0 : index
      %26 = vector.load %arg7[%c0_23, %c0_24] : memref<128x128xbf16, #tpu.memory_space<vmem>>, vector<128x128xbf16>
      %cst_25 = arith.constant dense<0.000000e+00> : vector<8x128xf32>
      %27 = tpu.matmul %25, %26, %cst_25 {dimension_numbers = #tpu.dot_dimension_numbers<[1], [0], [0], [1], [0, 0, 1, 1], [], []>} : vector<8x128xbf16>, vector<128x128xbf16>, vector<8x128xf32> -> vector<8x128xf32>
      %c0_26 = arith.constant 0 : index
      %c0_27 = arith.constant 0 : index
      %c0_28 = arith.constant 0 : index
      %28 = vector.load %arg3[%c0_26, %c0_27, %c0_28] : memref<8x8x128xbf16, #tpu.memory_space<vmem>>, vector<8x8x128xbf16>
      %29 = arith.extf %28 : vector<8x8x128xbf16> to vector<8x8x128xf32>
      %30 = vector.shape_cast %27 : vector<8x128xf32> to vector<8x1x128xf32>
      %31 = vector.broadcast %30 : vector<8x1x128xf32> to vector<8x8x128xf32>
      %32 = arith.addf %29, %31 : vector<8x8x128xf32>
      %33 = math.tanh %32 : vector<8x8x128xf32>
      %c0_29 = arith.constant 0 : index
      %c0_30 = arith.constant 0 : index
      %34 = vector.load %arg8[%c0_29, %c0_30] : memref<1x128xf32, #tpu.memory_space<vmem>>, vector<1x128xf32>
      %35 = vector.shape_cast %34 : vector<1x128xf32> to vector<1x1x128xf32>
      %36 = vector.broadcast %35 : vector<1x1x128xf32> to vector<8x8x128xf32>
      %37 = arith.mulf %33, %36 : vector<8x8x128xf32>
      %cst_31 = arith.constant dense<0.000000e+00> : vector<8x8xf32>
      %38 = vector.multi_reduction <add>, %37, %cst_31 [2] : vector<8x8x128xf32> to vector<8x8xf32>
      %cst_32 = arith.constant dense<0xFF800000> : vector<8xf32>
      %39 = vector.multi_reduction <maximumf>, %38, %cst_32 [1] : vector<8x8xf32> to vector<8xf32>
      %40 = vector.shape_cast %39 : vector<8xf32> to vector<8x1xf32>
      %41 = vector.broadcast %40 : vector<8x1xf32> to vector<8x8xf32>
      %42 = arith.subf %38, %41 : vector<8x8xf32>
      %43 = math.exp %42 : vector<8x8xf32>
      %cst_33 = arith.constant dense<0.000000e+00> : vector<8xf32>
      %44 = vector.multi_reduction <add>, %43, %cst_33 [1] : vector<8x8xf32> to vector<8xf32>
      %45 = vector.shape_cast %44 : vector<8xf32> to vector<8x1xf32>
      %46 = vector.broadcast %45 : vector<8x1xf32> to vector<8x8xf32>
      %47 = arith.divf %43, %46 : vector<8x8xf32>
      %c0_34 = arith.constant 0 : index
      %c0_35 = arith.constant 0 : index
      %c0_36 = arith.constant 0 : index
      %48 = vector.load %arg4[%c0_34, %c0_35, %c0_36] : memref<8x8x256xbf16, #tpu.memory_space<vmem>>, vector<8x8x256xbf16>
      %49 = arith.extf %48 : vector<8x8x256xbf16> to vector<8x8x256xf32>
      %50 = vector.shape_cast %47 : vector<8x8xf32> to vector<8x8x1xf32>
      %51 = vector.broadcast %50 : vector<8x8x1xf32> to vector<8x8x256xf32>
      %52 = arith.mulf %51, %49 : vector<8x8x256xf32>
      %cst_37 = arith.constant dense<0.000000e+00> : vector<8x256xf32>
      %53 = vector.multi_reduction <add>, %52, %cst_37 [1] : vector<8x8x256xf32> to vector<8x256xf32>
      %c0_38 = arith.constant 0 : index
      %c0_39 = arith.constant 0 : index
      %c0_40 = arith.constant 0 : index
      %54 = vector.load %arg2[%c0_38, %c0_39, %c0_40] : memref<1x8x128xf32, #tpu.memory_space<vmem>>, vector<1x8x128xf32>
      %55 = vector.shape_cast %54 : vector<1x8x128xf32> to vector<8x128xf32>
      %56 = tpu.concatenate %55, %53, %18 in 1 : vector<8x128xf32>, vector<8x256xf32>, vector<8x128xf32> -> vector<8x512xf32>
      %57 = arith.truncf %56 : vector<8x512xf32> to vector<8x512xbf16>
      %c0_41 = arith.constant 0 : index
      %c0_42 = arith.constant 0 : index
      %58 = vector.load %arg9[%c0_41, %c0_42] : memref<512x512xbf16, #tpu.memory_space<vmem>>, vector<512x512xbf16>
      %cst_43 = arith.constant dense<0.000000e+00> : vector<8x512xf32>
      %59 = tpu.matmul %57, %58, %cst_43 {dimension_numbers = #tpu.dot_dimension_numbers<[1], [0], [0], [1], [0, 0, 1, 1], [], []>} : vector<8x512xbf16>, vector<512x512xbf16>, vector<8x512xf32> -> vector<8x512xf32>
      %c0_44 = arith.constant 0 : index
      %c0_45 = arith.constant 0 : index
      %60 = vector.load %arg10[%c0_44, %c0_45] : memref<1x512xf32, #tpu.memory_space<vmem>>, vector<1x512xf32>
      %61 = vector.broadcast %60 : vector<1x512xf32> to vector<8x512xf32>
      %62 = arith.addf %59, %61 : vector<8x512xf32>
      %63 = vector.extract_strided_slice %62 {offsets = [0, 0], sizes = [8, 128], strides = [1, 1]} : vector<8x512xf32> to vector<8x128xf32>
      %64 = arith.negf %63 : vector<8x128xf32>
      %65 = math.exp %64 : vector<8x128xf32>
      %cst_46 = arith.constant 1.000000e+00 : f32
      %66 = vector.broadcast %cst_46 : f32 to vector<8x128xf32>
      %67 = arith.addf %66, %65 : vector<8x128xf32>
      %68 = arith.divf %66, %67 : vector<8x128xf32>
      %69 = vector.extract_strided_slice %62 {offsets = [0, 128], sizes = [8, 128], strides = [1, 1]} : vector<8x512xf32> to vector<8x128xf32>
      %70 = arith.negf %69 : vector<8x128xf32>
      %71 = math.exp %70 : vector<8x128xf32>
      %cst_47 = arith.constant 1.000000e+00 : f32
      %72 = vector.broadcast %cst_47 : f32 to vector<8x128xf32>
      %73 = arith.addf %72, %71 : vector<8x128xf32>
      %74 = arith.divf %72, %73 : vector<8x128xf32>
      %75 = vector.extract_strided_slice %62 {offsets = [0, 256], sizes = [8, 128], strides = [1, 1]} : vector<8x512xf32> to vector<8x128xf32>
      %76 = math.tanh %75 : vector<8x128xf32>
      %77 = vector.extract_strided_slice %62 {offsets = [0, 384], sizes = [8, 128], strides = [1, 1]} : vector<8x512xf32> to vector<8x128xf32>
      %78 = arith.negf %77 : vector<8x128xf32>
      %79 = math.exp %78 : vector<8x128xf32>
      %cst_48 = arith.constant 1.000000e+00 : f32
      %80 = vector.broadcast %cst_48 : f32 to vector<8x128xf32>
      %81 = arith.addf %80, %79 : vector<8x128xf32>
      %82 = arith.divf %80, %81 : vector<8x128xf32>
      %83 = arith.mulf %74, %22 : vector<8x128xf32>
      %84 = arith.mulf %68, %76 : vector<8x128xf32>
      %85 = arith.addf %83, %84 : vector<8x128xf32>
      %86 = math.tanh %85 : vector<8x128xf32>
      %87 = arith.mulf %82, %86 : vector<8x128xf32>
      %88 = tpu.concatenate %87, %20 in 1 : vector<8x128xf32>, vector<8x128xf32> -> vector<8x256xf32>
      %89 = arith.truncf %88 : vector<8x256xf32> to vector<8x256xbf16>
      %c0_49 = arith.constant 0 : index
      %c0_50 = arith.constant 0 : index
      %90 = vector.load %arg11[%c0_49, %c0_50] : memref<256x512xbf16, #tpu.memory_space<vmem>>, vector<256x512xbf16>
      %cst_51 = arith.constant dense<0.000000e+00> : vector<8x512xf32>
      %91 = tpu.matmul %89, %90, %cst_51 {dimension_numbers = #tpu.dot_dimension_numbers<[1], [0], [0], [1], [0, 0, 1, 1], [], []>} : vector<8x256xbf16>, vector<256x512xbf16>, vector<8x512xf32> -> vector<8x512xf32>
      %c0_52 = arith.constant 0 : index
      %c0_53 = arith.constant 0 : index
      %92 = vector.load %arg12[%c0_52, %c0_53] : memref<1x512xf32, #tpu.memory_space<vmem>>, vector<1x512xf32>
      %93 = vector.broadcast %92 : vector<1x512xf32> to vector<8x512xf32>
      %94 = arith.addf %91, %93 : vector<8x512xf32>
      %95 = vector.extract_strided_slice %94 {offsets = [0, 0], sizes = [8, 128], strides = [1, 1]} : vector<8x512xf32> to vector<8x128xf32>
      %96 = arith.negf %95 : vector<8x128xf32>
      %97 = math.exp %96 : vector<8x128xf32>
      %cst_54 = arith.constant 1.000000e+00 : f32
      %98 = vector.broadcast %cst_54 : f32 to vector<8x128xf32>
      %99 = arith.addf %98, %97 : vector<8x128xf32>
      %100 = arith.divf %98, %99 : vector<8x128xf32>
      %101 = vector.extract_strided_slice %94 {offsets = [0, 128], sizes = [8, 128], strides = [1, 1]} : vector<8x512xf32> to vector<8x128xf32>
      %102 = arith.negf %101 : vector<8x128xf32>
      %103 = math.exp %102 : vector<8x128xf32>
      %cst_55 = arith.constant 1.000000e+00 : f32
      %104 = vector.broadcast %cst_55 : f32 to vector<8x128xf32>
      %105 = arith.addf %104, %103 : vector<8x128xf32>
      %106 = arith.divf %104, %105 : vector<8x128xf32>
      %107 = vector.extract_strided_slice %94 {offsets = [0, 256], sizes = [8, 128], strides = [1, 1]} : vector<8x512xf32> to vector<8x128xf32>
      %108 = math.tanh %107 : vector<8x128xf32>
      %109 = vector.extract_strided_slice %94 {offsets = [0, 384], sizes = [8, 128], strides = [1, 1]} : vector<8x512xf32> to vector<8x128xf32>
      %110 = arith.negf %109 : vector<8x128xf32>
      %111 = math.exp %110 : vector<8x128xf32>
      %cst_56 = arith.constant 1.000000e+00 : f32
      %112 = vector.broadcast %cst_56 : f32 to vector<8x128xf32>
      %113 = arith.addf %112, %111 : vector<8x128xf32>
      %114 = arith.divf %112, %113 : vector<8x128xf32>
      %115 = arith.mulf %106, %24 : vector<8x128xf32>
      %116 = arith.mulf %100, %108 : vector<8x128xf32>
      %117 = arith.addf %115, %116 : vector<8x128xf32>
      %118 = math.tanh %117 : vector<8x128xf32>
      %119 = arith.mulf %114, %118 : vector<8x128xf32>
      %c0_57 = arith.constant 0 : index
      %c0_58 = arith.constant 0 : index
      %c0_59 = arith.constant 0 : index
      %120 = vector.load %arg18[%c0_57, %c0_58, %c0_59] : memref<2x8x128xf32, #tpu.memory_space<vmem>>, vector<1x8x128xf32>
      %121 = vector.shape_cast %120 : vector<1x8x128xf32> to vector<8x128xf32>
      %122 = vector.shape_cast %87 : vector<8x128xf32> to vector<1x8x128xf32>
      tpu.vector_store %arg18[%c0_57, %c0_58, %c0_59], %122 {strides = array<i32>} : memref<2x8x128xf32, #tpu.memory_space<vmem>>, vector<1x8x128xf32>,
      %c1_60 = arith.constant 1 : index
      %c0_61 = arith.constant 0 : index
      %c0_62 = arith.constant 0 : index
      %123 = vector.load %arg18[%c1_60, %c0_61, %c0_62] : memref<2x8x128xf32, #tpu.memory_space<vmem>>, vector<1x8x128xf32>
      %124 = vector.shape_cast %123 : vector<1x8x128xf32> to vector<8x128xf32>
      %125 = vector.shape_cast %119 : vector<8x128xf32> to vector<1x8x128xf32>
      tpu.vector_store %arg18[%c1_60, %c0_61, %c0_62], %125 {strides = array<i32>} : memref<2x8x128xf32, #tpu.memory_space<vmem>>, vector<1x8x128xf32>,
      %c0_63 = arith.constant 0 : index
      %c0_64 = arith.constant 0 : index
      %c0_65 = arith.constant 0 : index
      %126 = vector.load %arg19[%c0_63, %c0_64, %c0_65] : memref<2x8x128xf32, #tpu.memory_space<vmem>>, vector<1x8x128xf32>
      %127 = vector.shape_cast %126 : vector<1x8x128xf32> to vector<8x128xf32>
      %128 = vector.shape_cast %85 : vector<8x128xf32> to vector<1x8x128xf32>
      tpu.vector_store %arg19[%c0_63, %c0_64, %c0_65], %128 {strides = array<i32>} : memref<2x8x128xf32, #tpu.memory_space<vmem>>, vector<1x8x128xf32>,
      %c1_66 = arith.constant 1 : index
      %c0_67 = arith.constant 0 : index
      %c0_68 = arith.constant 0 : index
      %129 = vector.load %arg19[%c1_66, %c0_67, %c0_68] : memref<2x8x128xf32, #tpu.memory_space<vmem>>, vector<1x8x128xf32>
      %130 = vector.shape_cast %129 : vector<1x8x128xf32> to vector<8x128xf32>
      %131 = vector.shape_cast %117 : vector<8x128xf32> to vector<1x8x128xf32>
      tpu.vector_store %arg19[%c1_66, %c0_67, %c0_68], %131 {strides = array<i32>} : memref<2x8x128xf32, #tpu.memory_space<vmem>>, vector<1x8x128xf32>,
      %132 = arith.truncf %119 : vector<8x128xf32> to vector<8x128xbf16>
      %c0_69 = arith.constant 0 : index
      %c0_70 = arith.constant 0 : index
      %133 = vector.load %arg20[%c0_69, %c0_70] : memref<8x128xbf16, #tpu.memory_space<vmem>>, vector<8x128xbf16>
      tpu.vector_store %arg20[%c0_69, %c0_70], %132 {strides = array<i32>} : memref<8x128xbf16, #tpu.memory_space<vmem>>, vector<8x128xbf16>,
      %c0_71 = arith.constant 0 : index
      %c0_72 = arith.constant 0 : index
      %c0_73 = arith.constant 0 : index
      %134 = vector.load %arg16[%c0_71, %c0_72, %c0_73] : memref<2x8x128xf32, #tpu.memory_space<vmem>>, vector<1x8x128xf32>
      %135 = vector.shape_cast %134 : vector<1x8x128xf32> to vector<8x128xf32>
      %136 = vector.shape_cast %87 : vector<8x128xf32> to vector<1x8x128xf32>
      tpu.vector_store %arg16[%c0_71, %c0_72, %c0_73], %136 {strides = array<i32>} : memref<2x8x128xf32, #tpu.memory_space<vmem>>, vector<1x8x128xf32>,
      %c1_74 = arith.constant 1 : index
      %c0_75 = arith.constant 0 : index
      %c0_76 = arith.constant 0 : index
      %137 = vector.load %arg16[%c1_74, %c0_75, %c0_76] : memref<2x8x128xf32, #tpu.memory_space<vmem>>, vector<1x8x128xf32>
      %138 = vector.shape_cast %137 : vector<1x8x128xf32> to vector<8x128xf32>
      %139 = vector.shape_cast %119 : vector<8x128xf32> to vector<1x8x128xf32>
      tpu.vector_store %arg16[%c1_74, %c0_75, %c0_76], %139 {strides = array<i32>} : memref<2x8x128xf32, #tpu.memory_space<vmem>>, vector<1x8x128xf32>,
      %c0_77 = arith.constant 0 : index
      %c0_78 = arith.constant 0 : index
      %c0_79 = arith.constant 0 : index
      %140 = vector.load %arg17[%c0_77, %c0_78, %c0_79] : memref<2x8x128xf32, #tpu.memory_space<vmem>>, vector<1x8x128xf32>
      %141 = vector.shape_cast %140 : vector<1x8x128xf32> to vector<8x128xf32>
      %142 = vector.shape_cast %85 : vector<8x128xf32> to vector<1x8x128xf32>
      tpu.vector_store %arg17[%c0_77, %c0_78, %c0_79], %142 {strides = array<i32>} : memref<2x8x128xf32, #tpu.memory_space<vmem>>, vector<1x8x128xf32>,
      %c1_80 = arith.constant 1 : index
      %c0_81 = arith.constant 0 : index
      %c0_82 = arith.constant 0 : index
      %143 = vector.load %arg17[%c1_80, %c0_81, %c0_82] : memref<2x8x128xf32, #tpu.memory_space<vmem>>, vector<1x8x128xf32>
      %144 = vector.shape_cast %143 : vector<1x8x128xf32> to vector<8x128xf32>
      %145 = vector.shape_cast %117 : vector<8x128xf32> to vector<1x8x128xf32>
      tpu.vector_store %arg17[%c1_80, %c0_81, %c0_82], %145 {strides = array<i32>} : memref<2x8x128xf32, #tpu.memory_space<vmem>>, vector<1x8x128xf32>,
    } else {
    }
    %c0 = arith.constant 0 : index
    %c0_4 = arith.constant 0 : index
    %8 = vector.load %arg20[%c0, %c0_4] : memref<8x128xbf16, #tpu.memory_space<vmem>>, vector<8x128xbf16>
    %c0_5 = arith.constant 0 : index
    %c0_6 = arith.constant 0 : index
    %9 = vector.load %arg13[%c0_5, %c0_6] : memref<128x512xbf16, #tpu.memory_space<vmem>>, vector<128x512xbf16>
    %cst = arith.constant dense<0.000000e+00> : vector<8x512xf32>
    %10 = tpu.matmul %8, %9, %cst {dimension_numbers = #tpu.dot_dimension_numbers<[1], [0], [0], [1], [0, 0, 1, 1], [], []>} : vector<8x128xbf16>, vector<128x512xbf16>, vector<8x512xf32> -> vector<8x512xf32>
    %c0_7 = arith.constant 0 : index
    %c0_8 = arith.constant 0 : index
    %11 = vector.load %arg14[%c0_7, %c0_8] : memref<1x512xf32, #tpu.memory_space<vmem>>, vector<1x512xf32>
    %12 = vector.broadcast %11 : vector<1x512xf32> to vector<8x512xf32>
    %13 = arith.addf %10, %12 : vector<8x512xf32>
    %c0_9 = arith.constant 0 : index
    %c0_10 = arith.constant 0 : index
    %c0_11 = arith.constant 0 : index
    %14 = vector.load %arg15[%c0_9, %c0_10, %c0_11] : memref<1x8x512xf32, #tpu.memory_space<vmem>>, vector<1x8x512xf32>
    %15 = vector.shape_cast %14 : vector<1x8x512xf32> to vector<8x512xf32>
    %16 = vector.shape_cast %13 : vector<8x512xf32> to vector<1x8x512xf32>
    tpu.vector_store %arg15[%c0_9, %c0_10, %c0_11], %16 {strides = array<i32>} : memref<1x8x512xf32, #tpu.memory_space<vmem>>, vector<1x8x512xf32>,
    return
  }
  func.func @transform_0(%arg0: i32, %arg1: i32) -> (i32, i32, i32) {
    %c0_i32 = arith.constant 0 : i32
    %c0_i32_0 = arith.constant 0 : i32
    %c0_i32_1 = arith.constant 0 : i32
    return %arg0, %c0_i32, %c0_i32_0 : i32, i32, i32
  }
  func.func @transform_1(%arg0: i32, %arg1: i32) -> (i32, i32, i32) {
    %c0_i32 = arith.constant 0 : i32
    %c0_i32_0 = arith.constant 0 : i32
    %c0_i32_1 = arith.constant 0 : i32
    %c0_i32_2 = arith.constant 0 : i32
    return %c0_i32, %c0_i32_0, %c0_i32_1 : i32, i32, i32
  }
  func.func @transform_2(%arg0: i32, %arg1: i32) -> (i32, i32, i32) {
    %c0_i32 = arith.constant 0 : i32
    %c0_i32_0 = arith.constant 0 : i32
    %c0_i32_1 = arith.constant 0 : i32
    %c0_i32_2 = arith.constant 0 : i32
    return %c0_i32, %c0_i32_0, %c0_i32_1 : i32, i32, i32
  }
  func.func @transform_3(%arg0: i32, %arg1: i32) -> (i32, i32, i32) {
    %c0_i32 = arith.constant 0 : i32
    %c0_i32_0 = arith.constant 0 : i32
    %c0_i32_1 = arith.constant 0 : i32
    %c0_i32_2 = arith.constant 0 : i32
    return %c0_i32, %c0_i32_0, %c0_i32_1 : i32, i32, i32
  }
  func.func @transform_4(%arg0: i32, %arg1: i32) -> (i32, i32, i32) {
    %c0_i32 = arith.constant 0 : i32
    %c0_i32_0 = arith.constant 0 : i32
    %c0_i32_1 = arith.constant 0 : i32
    %c0_i32_2 = arith.constant 0 : i32
    return %c0_i32, %c0_i32_0, %c0_i32_1 : i32, i32, i32
  }
  func.func @transform_5(%arg0: i32, %arg1: i32) -> (i32, i32) {
    %c0_i32 = arith.constant 0 : i32
    %c0_i32_0 = arith.constant 0 : i32
    %c0_i32_1 = arith.constant 0 : i32
    return %c0_i32, %c0_i32_0 : i32, i32
  }
  func.func @transform_6(%arg0: i32, %arg1: i32) -> (i32, i32) {
    %c0_i32 = arith.constant 0 : i32
    %c0_i32_0 = arith.constant 0 : i32
    %c0_i32_1 = arith.constant 0 : i32
    return %c0_i32, %c0_i32_0 : i32, i32
  }
  func.func @transform_7(%arg0: i32, %arg1: i32) -> (i32, i32) {
    %c0_i32 = arith.constant 0 : i32
    %c0_i32_0 = arith.constant 0 : i32
    %c0_i32_1 = arith.constant 0 : i32
    return %c0_i32, %c0_i32_0 : i32, i32
  }
  func.func @transform_8(%arg0: i32, %arg1: i32) -> (i32, i32) {
    %c0_i32 = arith.constant 0 : i32
    %c0_i32_0 = arith.constant 0 : i32
    %c0_i32_1 = arith.constant 0 : i32
    return %c0_i32, %c0_i32_0 : i32, i32
  }
  func.func @transform_9(%arg0: i32, %arg1: i32) -> (i32, i32) {
    %c0_i32 = arith.constant 0 : i32
    %c0_i32_0 = arith.constant 0 : i32
    %c0_i32_1 = arith.constant 0 : i32
    return %c0_i32, %c0_i32_0 : i32, i32
  }
  func.func @transform_10(%arg0: i32, %arg1: i32) -> (i32, i32) {
    %c0_i32 = arith.constant 0 : i32
    %c0_i32_0 = arith.constant 0 : i32
    %c0_i32_1 = arith.constant 0 : i32
    return %c0_i32, %c0_i32_0 : i32, i32
  }
  func.func @transform_11(%arg0: i32, %arg1: i32) -> (i32, i32) {
    %c0_i32 = arith.constant 0 : i32
    %c0_i32_0 = arith.constant 0 : i32
    return %c0_i32, %arg1 : i32, i32
  }
  func.func @transform_12(%arg0: i32, %arg1: i32) -> (i32, i32) {
    %c0_i32 = arith.constant 0 : i32
    %c0_i32_0 = arith.constant 0 : i32
    return %c0_i32, %arg1 : i32, i32
  }
  func.func @transform_13(%arg0: i32, %arg1: i32) -> (i32, i32, i32) {
    %c0_i32 = arith.constant 0 : i32
    %c0_i32_0 = arith.constant 0 : i32
    return %arg0, %c0_i32, %arg1 : i32, i32, i32
  }
  func.func @transform_14(%arg0: i32, %arg1: i32) -> (i32, i32, i32) {
    %c0_i32 = arith.constant 0 : i32
    %c0_i32_0 = arith.constant 0 : i32
    %c0_i32_1 = arith.constant 0 : i32
    %c0_i32_2 = arith.constant 0 : i32
    return %c0_i32, %c0_i32_0, %c0_i32_1 : i32, i32, i32
  }
  func.func @transform_15(%arg0: i32, %arg1: i32) -> (i32, i32, i32) {
    %c0_i32 = arith.constant 0 : i32
    %c0_i32_0 = arith.constant 0 : i32
    %c0_i32_1 = arith.constant 0 : i32
    %c0_i32_2 = arith.constant 0 : i32
    return %c0_i32, %c0_i32_0, %c0_i32_1 : i32, i32, i32
  }
}

module attributes {stable_mosaic.version = 11 : i64} {
  func.func @decoder_kernel(%arg0: i32, %arg1: i32, %arg2: memref<1x8x128xf32, #tpu.memory_space<vmem>>, %arg3: memref<8x8x128xbf16, #tpu.memory_space<vmem>>, %arg4: memref<8x8x256xbf16, #tpu.memory_space<vmem>>, %arg5: memref<2x8x128xf32, #tpu.memory_space<vmem>>, %arg6: memref<2x8x128xf32, #tpu.memory_space<vmem>>, %arg7: memref<128x128xbf16, #tpu.memory_space<vmem>>, %arg8: memref<1x128xf32, #tpu.memory_space<vmem>>, %arg9: memref<512x512xbf16, #tpu.memory_space<vmem>>, %arg10: memref<1x512xf32, #tpu.memory_space<vmem>>, %arg11: memref<256x512xbf16, #tpu.memory_space<vmem>>, %arg12: memref<1x512xf32, #tpu.memory_space<vmem>>, %arg13: memref<128x512xbf16, #tpu.memory_space<vmem>>, %arg14: memref<1x512xf32, #tpu.memory_space<vmem>>, %arg15: memref<1x8x512xf32, #tpu.memory_space<vmem>>, %arg16: memref<2x8x128xf32, #tpu.memory_space<vmem>>, %arg17: memref<2x8x128xf32, #tpu.memory_space<vmem>>, %arg18: memref<2x8x128xf32, #tpu.memory_space<vmem>>, %arg19: memref<2x8x128xf32, #tpu.memory_space<vmem>>, %arg20: memref<8x128xbf16, #tpu.memory_space<vmem>>) attributes {dimension_semantics = [#tpu.dimension_semantics<arbitrary>, #tpu.dimension_semantics<arbitrary>], iteration_bounds = array<i64: 3, 1>, scalar_prefetch = 0 : i64, scratch_operands = 3 : i64, tpu.core_type = #tpu.core_type<tc>, window_params = [{transform_indices = @transform_0, window_bounds = array<i64: 1, 8, 128>}, {pipeline_mode = #tpu.pipeline_mode<synchronous>, transform_indices = @transform_1, window_bounds = array<i64: 8, 8, 128>}, {pipeline_mode = #tpu.pipeline_mode<synchronous>, transform_indices = @transform_2, window_bounds = array<i64: 8, 8, 256>}, {pipeline_mode = #tpu.pipeline_mode<synchronous>, transform_indices = @transform_3, window_bounds = array<i64: 2, 8, 128>}, {pipeline_mode = #tpu.pipeline_mode<synchronous>, transform_indices = @transform_4, window_bounds = array<i64: 2, 8, 128>}, {pipeline_mode = #tpu.pipeline_mode<synchronous>, transform_indices = @transform_5, window_bounds = array<i64: 128, 128>}, {pipeline_mode = #tpu.pipeline_mode<synchronous>, transform_indices = @transform_6, window_bounds = array<i64: 1, 128>}, {pipeline_mode = #tpu.pipeline_mode<synchronous>, transform_indices = @transform_7, window_bounds = array<i64: 512, 512>}, {pipeline_mode = #tpu.pipeline_mode<synchronous>, transform_indices = @transform_8, window_bounds = array<i64: 1, 512>}, {pipeline_mode = #tpu.pipeline_mode<synchronous>, transform_indices = @transform_9, window_bounds = array<i64: 256, 512>}, {pipeline_mode = #tpu.pipeline_mode<synchronous>, transform_indices = @transform_10, window_bounds = array<i64: 1, 512>}, {transform_indices = @transform_11, window_bounds = array<i64: 128, 512>}, {transform_indices = @transform_12, window_bounds = array<i64: 1, 512>}, {transform_indices = @transform_13, window_bounds = array<i64: 1, 8, 512>}, {pipeline_mode = #tpu.pipeline_mode<synchronous>, transform_indices = @transform_14, window_bounds = array<i64: 2, 8, 128>}, {pipeline_mode = #tpu.pipeline_mode<synchronous>, transform_indices = @transform_15, window_bounds = array<i64: 2, 8, 128>}]} {
    %c0_i32 = arith.constant 0 : i32
    %0 = arith.cmpi eq, %arg0, %c0_i32 : i32
    %c0_i32_0 = arith.constant 0 : i32
    %1 = arith.cmpi eq, %arg1, %c0_i32_0 : i32
    %2 = arith.andi %0, %1 : i1
    %3 = arith.extui %2 : i1 to i32
    %c0_i32_1 = arith.constant 0 : i32
    %4 = arith.cmpi ne, %3, %c0_i32_1 : i32
    scf.if %4 {
      %c0_12 = arith.constant 0 : index
      %c0_13 = arith.constant 0 : index
      %c0_14 = arith.constant 0 : index
      %17 = vector.load %arg5[%c0_12, %c0_13, %c0_14] : memref<2x8x128xf32, #tpu.memory_space<vmem>>, vector<2x8x128xf32>
      %c0_15 = arith.constant 0 : index
      %c0_16 = arith.constant 0 : index
      %c0_17 = arith.constant 0 : index
      %18 = vector.load %arg18[%c0_15, %c0_16, %c0_17] : memref<2x8x128xf32, #tpu.memory_space<vmem>>, vector<2x8x128xf32>
      tpu.vector_store %arg18[%c0_15, %c0_16, %c0_17], %17 {strides = array<i32>} : memref<2x8x128xf32, #tpu.memory_space<vmem>>, vector<2x8x128xf32>,
      %c0_18 = arith.constant 0 : index
      %c0_19 = arith.constant 0 : index
      %c0_20 = arith.constant 0 : index
      %19 = vector.load %arg6[%c0_18, %c0_19, %c0_20] : memref<2x8x128xf32, #tpu.memory_space<vmem>>, vector<2x8x128xf32>
      %c0_21 = arith.constant 0 : index
      %c0_22 = arith.constant 0 : index
      %c0_23 = arith.constant 0 : index
      %20 = vector.load %arg19[%c0_21, %c0_22, %c0_23] : memref<2x8x128xf32, #tpu.memory_space<vmem>>, vector<2x8x128xf32>
      tpu.vector_store %arg19[%c0_21, %c0_22, %c0_23], %19 {strides = array<i32>} : memref<2x8x128xf32, #tpu.memory_space<vmem>>, vector<2x8x128xf32>,
    } else {
    }
    %c0_i32_2 = arith.constant 0 : i32
    %5 = arith.cmpi eq, %arg1, %c0_i32_2 : i32
    %6 = arith.extui %5 : i1 to i32
    %c0_i32_3 = arith.constant 0 : i32
    %7 = arith.cmpi ne, %6, %c0_i32_3 : i32
    scf.if %7 {
      %c0_12 = arith.constant 0 : index
      %c0_13 = arith.constant 0 : index
      %c0_14 = arith.constant 0 : index
      %17 = vector.load %arg18[%c0_12, %c0_13, %c0_14] : memref<2x8x128xf32, #tpu.memory_space<vmem>>, vector<1x8x128xf32>
      %18 = vector.shape_cast %17 : vector<1x8x128xf32> to vector<8x128xf32>
      %c1 = arith.constant 1 : index
      %c0_15 = arith.constant 0 : index
      %c0_16 = arith.constant 0 : index
      %19 = vector.load %arg18[%c1, %c0_15, %c0_16] : memref<2x8x128xf32, #tpu.memory_space<vmem>>, vector<1x8x128xf32>
      %20 = vector.shape_cast %19 : vector<1x8x128xf32> to vector<8x128xf32>
      %c0_17 = arith.constant 0 : index
      %c0_18 = arith.constant 0 : index
      %c0_19 = arith.constant 0 : index
      %21 = vector.load %arg19[%c0_17, %c0_18, %c0_19] : memref<2x8x128xf32, #tpu.memory_space<vmem>>, vector<1x8x128xf32>
      %22 = vector.shape_cast %21 : vector<1x8x128xf32> to vector<8x128xf32>
      %c1_20 = arith.constant 1 : index
      %c0_21 = arith.constant 0 : index
      %c0_22 = arith.constant 0 : index
      %23 = vector.load %arg19[%c1_20, %c0_21, %c0_22] : memref<2x8x128xf32, #tpu.memory_space<vmem>>, vector<1x8x128xf32>
      %24 = vector.shape_cast %23 : vector<1x8x128xf32> to vector<8x128xf32>
      %25 = arith.truncf %20 : vector<8x128xf32> to vector<8x128xbf16>
      %c0_23 = arith.constant 0 : index
      %c0_24 = arith.constant 0 : index
      %26 = vector.load %arg7[%c0_23, %c0_24] : memref<128x128xbf16, #tpu.memory_space<vmem>>, vector<128x128xbf16>
      %cst_25 = arith.constant dense<0.000000e+00> : vector<8x128xf32>
      %27 = tpu.matmul %25, %26, %cst_25 {dimension_numbers = #tpu.dot_dimension_numbers<[1], [0], [0], [1], [0, 0, 1, 1], [], []>} : vector<8x128xbf16>, vector<128x128xbf16>, vector<8x128xf32> -> vector<8x128xf32>
      %c0_26 = arith.constant 0 : index
      %c0_27 = arith.constant 0 : index
      %c0_28 = arith.constant 0 : index
      %28 = vector.load %arg3[%c0_26, %c0_27, %c0_28] : memref<8x8x128xbf16, #tpu.memory_space<vmem>>, vector<8x8x128xbf16>
      %29 = arith.extf %28 : vector<8x8x128xbf16> to vector<8x8x128xf32>
      %30 = vector.shape_cast %27 : vector<8x128xf32> to vector<8x1x128xf32>
      %31 = vector.broadcast %30 : vector<8x1x128xf32> to vector<8x8x128xf32>
      %32 = arith.addf %29, %31 : vector<8x8x128xf32>
      %33 = math.tanh %32 : vector<8x8x128xf32>
      %c0_29 = arith.constant 0 : index
      %c0_30 = arith.constant 0 : index
      %34 = vector.load %arg8[%c0_29, %c0_30] : memref<1x128xf32, #tpu.memory_space<vmem>>, vector<1x128xf32>
      %35 = vector.shape_cast %34 : vector<1x128xf32> to vector<1x1x128xf32>
      %36 = vector.broadcast %35 : vector<1x1x128xf32> to vector<8x8x128xf32>
      %37 = arith.mulf %33, %36 : vector<8x8x128xf32>
      %cst_31 = arith.constant dense<0.000000e+00> : vector<8x8xf32>
      %38 = vector.multi_reduction <add>, %37, %cst_31 [2] : vector<8x8x128xf32> to vector<8x8xf32>
      %cst_32 = arith.constant dense<0xFF800000> : vector<8xf32>
      %39 = vector.multi_reduction <maximumf>, %38, %cst_32 [1] : vector<8x8xf32> to vector<8xf32>
      %40 = vector.shape_cast %39 : vector<8xf32> to vector<8x1xf32>
      %41 = vector.broadcast %40 : vector<8x1xf32> to vector<8x8xf32>
      %42 = arith.subf %38, %41 : vector<8x8xf32>
      %43 = math.exp %42 : vector<8x8xf32>
      %cst_33 = arith.constant dense<0.000000e+00> : vector<8xf32>
      %44 = vector.multi_reduction <add>, %43, %cst_33 [1] : vector<8x8xf32> to vector<8xf32>
      %45 = vector.shape_cast %44 : vector<8xf32> to vector<8x1xf32>
      %46 = vector.broadcast %45 : vector<8x1xf32> to vector<8x8xf32>
      %47 = arith.divf %43, %46 : vector<8x8xf32>
      %c0_34 = arith.constant 0 : index
      %c0_35 = arith.constant 0 : index
      %c0_36 = arith.constant 0 : index
      %48 = vector.load %arg4[%c0_34, %c0_35, %c0_36] : memref<8x8x256xbf16, #tpu.memory_space<vmem>>, vector<8x8x256xbf16>
      %49 = arith.extf %48 : vector<8x8x256xbf16> to vector<8x8x256xf32>
      %50 = vector.shape_cast %47 : vector<8x8xf32> to vector<8x8x1xf32>
      %51 = vector.broadcast %50 : vector<8x8x1xf32> to vector<8x8x256xf32>
      %52 = arith.mulf %51, %49 : vector<8x8x256xf32>
      %cst_37 = arith.constant dense<0.000000e+00> : vector<8x256xf32>
      %53 = vector.multi_reduction <add>, %52, %cst_37 [1] : vector<8x8x256xf32> to vector<8x256xf32>
      %c0_38 = arith.constant 0 : index
      %c0_39 = arith.constant 0 : index
      %c0_40 = arith.constant 0 : index
      %54 = vector.load %arg2[%c0_38, %c0_39, %c0_40] : memref<1x8x128xf32, #tpu.memory_space<vmem>>, vector<1x8x128xf32>
      %55 = vector.shape_cast %54 : vector<1x8x128xf32> to vector<8x128xf32>
      %56 = tpu.concatenate %55, %53, %18 in 1 : vector<8x128xf32>, vector<8x256xf32>, vector<8x128xf32> -> vector<8x512xf32>
      %57 = arith.truncf %56 : vector<8x512xf32> to vector<8x512xbf16>
      %c0_41 = arith.constant 0 : index
      %c0_42 = arith.constant 0 : index
      %58 = vector.load %arg9[%c0_41, %c0_42] : memref<512x512xbf16, #tpu.memory_space<vmem>>, vector<512x512xbf16>
      %cst_43 = arith.constant dense<0.000000e+00> : vector<8x512xf32>
      %59 = tpu.matmul %57, %58, %cst_43 {dimension_numbers = #tpu.dot_dimension_numbers<[1], [0], [0], [1], [0, 0, 1, 1], [], []>} : vector<8x512xbf16>, vector<512x512xbf16>, vector<8x512xf32> -> vector<8x512xf32>
      %c0_44 = arith.constant 0 : index
      %c0_45 = arith.constant 0 : index
      %60 = vector.load %arg10[%c0_44, %c0_45] : memref<1x512xf32, #tpu.memory_space<vmem>>, vector<1x512xf32>
      %61 = vector.broadcast %60 : vector<1x512xf32> to vector<8x512xf32>
      %62 = arith.addf %59, %61 : vector<8x512xf32>
      %63 = vector.extract_strided_slice %62 {offsets = [0, 0], sizes = [8, 128], strides = [1, 1]} : vector<8x512xf32> to vector<8x128xf32>
      %64 = arith.negf %63 : vector<8x128xf32>
      %65 = math.exp %64 : vector<8x128xf32>
      %cst_46 = arith.constant 1.000000e+00 : f32
      %66 = vector.broadcast %cst_46 : f32 to vector<8x128xf32>
      %67 = arith.addf %66, %65 : vector<8x128xf32>
      %68 = arith.divf %66, %67 : vector<8x128xf32>
      %69 = vector.extract_strided_slice %62 {offsets = [0, 128], sizes = [8, 128], strides = [1, 1]} : vector<8x512xf32> to vector<8x128xf32>
      %70 = arith.negf %69 : vector<8x128xf32>
      %71 = math.exp %70 : vector<8x128xf32>
      %cst_47 = arith.constant 1.000000e+00 : f32
      %72 = vector.broadcast %cst_47 : f32 to vector<8x128xf32>
      %73 = arith.addf %72, %71 : vector<8x128xf32>
      %74 = arith.divf %72, %73 : vector<8x128xf32>
      %75 = vector.extract_strided_slice %62 {offsets = [0, 256], sizes = [8, 128], strides = [1, 1]} : vector<8x512xf32> to vector<8x128xf32>
      %76 = math.tanh %75 : vector<8x128xf32>
      %77 = vector.extract_strided_slice %62 {offsets = [0, 384], sizes = [8, 128], strides = [1, 1]} : vector<8x512xf32> to vector<8x128xf32>
      %78 = arith.negf %77 : vector<8x128xf32>
      %79 = math.exp %78 : vector<8x128xf32>
      %cst_48 = arith.constant 1.000000e+00 : f32
      %80 = vector.broadcast %cst_48 : f32 to vector<8x128xf32>
      %81 = arith.addf %80, %79 : vector<8x128xf32>
      %82 = arith.divf %80, %81 : vector<8x128xf32>
      %83 = arith.mulf %74, %22 : vector<8x128xf32>
      %84 = arith.mulf %68, %76 : vector<8x128xf32>
      %85 = arith.addf %83, %84 : vector<8x128xf32>
      %86 = math.tanh %85 : vector<8x128xf32>
      %87 = arith.mulf %82, %86 : vector<8x128xf32>
      %88 = tpu.concatenate %87, %20 in 1 : vector<8x128xf32>, vector<8x128xf32> -> vector<8x256xf32>
      %89 = arith.truncf %88 : vector<8x256xf32> to vector<8x256xbf16>
      %c0_49 = arith.constant 0 : index
      %c0_50 = arith.constant 0 : index
      %90 = vector.load %arg11[%c0_49, %c0_50] : memref<256x512xbf16, #tpu.memory_space<vmem>>, vector<256x512xbf16>
      %cst_51 = arith.constant dense<0.000000e+00> : vector<8x512xf32>
      %91 = tpu.matmul %89, %90, %cst_51 {dimension_numbers = #tpu.dot_dimension_numbers<[1], [0], [0], [1], [0, 0, 1, 1], [], []>} : vector<8x256xbf16>, vector<256x512xbf16>, vector<8x512xf32> -> vector<8x512xf32>
      %c0_52 = arith.constant 0 : index
      %c0_53 = arith.constant 0 : index
      %92 = vector.load %arg12[%c0_52, %c0_53] : memref<1x512xf32, #tpu.memory_space<vmem>>, vector<1x512xf32>
      %93 = vector.broadcast %92 : vector<1x512xf32> to vector<8x512xf32>
      %94 = arith.addf %91, %93 : vector<8x512xf32>
      %95 = vector.extract_strided_slice %94 {offsets = [0, 0], sizes = [8, 128], strides = [1, 1]} : vector<8x512xf32> to vector<8x128xf32>
      %96 = arith.negf %95 : vector<8x128xf32>
      %97 = math.exp %96 : vector<8x128xf32>
      %cst_54 = arith.constant 1.000000e+00 : f32
      %98 = vector.broadcast %cst_54 : f32 to vector<8x128xf32>
      %99 = arith.addf %98, %97 : vector<8x128xf32>
      %100 = arith.divf %98, %99 : vector<8x128xf32>
      %101 = vector.extract_strided_slice %94 {offsets = [0, 128], sizes = [8, 128], strides = [1, 1]} : vector<8x512xf32> to vector<8x128xf32>
      %102 = arith.negf %101 : vector<8x128xf32>
      %103 = math.exp %102 : vector<8x128xf32>
      %cst_55 = arith.constant 1.000000e+00 : f32
      %104 = vector.broadcast %cst_55 : f32 to vector<8x128xf32>
      %105 = arith.addf %104, %103 : vector<8x128xf32>
      %106 = arith.divf %104, %105 : vector<8x128xf32>
      %107 = vector.extract_strided_slice %94 {offsets = [0, 256], sizes = [8, 128], strides = [1, 1]} : vector<8x512xf32> to vector<8x128xf32>
      %108 = math.tanh %107 : vector<8x128xf32>
      %109 = vector.extract_strided_slice %94 {offsets = [0, 384], sizes = [8, 128], strides = [1, 1]} : vector<8x512xf32> to vector<8x128xf32>
      %110 = arith.negf %109 : vector<8x128xf32>
      %111 = math.exp %110 : vector<8x128xf32>
      %cst_56 = arith.constant 1.000000e+00 : f32
      %112 = vector.broadcast %cst_56 : f32 to vector<8x128xf32>
      %113 = arith.addf %112, %111 : vector<8x128xf32>
      %114 = arith.divf %112, %113 : vector<8x128xf32>
      %115 = arith.mulf %106, %24 : vector<8x128xf32>
      %116 = arith.mulf %100, %108 : vector<8x128xf32>
      %117 = arith.addf %115, %116 : vector<8x128xf32>
      %118 = math.tanh %117 : vector<8x128xf32>
      %119 = arith.mulf %114, %118 : vector<8x128xf32>
      %c0_57 = arith.constant 0 : index
      %c0_58 = arith.constant 0 : index
      %c0_59 = arith.constant 0 : index
      %120 = vector.load %arg18[%c0_57, %c0_58, %c0_59] : memref<2x8x128xf32, #tpu.memory_space<vmem>>, vector<1x8x128xf32>
      %121 = vector.shape_cast %120 : vector<1x8x128xf32> to vector<8x128xf32>
      %122 = vector.shape_cast %87 : vector<8x128xf32> to vector<1x8x128xf32>
      tpu.vector_store %arg18[%c0_57, %c0_58, %c0_59], %122 {strides = array<i32>} : memref<2x8x128xf32, #tpu.memory_space<vmem>>, vector<1x8x128xf32>,
      %c1_60 = arith.constant 1 : index
      %c0_61 = arith.constant 0 : index
      %c0_62 = arith.constant 0 : index
      %123 = vector.load %arg18[%c1_60, %c0_61, %c0_62] : memref<2x8x128xf32, #tpu.memory_space<vmem>>, vector<1x8x128xf32>
      %124 = vector.shape_cast %123 : vector<1x8x128xf32> to vector<8x128xf32>
      %125 = vector.shape_cast %119 : vector<8x128xf32> to vector<1x8x128xf32>
      tpu.vector_store %arg18[%c1_60, %c0_61, %c0_62], %125 {strides = array<i32>} : memref<2x8x128xf32, #tpu.memory_space<vmem>>, vector<1x8x128xf32>,
      %c0_63 = arith.constant 0 : index
      %c0_64 = arith.constant 0 : index
      %c0_65 = arith.constant 0 : index
      %126 = vector.load %arg19[%c0_63, %c0_64, %c0_65] : memref<2x8x128xf32, #tpu.memory_space<vmem>>, vector<1x8x128xf32>
      %127 = vector.shape_cast %126 : vector<1x8x128xf32> to vector<8x128xf32>
      %128 = vector.shape_cast %85 : vector<8x128xf32> to vector<1x8x128xf32>
      tpu.vector_store %arg19[%c0_63, %c0_64, %c0_65], %128 {strides = array<i32>} : memref<2x8x128xf32, #tpu.memory_space<vmem>>, vector<1x8x128xf32>,
      %c1_66 = arith.constant 1 : index
      %c0_67 = arith.constant 0 : index
      %c0_68 = arith.constant 0 : index
      %129 = vector.load %arg19[%c1_66, %c0_67, %c0_68] : memref<2x8x128xf32, #tpu.memory_space<vmem>>, vector<1x8x128xf32>
      %130 = vector.shape_cast %129 : vector<1x8x128xf32> to vector<8x128xf32>
      %131 = vector.shape_cast %117 : vector<8x128xf32> to vector<1x8x128xf32>
      tpu.vector_store %arg19[%c1_66, %c0_67, %c0_68], %131 {strides = array<i32>} : memref<2x8x128xf32, #tpu.memory_space<vmem>>, vector<1x8x128xf32>,
      %132 = arith.truncf %119 : vector<8x128xf32> to vector<8x128xbf16>
      %c0_69 = arith.constant 0 : index
      %c0_70 = arith.constant 0 : index
      %133 = vector.load %arg20[%c0_69, %c0_70] : memref<8x128xbf16, #tpu.memory_space<vmem>>, vector<8x128xbf16>
      tpu.vector_store %arg20[%c0_69, %c0_70], %132 {strides = array<i32>} : memref<8x128xbf16, #tpu.memory_space<vmem>>, vector<8x128xbf16>,
      %c0_71 = arith.constant 0 : index
      %c0_72 = arith.constant 0 : index
      %c0_73 = arith.constant 0 : index
      %134 = vector.load %arg16[%c0_71, %c0_72, %c0_73] : memref<2x8x128xf32, #tpu.memory_space<vmem>>, vector<1x8x128xf32>
      %135 = vector.shape_cast %134 : vector<1x8x128xf32> to vector<8x128xf32>
      %136 = vector.shape_cast %87 : vector<8x128xf32> to vector<1x8x128xf32>
      tpu.vector_store %arg16[%c0_71, %c0_72, %c0_73], %136 {strides = array<i32>} : memref<2x8x128xf32, #tpu.memory_space<vmem>>, vector<1x8x128xf32>,
      %c1_74 = arith.constant 1 : index
      %c0_75 = arith.constant 0 : index
      %c0_76 = arith.constant 0 : index
      %137 = vector.load %arg16[%c1_74, %c0_75, %c0_76] : memref<2x8x128xf32, #tpu.memory_space<vmem>>, vector<1x8x128xf32>
      %138 = vector.shape_cast %137 : vector<1x8x128xf32> to vector<8x128xf32>
      %139 = vector.shape_cast %119 : vector<8x128xf32> to vector<1x8x128xf32>
      tpu.vector_store %arg16[%c1_74, %c0_75, %c0_76], %139 {strides = array<i32>} : memref<2x8x128xf32, #tpu.memory_space<vmem>>, vector<1x8x128xf32>,
      %c0_77 = arith.constant 0 : index
      %c0_78 = arith.constant 0 : index
      %c0_79 = arith.constant 0 : index
      %140 = vector.load %arg17[%c0_77, %c0_78, %c0_79] : memref<2x8x128xf32, #tpu.memory_space<vmem>>, vector<1x8x128xf32>
      %141 = vector.shape_cast %140 : vector<1x8x128xf32> to vector<8x128xf32>
      %142 = vector.shape_cast %85 : vector<8x128xf32> to vector<1x8x128xf32>
      tpu.vector_store %arg17[%c0_77, %c0_78, %c0_79], %142 {strides = array<i32>} : memref<2x8x128xf32, #tpu.memory_space<vmem>>, vector<1x8x128xf32>,
      %c1_80 = arith.constant 1 : index
      %c0_81 = arith.constant 0 : index
      %c0_82 = arith.constant 0 : index
      %143 = vector.load %arg17[%c1_80, %c0_81, %c0_82] : memref<2x8x128xf32, #tpu.memory_space<vmem>>, vector<1x8x128xf32>
      %144 = vector.shape_cast %143 : vector<1x8x128xf32> to vector<8x128xf32>
      %145 = vector.shape_cast %117 : vector<8x128xf32> to vector<1x8x128xf32>
      tpu.vector_store %arg17[%c1_80, %c0_81, %c0_82], %145 {strides = array<i32>} : memref<2x8x128xf32, #tpu.memory_space<vmem>>, vector<1x8x128xf32>,
    } else {
    }
    %c0 = arith.constant 0 : index
    %c0_4 = arith.constant 0 : index
    %8 = vector.load %arg20[%c0, %c0_4] : memref<8x128xbf16, #tpu.memory_space<vmem>>, vector<8x128xbf16>
    %c0_5 = arith.constant 0 : index
    %c0_6 = arith.constant 0 : index
    %9 = vector.load %arg13[%c0_5, %c0_6] : memref<128x512xbf16, #tpu.memory_space<vmem>>, vector<128x512xbf16>
    %cst = arith.constant dense<0.000000e+00> : vector<8x512xf32>
    %10 = tpu.matmul %8, %9, %cst {dimension_numbers = #tpu.dot_dimension_numbers<[1], [0], [0], [1], [0, 0, 1, 1], [], []>} : vector<8x128xbf16>, vector<128x512xbf16>, vector<8x512xf32> -> vector<8x512xf32>
    %c0_7 = arith.constant 0 : index
    %c0_8 = arith.constant 0 : index
    %11 = vector.load %arg14[%c0_7, %c0_8] : memref<1x512xf32, #tpu.memory_space<vmem>>, vector<1x512xf32>
    %12 = vector.broadcast %11 : vector<1x512xf32> to vector<8x512xf32>
    %13 = arith.addf %10, %12 : vector<8x512xf32>
    %c0_9 = arith.constant 0 : index
    %c0_10 = arith.constant 0 : index
    %c0_11 = arith.constant 0 : index
    %14 = vector.load %arg15[%c0_9, %c0_10, %c0_11] : memref<1x8x512xf32, #tpu.memory_space<vmem>>, vector<1x8x512xf32>
    %15 = vector.shape_cast %14 : vector<1x8x512xf32> to vector<8x512xf32>
    %16 = vector.shape_cast %13 : vector<8x512xf32> to vector<1x8x512xf32>
    tpu.vector_store %arg15[%c0_9, %c0_10, %c0_11], %16 {strides = array<i32>} : memref<1x8x512xf32, #tpu.memory_space<vmem>>, vector<1x8x512xf32>,
    return
  }
  func.func @transform_0(%arg0: i32, %arg1: i32) -> (i32, i32, i32) {
    %c0_i32 = arith.constant 0 : i32
    %c0_i32_0 = arith.constant 0 : i32
    %c0_i32_1 = arith.constant 0 : i32
    return %arg0, %c0_i32, %c0_i32_0 : i32, i32, i32
  }
  func.func @transform_1(%arg0: i32, %arg1: i32) -> (i32, i32, i32) {
    %c0_i32 = arith.constant 0 : i32
    %c0_i32_0 = arith.constant 0 : i32
    %c0_i32_1 = arith.constant 0 : i32
    %c0_i32_2 = arith.constant 0 : i32
    return %c0_i32, %c0_i32_0, %c0_i32_1 : i32, i32, i32
  }
  func.func @transform_2(%arg0: i32, %arg1: i32) -> (i32, i32, i32) {
    %c0_i32 = arith.constant 0 : i32
    %c0_i32_0 = arith.constant 0 : i32
    %c0_i32_1 = arith.constant 0 : i32
    %c0_i32_2 = arith.constant 0 : i32
    return %c0_i32, %c0_i32_0, %c0_i32_1 : i32, i32, i32
  }
  func.func @transform_3(%arg0: i32, %arg1: i32) -> (i32, i32, i32) {
    %c0_i32 = arith.constant 0 : i32
    %c0_i32_0 = arith.constant 0 : i32
    %c0_i32_1 = arith.constant 0 : i32
    %c0_i32_2 = arith.constant 0 : i32
    return %c0_i32, %c0_i32_0, %c0_i32_1 : i32, i32, i32
  }
  func.func @transform_4(%arg0: i32, %arg1: i32) -> (i32, i32, i32) {
    %c0_i32 = arith.constant 0 : i32
    %c0_i32_0 = arith.constant 0 : i32
    %c0_i32_1 = arith.constant 0 : i32
    %c0_i32_2 = arith.constant 0 : i32
    return %c0_i32, %c0_i32_0, %c0_i32_1 : i32, i32, i32
  }
  func.func @transform_5(%arg0: i32, %arg1: i32) -> (i32, i32) {
    %c0_i32 = arith.constant 0 : i32
    %c0_i32_0 = arith.constant 0 : i32
    %c0_i32_1 = arith.constant 0 : i32
    return %c0_i32, %c0_i32_0 : i32, i32
  }
  func.func @transform_6(%arg0: i32, %arg1: i32) -> (i32, i32) {
    %c0_i32 = arith.constant 0 : i32
    %c0_i32_0 = arith.constant 0 : i32
    %c0_i32_1 = arith.constant 0 : i32
    return %c0_i32, %c0_i32_0 : i32, i32
  }
  func.func @transform_7(%arg0: i32, %arg1: i32) -> (i32, i32) {
    %c0_i32 = arith.constant 0 : i32
    %c0_i32_0 = arith.constant 0 : i32
    %c0_i32_1 = arith.constant 0 : i32
    return %c0_i32, %c0_i32_0 : i32, i32
  }
  func.func @transform_8(%arg0: i32, %arg1: i32) -> (i32, i32) {
    %c0_i32 = arith.constant 0 : i32
    %c0_i32_0 = arith.constant 0 : i32
    %c0_i32_1 = arith.constant 0 : i32
    return %c0_i32, %c0_i32_0 : i32, i32
  }
  func.func @transform_9(%arg0: i32, %arg1: i32) -> (i32, i32) {
    %c0_i32 = arith.constant 0 : i32
    %c0_i32_0 = arith.constant 0 : i32
    %c0_i32_1 = arith.constant 0 : i32
    return %c0_i32, %c0_i32_0 : i32, i32
  }
  func.func @transform_10(%arg0: i32, %arg1: i32) -> (i32, i32) {
    %c0_i32 = arith.constant 0 : i32
    %c0_i32_0 = arith.constant 0 : i32
    %c0_i32_1 = arith.constant 0 : i32
    return %c0_i32, %c0_i32_0 : i32, i32
  }
  func.func @transform_11(%arg0: i32, %arg1: i32) -> (i32, i32) {
    %c0_i32 = arith.constant 0 : i32
    %c0_i32_0 = arith.constant 0 : i32
    return %c0_i32, %arg1 : i32, i32
  }
  func.func @transform_12(%arg0: i32, %arg1: i32) -> (i32, i32) {
    %c0_i32 = arith.constant 0 : i32
    %c0_i32_0 = arith.constant 0 : i32
    return %c0_i32, %arg1 : i32, i32
  }
  func.func @transform_13(%arg0: i32, %arg1: i32) -> (i32, i32, i32) {
    %c0_i32 = arith.constant 0 : i32
    %c0_i32_0 = arith.constant 0 : i32
    return %arg0, %c0_i32, %arg1 : i32, i32, i32
  }
  func.func @transform_14(%arg0: i32, %arg1: i32) -> (i32, i32, i32) {
    %c0_i32 = arith.constant 0 : i32
    %c0_i32_0 = arith.constant 0 : i32
    %c0_i32_1 = arith.constant 0 : i32
    %c0_i32_2 = arith.constant 0 : i32
    return %c0_i32, %c0_i32_0, %c0_i32_1 : i32, i32, i32
  }
  func.func @transform_15(%arg0: i32, %arg1: i32) -> (i32, i32, i32) {
    %c0_i32 = arith.constant 0 : i32
    %c0_i32_0 = arith.constant 0 : i32
    %c0_i32_1 = arith.constant 0 : i32
    %c0_i32_2 = arith.constant 0 : i32
    return %c0_i32, %c0_i32_0, %c0_i32_1 : i32, i32, i32
  }
}

</mosaic_0001>

<bundles_post_ra>
// kernel: tpu_custom_call.1
= control target key start
LH: loop header
LB: loop body
LE: loop exit
PB: predicated region body
PF: predicated region fallthrough
CT: control target
= control target key end

     0   :  { %s5544_s0 = inlined_call_operand.hbm [shape: f32[3,8,128], index: 0, kind: input, shape index: {}]   ;;  %s5545_s1 = inlined_call_operand.vmem [shape: bf16[8,8,128], index: 1, kind: input, shape index: {}]   ;;  %s5546_s2 = inlined_call_operand.vmem [shape: bf16[8,8,256], index: 2, kind: input, shape index: {}]   ;;  %s5547_s3 = inlined_call_operand.hbm [shape: f32[2,8,128], index: 3, kind: input, shape index: {}, may-alias: {3,14}]   ;;  %s5548_s4 = inlined_call_operand.hbm [shape: f32[2,8,128], index: 4, kind: input, shape index: {}, may-alias: {4,15}]   ;;  %s5549_s5 = inlined_call_operand.hbm [shape: bf16[128,128], index: 5, kind: input, shape index: {}]   ;;  %s5550_s6 = inlined_call_operand.vmem [shape: f32[1,128], index: 6, kind: input, shape index: {}]   ;;  %s5551_s7 = inlined_call_operand.hbm [shape: bf16[512,512], index: 7, kind: input, shape index: {}]   ;;  %s5552_s8 = inlined_call_operand.vmem [shape: f32[1,512], index: 8, kind: input, shape index: {}]   ;;  %s5553_s9 = inlined_call_operand.hbm [shape: bf16[256,512], index: 9, kind: input, shape index: {}]   ;;  %s5554_s10 = inlined_call_operand.hbm [shape: f32[1,512], index: 10, kind: input, shape index: {}]   ;;  %s5555_s11 = inlined_call_operand.hbm [shape: bf16[128,512], index: 11, kind: input, shape index: {}]   ;;  %s5556_s12 = inlined_call_operand.hbm [shape: f32[1,512], index: 12, kind: input, shape index: {}]   ;;  %s5557_s13 = inlined_call_operand.hbm [shape: f32[3,8,512], index: 13, kind: output, shape index: {0}]   ;;  %s5558_s14 = inlined_call_operand.hbm [shape: f32[2,8,128], index: 14, kind: output, shape index: {1}, may-alias: {3,14}]   ;;  %s5559_s15 = inlined_call_operand.hbm [shape: f32[2,8,128], index: 15, kind: output, shape index: {2}, may-alias: {4,15}]  }
   0x1   :  { %5576 = sst [smem:[#allocation32_spill]] %s5544_s0 }
   0x2   :  { %5577 = sst [smem:[#allocation33_spill]] %s5545_s1 }
   0x3   :  { %5578 = sst [smem:[#allocation34_spill]] %s5546_s2 }
   0x4   :  { %5579 = sst [smem:[#allocation35_spill]] %s5547_s3 }
   0x5   :  { %5580 = sst [smem:[#allocation36_spill]] %s5548_s4 }
   0x6   :  { %5581 = sst [smem:[#allocation37_spill]] %s5549_s5 }
   0x7   :  { %5582 = sst [smem:[#allocation38_spill]] %s5550_s6 }
   0x8   :  { %5583 = sst [smem:[#allocation39_spill]] %s5551_s7 }
   0x9   :  { %5584 = sst [smem:[#allocation40_spill]] %s5552_s8 }
   0xa   :  { %5585 = sst [smem:[#allocation41_spill]] %s5557_s13 }
   0xb   :  { %5586 = sst [smem:[#allocation42_spill]] %s5558_s14 }
   0xc   :  { %5587 = sst [smem:[#allocation43_spill]] %s5559_s15 }
   0xd   :  { %21 = vsyncpa [#allocation6], 0 }
   0xe   :  { %23 = vsyncpa [#allocation6 + $0x1], 0 }
   0xf   :  { %24 = vsyncpa [#allocation9], 0 }
  0x10   :  { %25 = vsyncpa [#allocation12], 0 }
  0x11   :  { %26 = vsyncpa [#allocation15], 0 }
  0x12   :  { %27 = vsyncpa [#allocation18], 0 }
  0x13   :  { %28 = vsyncpa [#allocation7], 0 }
  0x14   :  { %30 = vsyncpa [#allocation7 + $0x1], 0 }
  0x15   :  { %31 = vsyncpa [#allocation22], 0  ;;  %s4878_s18 = smov 0   ;;  %s4880_s19 = smov 0  }
  0x16   :  { %s4882_s20 = smov 0   ;;  %s4884_s21 = smov 0  }
  0x17   :  { %s4886_s22 = smov 0   ;;  %s4888_s23 = smov 0  }
  0x18 LB: > { %5588 = sst [smem:[#allocation31_spill]] %s4764_s21  ;;  %s5560_s24 = sadd.s32 4294967295, %s4772_s23   ;;  %s4772_s23 = sphi %s4888_s23, %s37_s23   ;;  %s4768_s22 = sphi %s4886_s22, %s5627_s22   ;;  %s4764_s21 = sphi %s4884_s21, %s5626_s21   ;;  %s4760_s20 = sphi %s4882_s20, %s5625_s20   ;;  %s4756_s19 = sphi %s4880_s19, %s5624_s19   ;;  %s4752_s18 = sphi %s4878_s18, %s5623_s18  }
  0x19   : > { %p3435_p0 = scmp.ge.s32.totalorder %s4772_s23, 1  ;;  %p4912_p1 = scmp.eq.s32.totalorder %s5560_s24, 0 }
  0x1a   : > { %p412_p2 = scmp.lt.s32.totalorder %s4772_s23, 4  ;;  %s4774_s27 = smov [#allocation8]  }
  0x1b   : > { %s5589_s25 = scalar_select %p4912_p1, 1, 0 }
  0x1c   : > { %p4917_p3 = pnand %p3435_p0, %p412_p2  ;;  %s430_s28 = sshll.u32 %s4774_s27, 4  ;;  %s431_s28 = int_to_ptr.vmem [resolvable:$true] %s430_s28 }
  0x1d   : > { %s4775_s30 = smov [#allocation11]   ;;  %s5592_s3 = sld [smem:[#allocation35_spill]] }
  0x1e   : > { %s5590_s26 = scalar_select %p4917_p3, 1, 0 }
  0x1f   : > { %p3813_p4 = pneg %p4917_p3  ;;  %s456_s16 = sshll.u32 %s4775_s30, 4  ;;  %s4929_s16 = int_to_ptr.vmem [resolvable:$true] %s456_s16 }
  0x21   : > { %p4925_p5 = pnand %p3813_p4, %p4912_p1 }
  0x23   : > { %s4364_s13 = scalar_lea.hbm %s5592_s3, 256  ;;  %p4939_p7 = pneg %p4925_p5 }
  0x24   : > { %p4365_p6 = scmp.ne.s32.totalorder %s5592_s3, %s4364_s13  ;;  %p4371_p10 = scmp.lt.u32.totalorder %s4364_s13, %s5592_s3 }
  0x26   : > { %p4367_p8 = pnand %p4939_p7, %p4365_p6 }
  0x28   : > { %p4368_p9 = pneg %p4367_p8 }
  0x2a   : > { %p4373_p11 = pnand %p4371_p10, %p4368_p9 }
  0x2c   : > { %4376 = shalt.err (!%p4373_p11)
}
  0x2d   : > { %s4377_s24 = scalar_lea.vmem %s431_s28, 256  ;;  %p4385_p2 = scmp.lt.s32.totalorder %s431_s28, %s431_s28 }
  0x2e   : > { %p4378_p12 = scmp.ne.s32.totalorder %s431_s28, %s4377_s24  ;;  %p4386_p4 = scmp.lt.s32.totalorder %s4377_s24, %s4377_s24 }
  0x30   : > { %p4380_p13 = pnand %p4378_p12, %p4939_p7  ;;  %p4387_p3 = por %p4386_p4, %p4385_p2 }
  0x32   : > { %p4381_p0 = pneg %p4380_p13 }
  0x34   : > { %p4388_p1 = pnand %p4387_p3, %p4381_p0 }
  0x36   : > { %4391 = shalt.err (!%p4388_p1)
}
  0x37   : > { %s5569_s14 = smov 128   ;;  %s5570_s15 = smov 8  }
  0x38   : > { %3816 = dma.hbm_to_vmem [thread:$0]  (!%p4925_p5), %s5592_s3, 256, %s431_s28, [#allocation9], %s5569_s14, %s5569_s14, %s5570_s15  }
  0x39   : > { %s5594_s5 = sld [smem:[#allocation37_spill]] }
  0x3f   : > { %s4392_s2 = scalar_lea.hbm %s5594_s5, 1024 }
  0x40   : > { %p4393_p1 = scmp.ne.s32.totalorder %s5594_s5, %s4392_s2  ;;  %p4399_p8 = scmp.lt.u32.totalorder %s4392_s2, %s5594_s5 }
  0x42   : > { %p4395_p3 = pnand %p4393_p1, %p4939_p7 }
  0x44   : > { %p4396_p6 = pneg %p4395_p3 }
  0x46   : > { %p4401_p9 = pnand %p4399_p8, %p4396_p6 }
  0x48   : > { %4404 = shalt.err (!%p4401_p9)
}
  0x49   : > { %s4405_s28 = scalar_lea.vmem %s4929_s16, 1024  ;;  %p4413_p13 = scmp.lt.s32.totalorder %s4929_s16, %s4929_s16 }
  0x4a   : > { %p4406_p10 = scmp.ne.s32.totalorder %s4929_s16, %s4405_s28  ;;  %p4414_p0 = scmp.lt.s32.totalorder %s4405_s28, %s4405_s28 }
  0x4c   : > { %p4408_p11 = pnand %p4406_p10, %p4939_p7  ;;  %p4415_p2 = por %p4414_p0, %p4413_p13 }
  0x4e   : > { %p4409_p12 = pneg %p4408_p11 }
  0x50   : > { %p4416_p4 = pnand %p4415_p2, %p4409_p12 }
  0x52   : > { %4419 = shalt.err (!%p4416_p4)
}
  0x53   : > { %s4778_s6 = smov 64   ;;  %s4779_s1 = smov 4  }
  0x54   : > { %3822 = dma.hbm_to_vmem [thread:$0]  (!%p4925_p5), %s5594_s5, 1024, %s4929_s16, [#allocation12], %s4778_s6, %s4778_s6, %s4779_s1  }
  0x55   : > { %s4780_s8 = smov [#allocation14]   ;;  %s4781_s17 = smov [#allocation17]  }
  0x56   : > { %s488_s13 = sshll.u32 %s4780_s8, 4  ;;  %s515_s30 = sshll.u32 %s4781_s17, 4  ;;  %s489_s13 = int_to_ptr.vmem [resolvable:$true] %s488_s13  ;;  %s4981_s30 = int_to_ptr.vmem [resolvable:$true] %s515_s30 }
  0x57   : > { %s4420_s14 = scalar_lea.hbm %s5553_s9, 8192 }
  0x58   : > { %p4421_p1 = scmp.ne.s32.totalorder %s5553_s9, %s4420_s14  ;;  %p4427_p8 = scmp.lt.u32.totalorder %s4420_s14, %s5553_s9 }
  0x5a   : > { %p4423_p3 = pnand %p4421_p1, %p4939_p7 }
  0x5c   : > { %p4424_p6 = pneg %p4423_p3 }
  0x5e   : > { %p4429_p9 = pnand %p4427_p8, %p4424_p6 }
  0x60   : > { %4432 = shalt.err (!%p4429_p9)
}
  0x61   : > { %s4433_s6 = scalar_lea.vmem %s489_s13, 8192  ;;  %p4441_p13 = scmp.lt.s32.totalorder %s489_s13, %s489_s13 }
  0x62   : > { %p4434_p10 = scmp.ne.s32.totalorder %s489_s13, %s4433_s6  ;;  %p4442_p0 = scmp.lt.s32.totalorder %s4433_s6, %s4433_s6 }
  0x64   : > { %p4436_p11 = pnand %p4434_p10, %p4939_p7  ;;  %p4443_p2 = por %p4442_p0, %p4441_p13 }
  0x66   : > { %p4437_p12 = pneg %p4436_p11 }
  0x68   : > { %p4444_p4 = pnand %p4443_p2, %p4437_p12 }
  0x6a   : > { %4447 = shalt.err (!%p4444_p4)
}
  0x6b   : > { %s5571_s3 = smov 256   ;;  %s4783_s15 = smov 16  }
  0x6c   : > { %3828 = dma.hbm_to_vmem [thread:$0]  (!%p4925_p5), %s5553_s9, 8192, %s489_s13, [#allocation15], %s5571_s3, %s5571_s3, %s4783_s15  }
  0x6d   : > { %s4448_s17 = scalar_lea.hbm %s5555_s11, 4096 }
  0x6e   : > { %p4449_p1 = scmp.ne.s32.totalorder %s5555_s11, %s4448_s17  ;;  %p4455_p8 = scmp.lt.u32.totalorder %s4448_s17, %s5555_s11 }
  0x70   : > { %p4451_p3 = pnand %p4449_p1, %p4939_p7 }
  0x72   : > { %p4452_p6 = pneg %p4451_p3 }
  0x74   : > { %p4457_p9 = pnand %p4455_p8, %p4452_p6 }
  0x76   : > { %4460 = shalt.err (!%p4457_p9)
}
  0x77   : > { %s4461_s13 = scalar_lea.vmem %s4981_s30, 4096  ;;  %p4469_p13 = scmp.lt.s32.totalorder %s4981_s30, %s4981_s30 }
  0x78   : > { %p4462_p10 = scmp.ne.s32.totalorder %s4981_s30, %s4461_s13  ;;  %p4470_p0 = scmp.lt.s32.totalorder %s4461_s13, %s4461_s13 }
  0x7a   : > { %p4464_p11 = pnand %p4462_p10, %p4939_p7  ;;  %p4471_p2 = por %p4470_p0, %p4469_p13 }
  0x7c   : > { %p4465_p12 = pneg %p4464_p11 }
  0x7e   : > { %p4472_p4 = pnand %p4471_p2, %p4465_p12 }
  0x80   : > { %4475 = shalt.err (!%p4472_p4)
}
  0x81   : > { %3834 = dma.hbm_to_vmem [thread:$0]  (!%p4925_p5), %s5555_s11, 4096, %s4981_s30, [#allocation18], %s5571_s3, %s5571_s3, %s4783_s15  }
  0x82   : > { %s4784_s1 = smov [#allocation10]   ;;  %s4785_s8 = smov [#allocation13]  }
  0x83   : > { %s443_s21 = sshll.u32 %s4784_s1, 4  ;;  %s472_s17 = sshll.u32 %s4785_s8, 4  ;;  %s444_s21 = int_to_ptr.vmem [resolvable:$true] %s443_s21  ;;  %s5030_s17 = int_to_ptr.vmem [resolvable:$true] %s472_s17 }
  0x84   : > { %s5595_s4 = sld [smem:[#allocation36_spill]] }
  0x8a   : > { %s4476_s2 = scalar_lea.hbm %s5595_s4, 256 }
  0x8b   : > { %p4477_p1 = scmp.ne.s32.totalorder %s5595_s4, %s4476_s2  ;;  %p4483_p8 = scmp.lt.u32.totalorder %s4476_s2, %s5595_s4 }
  0x8d   : > { %p4479_p3 = pnand %p4477_p1, %p4939_p7 }
  0x8f   : > { %p4480_p6 = pneg %p4479_p3 }
  0x91   : > { %p4485_p9 = pnand %p4483_p8, %p4480_p6 }
  0x93   : > { %4488 = shalt.err (!%p4485_p9)
}
  0x94   : > { %s4489_s14 = scalar_lea.vmem %s444_s21, 256  ;;  %p4497_p13 = scmp.lt.s32.totalorder %s444_s21, %s444_s21 }
  0x95   : > { %p4490_p10 = scmp.ne.s32.totalorder %s444_s21, %s4489_s14  ;;  %p4498_p0 = scmp.lt.s32.totalorder %s4489_s14, %s4489_s14 }
  0x97   : > { %p4492_p11 = pnand %p4490_p10, %p4939_p7  ;;  %p4499_p2 = por %p4498_p0, %p4497_p13 }
  0x99   : > { %p4493_p12 = pneg %p4492_p11 }
  0x9b   : > { %p4500_p4 = pnand %p4499_p2, %p4493_p12 }
  0x9d   : > { %4503 = shalt.err (!%p4500_p4)
}
  0x9e   : > { %s5596_s1 = smov 8   ;;  %s5597_s8 = smov 128  }
  0x9f   : > { %3819 = dma.hbm_to_vmem [thread:$0]  (!%p4925_p5), %s5595_s4, 256, %s444_s21, [#allocation9], %s5597_s8, %s5597_s8, %s5596_s1  }
  0xa0   : > { %s5598_s7 = sld [smem:[#allocation39_spill]] }
  0xa6   : > { %s4504_s13 = scalar_lea.hbm %s5598_s7, 16384 }
  0xa7   : > { %p4505_p1 = scmp.ne.s32.totalorder %s5598_s7, %s4504_s13  ;;  %p4511_p8 = scmp.lt.u32.totalorder %s4504_s13, %s5598_s7 }
  0xa9   : > { %p4507_p3 = pnand %p4505_p1, %p4939_p7 }
  0xab   : > { %p4508_p6 = pneg %p4507_p3 }
  0xad   : > { %p4513_p9 = pnand %p4511_p8, %p4508_p6 }
  0xaf   : > { %4516 = shalt.err (!%p4513_p9)
}
  0xb0   : > { %s4517_s21 = scalar_lea.vmem %s5030_s17, 16384  ;;  %p4525_p13 = scmp.lt.s32.totalorder %s5030_s17, %s5030_s17 }
  0xb1   : > { %p4518_p10 = scmp.ne.s32.totalorder %s5030_s17, %s4517_s21  ;;  %p4526_p0 = scmp.lt.s32.totalorder %s4517_s21, %s4517_s21 }
  0xb3   : > { %p4520_p11 = pnand %p4518_p10, %p4939_p7  ;;  %p4527_p2 = por %p4526_p0, %p4525_p13 }
  0xb5   : > { %p4521_p12 = pneg %p4520_p11 }
  0xb7   : > { %p4528_p4 = pnand %p4527_p2, %p4521_p12 }
  0xb9   : > { %4531 = shalt.err (!%p4528_p4)
}
  0xba   : > { %s5599_s3 = smov 256   ;;  %s4786_s24 = smov [#allocation16]  }
  0xbb   : > { %3825 = dma.hbm_to_vmem [thread:$0]  (!%p4925_p5), %s5598_s7, 16384, %s5030_s17, [#allocation12], %s5599_s3, %s5599_s3, %s4783_s15  }
  0xbc   : > { %s502_s28 = sshll.u32 %s4786_s24, 4  ;;  %s4787_s2 = smov [#allocation19]   ;;  %s503_s28 = int_to_ptr.vmem [resolvable:$true] %s502_s28 }
  0xbd   : > { %s532_s16 = sshll.u32 %s4787_s2, 4  ;;  %s4532_s30 = scalar_lea.hbm %s5554_s10, 64  ;;  %s5079_s16 = int_to_ptr.vmem [resolvable:$true] %s532_s16 }
  0xbe   : > { %p4533_p1 = scmp.ne.s32.totalorder %s5554_s10, %s4532_s30  ;;  %p4539_p8 = scmp.lt.u32.totalorder %s4532_s30, %s5554_s10 }
  0xc0   : > { %p4535_p3 = pnand %p4533_p1, %p4939_p7 }
  0xc2   : > { %p4536_p6 = pneg %p4535_p3 }
  0xc4   : > { %p4541_p9 = pnand %p4539_p8, %p4536_p6 }
  0xc6   : > { %4544 = shalt.err (!%p4541_p9)
}
  0xc7   : > { %s4545_s17 = scalar_lea.vmem %s503_s28, 64  ;;  %p4553_p13 = scmp.lt.s32.totalorder %s503_s28, %s503_s28 }
  0xc8   : > { %p4546_p10 = scmp.ne.s32.totalorder %s503_s28, %s4545_s17  ;;  %p4554_p0 = scmp.lt.s32.totalorder %s4545_s17, %s4545_s17 }
  0xca   : > { %p4548_p11 = pnand %p4546_p10, %p4939_p7  ;;  %p4555_p2 = por %p4554_p0, %p4553_p13 }
  0xcc   : > { %p4549_p12 = pneg %p4548_p11 }
  0xce   : > { %p4556_p4 = pnand %p4555_p2, %p4549_p12 }
  0xd0   : > { %4559 = shalt.err (!%p4556_p4)
}
  0xd1   : > { %3831 = dma.hbm_to_vmem [thread:$0]  (!%p4925_p5), %s5554_s10, 64, %s503_s28, [#allocation15]  }
  0xd2   : > { %s4560_s13 = scalar_lea.hbm %s5556_s12, 64 }
  0xd3   : > { %p4561_p1 = scmp.ne.s32.totalorder %s5556_s12, %s4560_s13  ;;  %p4567_p8 = scmp.lt.u32.totalorder %s4560_s13, %s5556_s12 }
  0xd5   : > { %p4563_p3 = pnand %p4561_p1, %p4939_p7 }
  0xd7   : > { %p4564_p6 = pneg %p4563_p3 }
  0xd9   : > { %p4569_p9 = pnand %p4567_p8, %p4564_p6 }
  0xdb   : > { %4572 = shalt.err (!%p4569_p9)
}
  0xdc   : > { %s4573_s28 = scalar_lea.vmem %s5079_s16, 64  ;;  %p4581_p13 = scmp.lt.s32.totalorder %s5079_s16, %s5079_s16 }
  0xdd   : > { %p4574_p10 = scmp.ne.s32.totalorder %s5079_s16, %s4573_s28  ;;  %p4582_p0 = scmp.lt.s32.totalorder %s4573_s28, %s4573_s28 }
  0xdf   : > { %p4576_p11 = pnand %p4574_p10, %p4939_p7  ;;  %p4583_p2 = por %p4582_p0, %p4581_p13 }
  0xe1   : > { %p4577_p12 = pneg %p4576_p11 }
  0xe3   : > { %p4584_p4 = pnand %p4583_p2, %p4577_p12 }
  0xe5   : > { %4587 = shalt.err (!%p4584_p4)
}
  0xe6   : > { %3837 = dma.hbm_to_vmem [thread:$0]  (!%p4925_p5), %s5556_s12, 64, %s5079_s16, [#allocation18]  }
  0xe7   : > { %s3434_s27 = sadd.s32 4294967294, %s4772_s23   ;;  %s49_s17 = sadd.s32 1, %s4768_s22 }
  0xe8   : > { %p51_p7 = scmp.ge.s32.totalorder %s49_s17, 3  ;;  %s56_s29 = sadd.s32 1, %s4760_s20 }
  0xe9   : > { %p63_p1 = scmp.ne.s32.totalorder %s4760_s20, %s4756_s19  ;;  %p64_p3 = scmp.eq.s32.totalorder %s4772_s23, 0 }
  0xea   : > { %s5629_s17 = smov (%p51_p7, %s49_s17), 0  ;;  %p69_p8 = scmp.ne.s32.totalorder %s4756_s19, %s4752_s18 }
  0xeb   : > { %p5130_p6 = por %p64_p3, %p63_p1  ;;  %s53_s16 = ssub.s32 %s4768_s22, %s5629_s17 }
  0xec   : > { %s5601_s8 = sadd.s32 4294967295, %s4772_s23   ;;  %p54_p9 = scmp.eq.s32.totalorder %s53_s16, 0 }
  0xed   : > { %p5140_p5 = scmp.eq.s32.totalorder %s5601_s8, 2  ;;  %p5603_p10 = scmp.ne.s32.totalorder %s5589_s25, 0 }
  0xee   : > { %p363_p13 = scmp.eq.s32.totalorder %s3434_s27, 2  ;;  %p3854_p2 = scmp.lt.s32.totalorder %s4772_s23, 3 }
  0xef   : > { %s5602_s24 = scalar_select %p5140_p5, 1, 0 }
  0xf0   : > { %p5146_p11 = por %p5603_p10, %p69_p8  ;;  %p5152_p12 = por %p5140_p5, %p63_p1 }
  0xf1   : > { %s5157_s6 = scalar_select %p54_p9, %s4760_s20, %s56_s29  }
  0xf2   : > { %s5605_s13 = scalar_select %p5152_p12, 1, 0 }
  0xf3   : > { %p5159_p0 = por %p363_p13, %p69_p8  ;;  %s543_s14 = sand.u32 1, %s4760_s20  }
  0xf4   : > { %s3446_s21 = sshll.u32 %s4768_s22, 7  ;;  %s3445_s28 = sshll.u32 %s543_s14, 3 }
  0xf5   : > { %s5606_s30 = scalar_select %p5159_p0, 1, 0 }
  0xf6   : > { %s5607_s0 = sld [smem:[#allocation32_spill]]  ;;  %s547_s27 = scalar_lea.vmem [#allocation5], %s3445_s28 }
  0xf7   : > { %s554_s29 = sshll.u32 %s547_s27, 4  ;;  %p5173_p4 = pnand %p3854_p2, %p5130_p6  ;;  %s5177_s29 = int_to_ptr.vmem [resolvable:$true] %s554_s29 }
  0xf8   : > { %s544_s4 = scalar_lea.sflag [#allocation6], %s543_s14 }
  0xf9   : > { %p4590_p1 = pneg %p5173_p4 }
  0xfc   : > { %s5169_s16 = scalar_lea.hbm %s5607_s0, %s3446_s21  ;;  %s4593_s3 = scalar_lea.hbm %s5607_s0, 384 }
  0xfd   : > { %s4588_s5 = scalar_lea.hbm %s5169_s16, 128  ;;  %p4594_p6 = scmp.lt.u32.totalorder %s5169_s16, %s5607_s0 }
  0xfe   : > { %p4589_p7 = scmp.ne.s32.totalorder %s5169_s16, %s4588_s5  ;;  %p4595_p9 = scmp.lt.u32.totalorder %s4593_s3, %s4588_s5 }
  0xff   : > { %p4597_p13 = scmp.lt.u32.totalorder %s4588_s5, %s5169_s16 }
 0x100   : > { %p4591_p3 = pnand %p4590_p1, %p4589_p7  ;;  %p4596_p10 = por %p4595_p9, %p4594_p6 }
 0x102   : > { %p4592_p8 = pneg %p4591_p3  ;;  %p4598_p2 = por %p4597_p13, %p4596_p10 }
 0x104   : > { %p4599_p0 = pnand %p4598_p2, %p4592_p8 }
 0x106   : > { %4602 = shalt.err (!%p4599_p0)
}
 0x107   : > { %s4603_s14 = scalar_lea.vmem %s5177_s29, 128  ;;  %s4788_s27 = smov [#allocation5]  }
 0x108   : > { %p4604_p7 = scmp.ne.s32.totalorder %s5177_s29, %s4603_s14  ;;  %s4608_s21 = sshll.u32 %s4788_s27, 4  ;;  %s4609_s21 = int_to_ptr.vmem [resolvable:$false] %s4608_s21 }
 0x109   : > { %s4610_s28 = scalar_lea.vmem %s4609_s21, 256  ;;  %p4611_p5 = scmp.lt.s32.totalorder %s5177_s29, %s4609_s21 }
 0x10a   : > { %p4606_p3 = pnand %p4604_p7, %p4590_p1  ;;  %p4612_p6 = scmp.lt.s32.totalorder %s4610_s28, %s4603_s14 }
 0x10c   : > { %p4607_p12 = pneg %p4606_p3  ;;  %p4613_p9 = por %p4612_p6, %p4611_p5 }
 0x10e   : > { %p4614_p10 = pnand %p4613_p9, %p4607_p12 }
 0x110   : > { %4617 = shalt.err (!%p4614_p10)
}
 0x111   : > { %3841 = dma.hbm_to_vmem [thread:$0]  (!%p5173_p4), %s5169_s16, 128, %s5177_s29, %s544_s4  }
 0x112   : > { %p5609_p0 = scmp.ne.s32.totalorder %s5590_s26, 0 }
 0x113   : > { %s5207_s5 = sand.u32 (!%p5609_p0), 1, %s4756_s19  }
 0x114   : > { %563 = sbr.rel (%p5609_p0) target bundleno = 2205 (0x89d), region = 72  ;;  %s3448_s3 = sshll.u32 (!%p5609_p0), %s5207_s5, 3 }
 0x115   : > { %s566_s1 = scalar_lea.sflag (!%p5609_p0), [#allocation6], %s5207_s5  ;;  %s5211_s15 = scalar_lea.vmem (!%p5609_p0), [#allocation5], %s3448_s3 }
 0x11b   : > { %4723 = dma.done.wait (%p5146_p11), %s566_s1, 128  }
 0x11c   : > { %4725 = vsyncadd (%p5146_p11), %s566_s1, 4294967168  ;;  %p5610_p5 = scmp.ne.s32.totalorder %s5589_s25, 0 }
 0x11e   : > { %4727 = dma.done.wait (%p5610_p5), [#allocation9], 512  }
 0x11f   : > { %4729 = vsyncadd (%p5610_p5), [#allocation9], 4294966784 }
 0x120   : > { %4731 = dma.done.wait (%p5610_p5), [#allocation12], 17408  }
 0x121   : > { %4733 = vsyncadd (%p5610_p5), [#allocation12], 4294949888 }
 0x122   : > { %4735 = dma.done.wait (%p5610_p5), [#allocation15], 8256  }
 0x123   : > { %4737 = vsyncadd (%p5610_p5), [#allocation15], 4294959040 }
 0x124   : > { %4739 = dma.done.wait (%p5610_p5), [#allocation18], 4160  }
 0x125   : > { %4741 = vsyncadd (%p5610_p5), [#allocation18], 4294963136  ;;  %s5611_s4 = sld [smem:[#allocation31_spill]]  ;;  %s3457_s26 = sshll.u32 %s5207_s5, 5 }
 0x126   : > { %s5235_s2 = scalar_lea.vmem [#allocation20], %s3457_s26 }
 0x12b   : > { %p652_p11 = scmp.eq.s32.totalorder %s5611_s4, 0 }
 0x12c   : > { %v658_v0 = vld [vmem:[#allocation8] sm:$0xff] (%p652_p11)  ;;  %v659_v1 = vld [vmem:[#allocation8 + $0x8] sm:$0xff] (%p652_p11)  ;;  %v662_v2 = vld [vmem:[#allocation10] sm:$0xff] (%p652_p11) }
 0x12d   : > { %657 = sbr.rel (!%p652_p11) target bundleno = 308 (0x134), region = 112  ;;  %660 = vst [vmem:[#allocation2] sm:$0xff] (%p652_p11), %v658_v0  ;;  %661 = vst [vmem:[#allocation2 + $0x8] sm:$0xff] (%p652_p11), %v659_v1  ;;  %v663_v3 = vld [vmem:[#allocation10 + $0x8] sm:$0xff] (%p652_p11) }
 0x12e   : > { %664 = vst [vmem:[#allocation3] sm:$0xff] (%p652_p11), %v662_v2  ;;  %665 = vst [vmem:[#allocation3 + $0x8] sm:$0xff] (%p652_p11), %v663_v3 }
 0x134 PF: > { %v3940_v4 = vld [vmem:[#allocation11] sm:$0xff]   ;;  %v4789_v5 = vmov 0.0   ;;  %v3941_v6 = vld [vmem:[#allocation11 + $0x8] sm:$0xff]   ;;  %vm4790_vm0 = vmmov 0   ;;  %v3942_v7 = vld [vmem:[#allocation11 + $0x10] sm:$0xff]   ;;  %v801_v17 = vlaneseq  ;;  %s5612_s29 = sld [smem:[#allocation33_spill]] }
 0x135   : > { %3737 = vmatprep.subr.bf16.mxu0 %v4789_v5  ;;  %3753 = vmatprep.mubr.msk.bf16.mxu0 %vm4790_vm0, %v4789_v5  ;;  %v3943_v8 = vld [vmem:[#allocation11 + $0x18] sm:$0xff]   ;;  %v3944_v9 = vld [vmem:[#allocation11 + $0x20] sm:$0xff]   ;;  %v3945_v10 = vld [vmem:[#allocation11 + $0x28] sm:$0xff]   ;;  %v4791_v15 = vmov 1966171168   ;;  %s5613_s26 = sld [smem:[#allocation38_spill]] }
 0x136   : > { %3738 = vmatpush3.bf16.msra.mxu0 %v3940_v4  ;;  %v3946_v11 = vld [vmem:[#allocation11 + $0x30] sm:$0xff]   ;;  %v3947_v12 = vld [vmem:[#allocation11 + $0x38] sm:$0xff]   ;;  %v799_v16 = vunpack.c.l.s4 %v4791_v15  ;;  %v5241_v19 = vshrl.u32 %v801_v17, 7  ;;  %vm975_vm1 = vcmask 1041409   ;;  %vm977_vm2 = vcmask 1042434   ;;  %s5614_s8 = sld [smem:[#allocation34_spill]] }
 0x137   : > { %3739 = vmatprep.subr.bf16.mxu0 %v4789_v5  ;;  %v671_v13 = vld [vmem:[#allocation2 + $0x8] sm:$0xff]  ;;  %vm979_vm3 = vcmask 1043459   ;;  %vm981_vm4 = vcmask 1044484   ;;  %vm983_vm5 = vcmask 1045509   ;;  %vm985_vm6 = vcmask 1046534   ;;  %s5615_s1 = sld [smem:[#allocation40_spill]] }
 0x138   : > { %v5237_v14 = vpack.c.bf16 %v671_v13, %v671_v13  ;;  %v800_v18 = vunpack.c.0.s8 %v799_v16  ;;  %v5248_v26 = vsub.s32 0, %v5241_v19  ;;  %vm987_vm7 = vcmask 1047559   ;;  %s4793_s4 = smov [#allocation21]   ;;  %p5616_p4 = scmp.ne.s32.totalorder %s5602_s24, 0 }
 0x139   : > { %vm990_vm8 = vcmask 64512  }
 0x13a   : > { %3740 = vmatpush3.bf16.msra.mxu0 %v3941_v6  ;;  %v803_v20 = vsub.s32 %v800_v18, %v5241_v19  ;;  %v3710_v22 = vld [vmem:[%s5612_s29] sm:$0xff]   ;;  %v3725_v28 = vld [vmem:[%s5612_s29 + $0x8] sm:$0xff]   ;;  %v3726_v34 = vld [vmem:[%s5612_s29 + $0x10] sm:$0xff]  }
 0x13b   : > { %3741 = vmatprep.subr.bf16.mxu0 %v4789_v5  ;;  %v3711_v33 = vunpack.c.l.bf16 %v3710_v22  ;;  %v3712_v39 = vunpack.c.h.bf16 %v3710_v22  ;;  %v3715_v40 = vunpack.c.l.bf16 %v3725_v28  ;;  %v3716_v41 = vunpack.c.h.bf16 %v3725_v28  ;;  %v3727_v51 = vld [vmem:[%s5612_s29 + $0x18] sm:$0xff]   ;;  %v3467_v2 = vld [vmem:[%s5613_s26] ss:$0 sm:$0xff]  ;;  %s3235_s26 = sshll.u32 %s4793_s4, 4  ;;  %s3236_s26 = int_to_ptr.vmem [resolvable:$true] %s3235_s26 }
 0x13c   : > { %v3719_v43 = vunpack.c.l.bf16 %v3726_v34  ;;  %v3720_v55 = vunpack.c.h.bf16 %v3726_v34  ;;  %v3723_v59 = vunpack.c.l.bf16 %v3727_v51  ;;  %v3724_v0 = vunpack.c.h.bf16 %v3727_v51  ;;  %s4618_s25 = scalar_lea.vmem %s3236_s26, 256  ;;  %p4625_p13 = scmp.lt.s32.totalorder %s3236_s26, %s3236_s26 }
 0x13d   : > { %v5296_v51 = vsub.s32 2, %v5241_v19  ;;  %p4619_p12 = scmp.ne.s32.totalorder %s3236_s26, %s4618_s25  ;;  %p4626_p2 = scmp.lt.s32.totalorder %s4618_s25, %s4618_s25 }
 0x13e   : > { %3742 = vmatpush3.bf16.msra.mxu0 %v3942_v7 }
 0x13f   : > { %3743 = vmatprep.subr.bf16.mxu0 %v4789_v5  ;;  %p4620_p1 = pnand %p4619_p12, %p5616_p4  ;;  %p4627_p7 = por %p4626_p2, %p4625_p13 }
 0x141   : > { %p4621_p8 = pneg %p4620_p1 }
 0x142   : > { %3744 = vmatpush3.bf16.msra.mxu0 %v3943_v8 }
 0x143   : > { %3745 = vmatprep.subr.bf16.mxu0 %v4789_v5  ;;  %p4628_p3 = pnand %p4627_p7, %p4621_p8 }
 0x146   : > { %3746 = vmatpush3.bf16.msra.mxu0 %v3944_v9 }
 0x147   : > { %3747 = vmatprep.subr.bf16.mxu0 %v4789_v5 }
 0x14a   : > { %3748 = vmatpush3.bf16.msra.mxu0 %v3945_v10 }
 0x14b   : > { %3749 = vmatprep.subr.bf16.mxu0 %v4789_v5 }
 0x14e   : > { %3750 = vmatpush3.bf16.msra.mxu0 %v3946_v11 }
 0x14f   : > { %3751 = vmatprep.subr.bf16.mxu0 %v4789_v5 }
 0x152   : > { %3752 = vmatpush3.bf16.msra.mxu0 %v3947_v12 }
 0x155   : > { %3754 = vmatmul.mubr.bf16.vlgmr.msra.gmra.mrb[0].mxu0 %v5237_v14 }
 0x228   : > { %v774_v21 = vpop.f32.mrb[0].mxu0 }
 0x229   : > { %v797_v23 = vcombine.high %v774_v21, %v774_v21  ;;  %v804_v24 = vrot.slane %v774_v21, %v803_v20  ;;  %v3755_v25 = vpop.f32.mrb[1].mxu0 }
 0x22a   : > { %v777_v27 = vpop.f32.mrb[2].mxu0 }
 0x22b   : > { %v811_v29 = vrot.slane %v797_v23, %v803_v20  ;;  %v812_v30 = vcombine.high %v804_v24, %v804_v24  ;;  %v820_v31 = vrot.slane %v804_v24, %v803_v20  ;;  %v3756_v32 = vpop.f32.mrb[3].mxu0  ;;  %v942_v23 = vand.u32 127, %v801_v17 }
 0x22d   : > { %v813_v35 = vcombine.high %v811_v29, %v811_v29  ;;  %v827_v36 = vrot.slane %v811_v29, %v803_v20  ;;  %v834_v37 = vrot.slane %v812_v30, %v803_v20  ;;  %v842_v38 = vcombine.high %v820_v31, %v820_v31 }
 0x22e   : > { %v849_v42 = vrot.slane %v820_v31, %v5248_v26  ;;  %v5272_v25 = vsub.s32 %v942_v23, %v5241_v19 }
 0x22f   : > { %v841_v44 = vrot.slane %v813_v35, %v803_v20  ;;  %v844_v45 = vcombine.high %v834_v37, %v834_v37  ;;  %v853_v46 = vrot.slane %v834_v37, %v5248_v26  ;;  %v843_v47 = vcombine.high %v827_v36, %v827_v36 }
 0x230   : > { %v857_v48 = vrot.slane %v842_v38, %v5248_v26  ;;  %v865_v49 = vrot.slane %v827_v36, %v5248_v26  ;;  %v886_v50 = vadd.f32 %v3711_v33, %v849_v42 }
 0x231   : > { %v861_v52 = vrot.slane %v844_v45, %v5248_v26  ;;  %v887_v53 = vadd.f32 %v3712_v39, %v853_v46  ;;  %v845_v56 = vcombine.high %v841_v44, %v841_v44  ;;  %v869_v57 = vrot.slane %v841_v44, %v5248_v26 }
 0x232   : > { %v888_v54 = vadd.f32 %v3715_v40, %v857_v48  ;;  %4284 = vtanh.f32 %v886_v50  ;;  %v873_v60 = vrot.slane %v843_v47, %v5248_v26  ;;  %v890_v61 = vadd.f32 %v3719_v43, %v865_v49 }
 0x233   : > { %v889_v58 = vadd.f32 %v3716_v41, %v861_v52  ;;  %4286 = vtanh.f32 %v887_v53  ;;  %v877_v62 = vrot.slane %v845_v56, %v5248_v26  ;;  %v891_v63 = vadd.f32 %v3720_v55, %v869_v57 }
 0x234   : > { %4288 = vtanh.f32 %v888_v54  ;;  %v892_v1 = vadd.f32 %v3723_v59, %v873_v60  ;;  %v4792_v49 = vmov 0   ;;  %v5293_v50 = vsub.s32 1, %v5241_v19 }
 0x235   : > { %4290 = vtanh.f32 %v889_v58  ;;  %v893_v3 = vadd.f32 %v3724_v0, %v877_v62  ;;  %3939 = vset.pattern.permute.xlu0 %v4792_v49  ;;  %3938 = vset.pattern.permute.xlu1 %v4792_v49  ;;  %v5299_v52 = vsub.s32 3, %v5241_v19  ;;  %v1013_v57 = vsub.s32 4, %v5241_v19 }
 0x236   : > { %4292 = vtanh.f32 %v890_v61  ;;  %v1017_v0 = vsub.s32 5, %v5241_v19 }
 0x237   : > { %4294 = vtanh.f32 %v891_v63 }
 0x238   : > { %4296 = vtanh.f32 %v892_v1 }
 0x239   : > { %4298 = vtanh.f32 %v893_v3 }
 0x23c   : > { %v4285_v4 = vpop.eup %4284 }
 0x23d   : > { %v909_v5 = vmul.f32 %v4285_v4, %v3467_v2  ;;  %v4287_v6 = vpop.eup %4286  ;;  %v1021_v4 = vsub.s32 6, %v5241_v19 }
 0x23e   : > { %v4289_v7 = vpop.eup %4288  ;;  %v910_v10 = vmul.f32 %v4287_v6, %v3467_v2 }
 0x23f   : > { %917 = vadd.xlane.f32.xlu0 %v909_v5  ;;  %v911_v8 = vmul.f32 %v4289_v7, %v3467_v2  ;;  %v4291_v9 = vpop.eup %4290 }
 0x240   : > { %v4293_v11 = vpop.eup %4292  ;;  %v912_v12 = vmul.f32 %v4291_v9, %v3467_v2 }
 0x241   : > { %921 = vadd.xlane.f32.xlu1 %v911_v8  ;;  %v4295_v13 = vpop.eup %4294  ;;  %v913_v15 = vmul.f32 %v4293_v11, %v3467_v2  ;;  %v1025_v8 = vsub.s32 7, %v5241_v19  ;;  %v3990_v19 = vld [vmem:[#allocation13 + $0xe4] ss:$16 sps:$4 sm:$0xff]  }
 0x242   : > { %v4297_v16 = vpop.eup %4296  ;;  %v914_v18 = vmul.f32 %v4295_v13, %v3467_v2 }
 0x243   : > { %919 = vadd.xlane.f32.xlu0 %v910_v10  ;;  %v4299_v20 = vpop.eup %4298  ;;  %v915_v21 = vmul.f32 %v4297_v16, %v3467_v2 }
 0x244   : > { %v916_v22 = vmul.f32 %v4299_v20, %v3467_v2 }
 0x245   : > { %923 = vadd.xlane.f32.xlu1 %v912_v12 }
 0x247   : > { %925 = vadd.xlane.f32.xlu0 %v913_v15 }
 0x249   : > { %927 = vadd.xlane.f32.xlu1 %v914_v18 }
 0x24b   : > { %929 = vadd.xlane.f32.xlu0 %v915_v21 }
 0x24d   : > { %931 = vadd.xlane.f32.xlu1 %v916_v22 }
 0x2cc   : > { %v918_v24 = vpop.xlane.xlu0 %917 }
 0x2cd   : > { %v946_v29 = vrot.slane %v918_v24, %v5272_v25 }
 0x2ce   : > { %v922_v27 = vpop.xlane.xlu1 %921 }
 0x2cf   : > { %v954_v31 = vrot.slane %v922_v27, %v5272_v25 }
 0x2d0   : > { %v920_v28 = vpop.xlane.xlu0 %919 }
 0x2d1   : > { %v950_v30 = vrot.slane %v920_v28, %v5272_v25 }
 0x2d2   : > { %v924_v33 = vpop.xlane.xlu1 %923 }
 0x2d3   : > { %v976_v32 = vsel %vm975_vm1, %v950_v30, %v946_v29  ;;  %v958_v34 = vrot.slane %v924_v33, %v5272_v25 }
 0x2d4   : > { %v978_v17 = vsel %vm977_vm2, %v954_v31, %v976_v32  ;;  %v926_v35 = vpop.xlane.xlu0 %925 }
 0x2d5   : > { %v962_v36 = vrot.slane %v926_v35, %v5272_v25  ;;  %v980_v37 = vsel %vm979_vm3, %v958_v34, %v978_v17 }
 0x2d6   : > { %v928_v39 = vpop.xlane.xlu1 %927 }
 0x2d7   : > { %v982_v38 = vsel %vm981_vm4, %v962_v36, %v980_v37  ;;  %v966_v40 = vrot.slane %v928_v39, %v5272_v25 }
 0x2d8   : > { %v930_v41 = vpop.xlane.xlu0 %929 }
 0x2d9   : > { %v970_v42 = vrot.slane %v930_v41, %v5272_v25  ;;  %v984_v43 = vsel %vm983_vm5, %v966_v40, %v982_v38 }
 0x2da   : > { %v932_v44 = vpop.xlane.xlu1 %931 }
 0x2db   : > { %v986_v45 = vsel %vm985_vm6, %v970_v42, %v984_v43  ;;  %v974_v46 = vrot.slane %v932_v44, %v5272_v25 }
 0x2dd   : > { %v988_v47 = vsel %vm987_vm7, %v974_v46, %v986_v45 }
 0x2de   : > { %v991_v48 = vsel %vm990_vm8, %v988_v47, -inf }
 0x2df   : > { %992 = vmax.xlane.f32.xlu0 %v991_v48 }
 0x36c   : > { %v993_v53 = vpop.xlane.xlu0 %992 }
 0x36d   : > { %v998_v54 = vrot.slane %v993_v53, %v5248_v26  ;;  %v1002_v55 = vrot.slane %v993_v53, %v5293_v50  ;;  %v1006_v56 = vrot.slane %v993_v53, %v5296_v51  ;;  %v1010_v58 = vrot.slane %v993_v53, %v5299_v52 }
 0x36e   : > { %v1014_v1 = vrot.slane %v993_v53, %v1013_v57  ;;  %v1018_v5 = vrot.slane %v993_v53, %v1017_v0  ;;  %v1022_v9 = vrot.slane %v993_v53, %v1021_v4  ;;  %v1026_v15 = vrot.slane %v993_v53, %v1025_v8 }
 0x36f   : > { %v1035_v59 = vsub.f32 %v918_v24, %v998_v54  ;;  %v1036_v60 = vsub.f32 %v920_v28, %v1002_v55  ;;  %v1037_v61 = vsub.f32 %v922_v27, %v1006_v56  ;;  %v1038_v2 = vsub.f32 %v924_v33, %v1010_v58 }
 0x370   : > { %v1039_v6 = vsub.f32 %v926_v35, %v1014_v1  ;;  %v1040_v10 = vsub.f32 %v928_v39, %v1018_v5  ;;  %v1041_v16 = vsub.f32 %v930_v41, %v1022_v9  ;;  %v1042_v21 = vsub.f32 %v932_v44, %v1026_v15  ;;  %v3958_v1 = vld [vmem:[#allocation13 + $0x2c] ss:$16 sps:$4 sm:$0xff]   ;;  %v3966_v9 = vld [vmem:[#allocation13 + $0x64] ss:$16 sps:$4 sm:$0xff]   ;;  %v3971_v15 = vld [vmem:[#allocation13 + $0x60] ss:$16 sps:$4 sm:$0xff]  }
 0x371   : > { %v1043_v62 = vmul.f32 1.442695, %v1035_v59  ;;  %v1045_v63 = vmul.f32 1.442695, %v1036_v60  ;;  %v1047_v3 = vmul.f32 1.442695, %v1037_v61 }
 0x372   : > { %v1049_v7 = vmul.f32 1.442695, %v1038_v2  ;;  %v1051_v11 = vmul.f32 1.442695, %v1039_v6  ;;  %v1053_v18 = vmul.f32 1.442695, %v1040_v10 }
 0x373   : > { %4300 = vpow2.f32 %v1043_v62  ;;  %v1055_v22 = vmul.f32 1.442695, %v1041_v16  ;;  %v1057_v24 = vmul.f32 1.442695, %v1042_v21  ;;  %v3948_v59 = vld [vmem:[#allocation13 + $0x4] ss:$16 sps:$4 sm:$0xff]  }
 0x374   : > { %4302 = vpow2.f32 %v1045_v63  ;;  %v3950_v60 = vld [vmem:[#allocation13 + $0x8] ss:$16 sps:$4 sm:$0xff]   ;;  %v3952_v61 = vld [vmem:[#allocation13 + $0xc] ss:$16 sps:$4 sm:$0xff]   ;;  %v3953_v62 = vld [vmem:[#allocation13] ss:$16 sps:$4 sm:$0xff]   ;;  %2194 = vmatprep.subr.bf16.mxu1 %v3948_v59 }
 0x375   : > { %4304 = vpow2.f32 %v1047_v3  ;;  %v3954_v63 = vld [vmem:[#allocation13 + $0x24] ss:$16 sps:$4 sm:$0xff]   ;;  %2276 = vmatprep.subr.bf16.mxu0 %v3952_v61  ;;  %2195 = vmatpush1.bf16.msra.mxu1 %v3953_v62  ;;  %v3956_v2 = vld [vmem:[#allocation13 + $0x28] ss:$16 sps:$4 sm:$0xff]   ;;  %v3959_v3 = vld [vmem:[#allocation13 + $0x20] ss:$16 sps:$4 sm:$0xff]  }
 0x376   : > { %4306 = vpow2.f32 %v1049_v7  ;;  %2277 = vmatpush1.bf16.msra.mxu0 %v3950_v60  ;;  %2196 = vmatprep.subr.bf16.mxu1 %v3954_v63  ;;  %v3964_v5 = vld [vmem:[#allocation13 + $0x4c] ss:$16 sps:$4 sm:$0xff]   ;;  %v3962_v6 = vld [vmem:[#allocation13 + $0x48] ss:$16 sps:$4 sm:$0xff]   ;;  %v3965_v7 = vld [vmem:[#allocation13 + $0x40] ss:$16 sps:$4 sm:$0xff]  }
 0x377   : > { %4308 = vpow2.f32 %v1051_v11  ;;  %2278 = vmatprep.subr.bf16.mxu0 %v3958_v1  ;;  %v3970_v10 = vld [vmem:[#allocation13 + $0x6c] ss:$16 sps:$4 sm:$0xff]   ;;  %v3968_v11 = vld [vmem:[#allocation13 + $0x68] ss:$16 sps:$4 sm:$0xff]   ;;  %v3972_v16 = vld [vmem:[#allocation13 + $0x84] ss:$16 sps:$4 sm:$0xff]  }
 0x378   : > { %4310 = vpow2.f32 %v1053_v18  ;;  %v3976_v18 = vld [vmem:[#allocation13 + $0x8c] ss:$16 sps:$4 sm:$0xff]   ;;  %v3974_v21 = vld [vmem:[#allocation13 + $0x88] ss:$16 sps:$4 sm:$0xff]   ;;  %v4001_v62 = vld [vmem:[#allocation13 + $0x100] ss:$16 sps:$4 sm:$0xff]  }
 0x379   : > { %4312 = vpow2.f32 %v1055_v22  ;;  %2197 = vmatpush1.bf16.msra.mxu1 %v3959_v3  ;;  %v3977_v22 = vld [vmem:[#allocation13 + $0x80] ss:$16 sps:$4 sm:$0xff]   ;;  %v4000_v59 = vld [vmem:[#allocation13 + $0x10c] ss:$16 sps:$4 sm:$0xff]   ;;  %v3998_v61 = vld [vmem:[#allocation13 + $0x108] ss:$16 sps:$4 sm:$0xff]  }
 0x37a   : > { %4314 = vpow2.f32 %v1057_v24  ;;  %2279 = vmatpush1.bf16.msra.mxu0 %v3956_v2  ;;  %v4002_v63 = vld [vmem:[#allocation13 + $0x124] ss:$16 sps:$4 sm:$0xff]   ;;  %v4006_v1 = vld [vmem:[#allocation13 + $0x12c] ss:$16 sps:$4 sm:$0xff]   ;;  %v4004_v3 = vld [vmem:[#allocation13 + $0x128] ss:$16 sps:$4 sm:$0xff]  }
 0x37b   : > { %2280 = vmatprep.subr.bf16.mxu0 %v3964_v5  ;;  %v4008_v5 = vld [vmem:[#allocation13 + $0x144] ss:$16 sps:$4 sm:$0xff]  }
 0x37d   : > { %v5315_v12 = vpop.eup %4300 }
 0x37e   : > { %v5317_v13 = vpop.eup %4302  ;;  %1068 = vperm.xlu1 %3938, %v5315_v12   ;;  %2281 = vmatpush1.bf16.msra.mxu0 %v3962_v6  ;;  %v4012_v6 = vld [vmem:[#allocation13 + $0x14c] ss:$16 sps:$4 sm:$0xff]  }
 0x37f   : > { %1071 = vperm.xlu0 %3939, %v5317_v13   ;;  %v5323_v20 = vpop.eup %4304  ;;  %2282 = vmatprep.subr.bf16.mxu0 %v3970_v10  ;;  %v4018_v10 = vld [vmem:[#allocation13 + $0x16c] ss:$16 sps:$4 sm:$0xff]  }
 0x380   : > { %v5326_v23 = vpop.eup %4306 }
 0x381   : > { %v5329_v27 = vpop.eup %4308 }
 0x382   : > { %1074 = vperm.xlu1 %3938, %v5323_v20   ;;  %v5332_v28 = vpop.eup %4310  ;;  %2283 = vmatpush1.bf16.msra.mxu0 %v3968_v11  ;;  %v4016_v11 = vld [vmem:[#allocation13 + $0x168] ss:$16 sps:$4 sm:$0xff]  }
 0x383   : > { %v5335_v29 = vpop.eup %4312  ;;  %2284 = vmatprep.subr.bf16.mxu0 %v3976_v18  ;;  %v4022_v18 = vld [vmem:[#allocation13 + $0x188] ss:$16 sps:$4 sm:$0xff]  }
 0x384   : > { %v5338_v30 = vpop.eup %4314 }
 0x386   : > { %1077 = vperm.xlu1 %3938, %v5326_v23   ;;  %2285 = vmatpush1.bf16.msra.mxu0 %v3974_v21  ;;  %v4025_v21 = vld [vmem:[#allocation13 + $0x180] ss:$16 sps:$4 sm:$0xff]  }
 0x38a   : > { %1080 = vperm.xlu1 %3938, %v5329_v27  }
 0x38e   : > { %1083 = vperm.xlu1 %3938, %v5332_v28  }
 0x392   : > { %1086 = vperm.xlu1 %3938, %v5335_v29  }
 0x396   : > { %1089 = vperm.xlu1 %3938, %v5338_v30  }
 0x3fd   : > { %v1069_v31 = vpop.permute.xlu1 %1068 }
 0x3fe   : > { %v1072_v34 = vpop.permute.xlu0 %1071  ;;  %v1094_v37 = vrot.slane %v1069_v31, %v5272_v25 }
 0x3ff   : > { %v1098_v36 = vrot.slane %v1072_v34, %v5272_v25 }
 0x401   : > { %v1075_v32 = vpop.permute.xlu1 %1074  ;;  %v1123_v42 = vsel %vm975_vm1, %v1098_v36, %v1094_v37 }
 0x402   : > { %v1102_v38 = vrot.slane %v1075_v32, %v5272_v25 }
 0x404   : > { %v1124_v44 = vsel %vm977_vm2, %v1102_v38, %v1123_v42 }
 0x405   : > { %v1078_v33 = vpop.permute.xlu1 %1077 }
 0x406   : > { %v1106_v39 = vrot.slane %v1078_v33, %v5272_v25 }
 0x408   : > { %v1125_v46 = vsel %vm979_vm3, %v1106_v39, %v1124_v44 }
 0x409   : > { %v1081_v17 = vpop.permute.xlu1 %1080 }
 0x40a   : > { %v1110_v40 = vrot.slane %v1081_v17, %v5272_v25 }
 0x40c   : > { %v1126_v47 = vsel %vm981_vm4, %v1110_v40, %v1125_v46  ;;  %v3984_v46 = vld [vmem:[#allocation13 + $0xc4] ss:$16 sps:$4 sm:$0xff]  }
 0x40d   : > { %v1084_v35 = vpop.permute.xlu1 %1083 }
 0x40e   : > { %v1114_v43 = vrot.slane %v1084_v35, %v5272_v25 }
 0x410   : > { %v1127_v53 = vsel %vm983_vm5, %v1114_v43, %v1126_v47  ;;  %v3978_v43 = vld [vmem:[#allocation13 + $0xa4] ss:$16 sps:$4 sm:$0xff]  }
 0x411   : > { %v1087_v41 = vpop.permute.xlu1 %1086 }
 0x412   : > { %v1118_v45 = vrot.slane %v1087_v41, %v5272_v25 }
 0x414   : > { %v1128_v55 = vsel %vm985_vm6, %v1118_v45, %v1127_v53  ;;  %v3983_v45 = vld [vmem:[#allocation13 + $0xa0] ss:$16 sps:$4 sm:$0xff]  }
 0x415   : > { %v1090_v48 = vpop.permute.xlu1 %1089 }
 0x416   : > { %v1122_v54 = vrot.slane %v1090_v48, %v5272_v25  ;;  %v3960_v25 = vld [vmem:[#allocation13 + $0x44] ss:$16 sps:$4 sm:$0xff]   ;;  %v3989_v48 = vld [vmem:[#allocation13 + $0xc0] ss:$16 sps:$4 sm:$0xff]  }
 0x417   : > { %2198 = vmatprep.subr.bf16.mxu1 %v3960_v25  ;;  %v4007_v25 = vld [vmem:[#allocation13 + $0x120] ss:$16 sps:$4 sm:$0xff]  }
 0x418   : > { %v1129_v56 = vsel %vm987_vm7, %v1122_v54, %v1128_v55  ;;  %2199 = vmatpush1.bf16.msra.mxu1 %v3965_v7  ;;  %v3992_v55 = vld [vmem:[#allocation13 + $0xe8] ss:$16 sps:$4 sm:$0xff]  }
 0x419   : > { %v1131_v58 = vsel %vm990_vm8, %v1129_v56, 0.0  ;;  %2200 = vmatprep.subr.bf16.mxu1 %v3966_v9  ;;  %v3995_v56 = vld [vmem:[#allocation13 + $0xe0] ss:$16 sps:$4 sm:$0xff]   ;;  %v4010_v7 = vld [vmem:[#allocation13 + $0x148] ss:$16 sps:$4 sm:$0xff]  }
 0x41a   : > { %1132 = vadd.xlane.f32.xlu1 %v1131_v58  ;;  %v3996_v58 = vld [vmem:[#allocation13 + $0x104] ss:$16 sps:$4 sm:$0xff]   ;;  %v4013_v9 = vld [vmem:[#allocation13 + $0x140] ss:$16 sps:$4 sm:$0xff]  }
 0x41c   : > { %2201 = vmatpush1.bf16.msra.mxu1 %v3971_v15  ;;  %v4019_v15 = vld [vmem:[#allocation13 + $0x160] ss:$16 sps:$4 sm:$0xff]  }
 0x41d   : > { %2202 = vmatprep.subr.bf16.mxu1 %v3972_v16  ;;  %v4020_v16 = vld [vmem:[#allocation13 + $0x184] ss:$16 sps:$4 sm:$0xff]  }
 0x420   : > { %2203 = vmatpush1.bf16.msra.mxu1 %v3977_v22  ;;  %v4026_v22 = vld [vmem:[#allocation13 + $0x1a4] ss:$16 sps:$4 sm:$0xff]  }
 0x421   : > { %2204 = vmatprep.subr.bf16.mxu1 %v3978_v43 }
 0x424   : > { %2205 = vmatpush1.bf16.msra.mxu1 %v3983_v45 }
 0x425   : > { %2206 = vmatprep.subr.bf16.mxu1 %v3984_v46 }
 0x428   : > { %2207 = vmatpush1.bf16.msra.mxu1 %v3989_v48 }
 0x429   : > { %2208 = vmatprep.subr.bf16.mxu1 %v3990_v19 }
 0x42c   : > { %2209 = vmatpush1.bf16.msra.mxu1 %v3995_v56 }
 0x42d   : > { %2210 = vmatprep.subr.bf16.mxu1 %v3996_v58 }
 0x430   : > { %2211 = vmatpush1.bf16.msra.mxu1 %v4001_v62  ;;  %v1195_v62 = vld [vmem:[%s5614_s8 + $0x20] sm:$0xff] }
 0x431   : > { %2212 = vmatprep.subr.bf16.mxu1 %v4002_v63 }
 0x434   : > { %2213 = vmatpush1.bf16.msra.mxu1 %v4007_v25 }
 0x435   : > { %2214 = vmatprep.subr.bf16.mxu1 %v4008_v5 }
 0x438   : > { %2215 = vmatpush1.bf16.msra.mxu1 %v4013_v9  ;;  %v1207_v9 = vunpack.c.l.bf16 %v1195_v62 }
 0x4a7   : > { %v1133_v24 = vpop.xlane.xlu1 %1132 }
 0x4a8   : > { %v1138_v31 = vrot.slane %v1133_v24, %v5248_v26  ;;  %v1142_v32 = vrot.slane %v1133_v24, %v5293_v50  ;;  %v1146_v33 = vrot.slane %v1133_v24, %v5296_v51  ;;  %v1150_v17 = vrot.slane %v1133_v24, %v5299_v52 }
 0x4a9   : > { %v1154_v35 = vrot.slane %v1133_v24, %v1013_v57  ;;  %v1158_v38 = vrot.slane %v1133_v24, %v1017_v0  ;;  %v1162_v41 = vrot.slane %v1133_v24, %v1021_v4  ;;  %v3982_v57 = vld [vmem:[#allocation13 + $0xac] ss:$16 sps:$4 sm:$0xff]   ;;  %v1166_v0 = vrot.slane %v1133_v24, %v1025_v8 }
 0x4aa   : > { %4316 = vrcp.f32 %v1138_v31  ;;  %2286 = vmatprep.subr.bf16.mxu0 %v3982_v57  ;;  %v3988_v4 = vld [vmem:[#allocation13 + $0xcc] ss:$16 sps:$4 sm:$0xff]   ;;  %v4028_v31 = vld [vmem:[#allocation13 + $0x1a8] ss:$16 sps:$4 sm:$0xff]  }
 0x4ab   : > { %4318 = vrcp.f32 %v1142_v32  ;;  %v3994_v8 = vld [vmem:[#allocation13 + $0xec] ss:$16 sps:$4 sm:$0xff]   ;;  %v4031_v32 = vld [vmem:[#allocation13 + $0x1a0] ss:$16 sps:$4 sm:$0xff]   ;;  %v1192_v57 = vld [vmem:[%s5614_s8 + $0x8] sm:$0xff] }
 0x4ac   : > { %4320 = vrcp.f32 %v1146_v33  ;;  %v4030_v24 = vld [vmem:[#allocation13 + $0x1ac] ss:$16 sps:$4 sm:$0xff]   ;;  %v4032_v33 = vld [vmem:[#allocation13 + $0x1c4] ss:$16 sps:$4 sm:$0xff]  }
 0x4ad   : > { %4322 = vrcp.f32 %v1150_v17  ;;  %v4036_v17 = vld [vmem:[#allocation13 + $0x1cc] ss:$16 sps:$4 sm:$0xff]  }
 0x4ae   : > { %4324 = vrcp.f32 %v1154_v35  ;;  %v4037_v35 = vld [vmem:[#allocation13 + $0x1c0] ss:$16 sps:$4 sm:$0xff]  }
 0x4af   : > { %4326 = vrcp.f32 %v1158_v38  ;;  %v4043_v38 = vld [vmem:[#allocation13 + $0x1e0] ss:$16 sps:$4 sm:$0xff]  }
 0x4b0   : > { %4328 = vrcp.f32 %v1162_v41  ;;  %v4049_v41 = vld [vmem:[#allocation13 + $0x20c] ss:$16 sps:$4 sm:$0xff]  }
 0x4b1   : > { %4330 = vrcp.f32 %v1166_v0  ;;  %v1202_v0 = vunpack.c.h.bf16 %v1192_v57 }
 0x4b4   : > { %v4317_v34 = vpop.eup %4316 }
 0x4b5   : > { %v1176_v36 = vmul.f32 %v4317_v34, %v5315_v12  ;;  %v4319_v37 = vpop.eup %4318  ;;  %v3980_v12 = vld [vmem:[#allocation13 + $0xa8] ss:$16 sps:$4 sm:$0xff]  }
 0x4b6   : > { %v1178_v39 = vmul.f32 %v4319_v37, %v5317_v13  ;;  %v4321_v40 = vpop.eup %4320  ;;  %2287 = vmatpush1.bf16.msra.mxu0 %v3980_v12  ;;  %v4034_v34 = vld [vmem:[#allocation13 + $0x1c8] ss:$16 sps:$4 sm:$0xff]   ;;  %v4042_v37 = vld [vmem:[#allocation13 + $0x1ec] ss:$16 sps:$4 sm:$0xff]  }
 0x4b7   : > { %1217 = vperm.xlu0 %3939, %v1176_v36   ;;  %v1180_v42 = vmul.f32 %v4321_v40, %v5323_v20  ;;  %v4323_v44 = vpop.eup %4322  ;;  %v3986_v20 = vld [vmem:[#allocation13 + $0xc8] ss:$16 sps:$4 sm:$0xff]   ;;  %2288 = vmatprep.subr.bf16.mxu0 %v3988_v4  ;;  %v4038_v36 = vld [vmem:[#allocation13 + $0x1e4] ss:$16 sps:$4 sm:$0xff]   ;;  %v1193_v4 = vld [vmem:[%s5614_s8 + $0x10] sm:$0xff] }
 0x4b8   : > { %v1182_v13 = vmul.f32 %v4323_v44, %v5326_v23  ;;  %v4325_v47 = vpop.eup %4324  ;;  %v4046_v40 = vld [vmem:[#allocation13 + $0x204] ss:$16 sps:$4 sm:$0xff]   ;;  %v1203_v19 = vunpack.c.l.bf16 %v1193_v4 }
 0x4b9   : > { %v1184_v53 = vmul.f32 %v4325_v47, %v5329_v27  ;;  %v4327_v54 = vpop.eup %4326  ;;  %v1201_v47 = vunpack.c.l.bf16 %v1192_v57 }
 0x4ba   : > { %2289 = vmatpush1.bf16.msra.mxu0 %v3986_v20  ;;  %v1186_v23 = vmul.f32 %v4327_v54, %v5332_v28  ;;  %v4329_v60 = vpop.eup %4328 }
 0x4bb   : > { %1222 = vperm.xlu0 %3939, %v1178_v39   ;;  %2290 = vmatprep.subr.bf16.mxu0 %v3994_v8  ;;  %v1188_v27 = vmul.f32 %v4329_v60, %v5335_v29  ;;  %v4331_v2 = vpop.eup %4330  ;;  %v4014_v29 = vld [vmem:[#allocation13 + $0x164] ss:$16 sps:$4 sm:$0xff]   ;;  %v4040_v39 = vld [vmem:[#allocation13 + $0x1e8] ss:$16 sps:$4 sm:$0xff]   ;;  %v1204_v8 = vunpack.c.h.bf16 %v1193_v4 }
 0x4bc   : > { %v1190_v28 = vmul.f32 %v4331_v2, %v5338_v30  ;;  %2216 = vmatprep.subr.bf16.mxu1 %v4014_v29  ;;  %v4024_v30 = vld [vmem:[#allocation13 + $0x18c] ss:$16 sps:$4 sm:$0xff]   ;;  %v1208_v29 = vunpack.c.h.bf16 %v1195_v62 }
 0x4bd   : > { %2217 = vmatpush1.bf16.msra.mxu1 %v4019_v15 }
 0x4be   : > { %2291 = vmatpush1.bf16.msra.mxu0 %v3992_v55  ;;  %2218 = vmatprep.subr.bf16.mxu1 %v4020_v16 }
 0x4bf   : > { %1227 = vperm.xlu0 %3939, %v1180_v42   ;;  %2292 = vmatprep.subr.bf16.mxu0 %v4000_v59  ;;  %v1191_v42 = vld [vmem:[%s5614_s8] sm:$0xff] }
 0x4c0   : > { %v1200_v43 = vunpack.c.h.bf16 %v1191_v42  ;;  %v1199_v44 = vunpack.c.l.bf16 %v1191_v42 }
 0x4c1   : > { %2219 = vmatpush1.bf16.msra.mxu1 %v4025_v21 }
 0x4c2   : > { %2293 = vmatpush1.bf16.msra.mxu0 %v3998_v61  ;;  %2220 = vmatprep.subr.bf16.mxu1 %v4026_v22 }
 0x4c3   : > { %1232 = vperm.xlu0 %3939, %v1182_v13   ;;  %2294 = vmatprep.subr.bf16.mxu0 %v4006_v1 }
 0x4c5   : > { %2221 = vmatpush1.bf16.msra.mxu1 %v4031_v32 }
 0x4c6   : > { %2295 = vmatpush1.bf16.msra.mxu0 %v4004_v3  ;;  %2222 = vmatprep.subr.bf16.mxu1 %v4032_v33  ;;  %v1196_v3 = vld [vmem:[%s5614_s8 + $0x28] sm:$0xff] }
 0x4c7   : > { %1237 = vperm.xlu0 %3939, %v1184_v53   ;;  %2296 = vmatprep.subr.bf16.mxu0 %v4012_v6  ;;  %v1209_v16 = vunpack.c.l.bf16 %v1196_v3 }
 0x4c9   : > { %2223 = vmatpush1.bf16.msra.mxu1 %v4037_v35 }
 0x4ca   : > { %2297 = vmatpush1.bf16.msra.mxu0 %v4010_v7  ;;  %2224 = vmatprep.subr.bf16.mxu1 %v4038_v36 }
 0x4cb   : > { %1242 = vperm.xlu0 %3939, %v1186_v23   ;;  %2298 = vmatprep.subr.bf16.mxu0 %v4018_v10  ;;  %v1194_v23 = vld [vmem:[%s5614_s8 + $0x18] sm:$0xff]  ;;  %v1197_v10 = vld [vmem:[%s5614_s8 + $0x30] sm:$0xff] }
 0x4cc   : > { %v1205_v1 = vunpack.c.l.bf16 %v1194_v23  ;;  %v1206_v2 = vunpack.c.h.bf16 %v1194_v23  ;;  %v1211_v33 = vunpack.c.l.bf16 %v1197_v10 }
 0x4cd   : > { %2225 = vmatpush1.bf16.msra.mxu1 %v4043_v38 }
 0x4ce   : > { %2299 = vmatpush1.bf16.msra.mxu0 %v4016_v11  ;;  %2235 = vmatprep.subr.bf16.mxu1 %v4046_v40 }
 0x4cf   : > { %1247 = vperm.xlu0 %3939, %v1188_v27   ;;  %2300 = vmatprep.subr.bf16.mxu0 %v4024_v30  ;;  %v1210_v30 = vunpack.c.h.bf16 %v1196_v3 }
 0x4d2   : > { %2301 = vmatpush1.bf16.msra.mxu0 %v4022_v18 }
 0x4d3   : > { %1252 = vperm.xlu0 %3939, %v1190_v28   ;;  %2302 = vmatprep.subr.bf16.mxu0 %v4030_v24 }
 0x4d6   : > { %2303 = vmatpush1.bf16.msra.mxu0 %v4028_v31 }
 0x4d7   : > { %2304 = vmatprep.subr.bf16.mxu0 %v4036_v17  ;;  %v1212_v17 = vunpack.c.h.bf16 %v1197_v10 }
 0x4da   : > { %2305 = vmatpush1.bf16.msra.mxu0 %v4034_v34  ;;  %v5401_v34 = vld [vmem:[%s5614_s8 + $0x38] sm:$0xff] }
 0x4db   : > { %2306 = vmatprep.subr.bf16.mxu0 %v4042_v37 }
 0x4de   : > { %2307 = vmatpush1.bf16.msra.mxu0 %v4040_v39 }
 0x4df   : > { %2317 = vmatprep.subr.bf16.mxu0 %v4049_v41 }
 0x536   : > { %v1218_v12 = vpop.permute.xlu0 %1217 }
 0x537   : > { %v1256_v45 = vmul.f32 %v1218_v12, %v1200_v43  ;;  %v1255_v13 = vmul.f32 %v1218_v12, %v1199_v44 }
 0x539   : > { %v1277_v46 = vrot.slane %v1256_v45, 4  ;;  %v1271_v54 = vrot.slane %v1255_v13, 4 }
 0x53a   : > { %v1223_v20 = vpop.permute.xlu0 %1222 }
 0x53b   : > { %v1278_v48 = vadd.f32 %v1277_v46, %v1256_v45  ;;  %v1258_v53 = vmul.f32 %v1223_v20, %v1202_v0  ;;  %v1257_v58 = vmul.f32 %v1223_v20, %v1201_v47  ;;  %v1272_v25 = vadd.f32 %v1271_v54, %v1255_v13 }
 0x53c   : > { %v1213_v45 = vunpack.c.l.bf16 %v5401_v34 }
 0x53d   : > { %v1279_v55 = vrot.slane %v1278_v48, 2  ;;  %v1289_v56 = vrot.slane %v1258_v53, 4  ;;  %v1283_v5 = vrot.slane %v1257_v58, 4  ;;  %v1273_v31 = vrot.slane %v1272_v25, 2 }
 0x53e   : > { %v1228_v59 = vpop.permute.xlu0 %1227 }
 0x53f   : > { %v1280_v60 = vadd.f32 %v1279_v55, %v1278_v48  ;;  %v1290_v61 = vadd.f32 %v1289_v56, %v1258_v53  ;;  %v1259_v27 = vmul.f32 %v1228_v59, %v1203_v19  ;;  %v1260_v63 = vmul.f32 %v1228_v59, %v1204_v8 }
 0x540   : > { %v1284_v35 = vadd.f32 %v1283_v5, %v1257_v58  ;;  %v5405_v47 = vadd.f32 %v1273_v31, %v1272_v25 }
 0x541   : > { %v1291_v28 = vrot.slane %v1290_v61, 2  ;;  %v1301_v6 = vrot.slane %v1260_v63, 4  ;;  %v1281_v11 = vrot.slane %v1280_v60, 1  ;;  %v1295_v18 = vrot.slane %v1259_v27, 4 }
 0x542   : > { %v1233_v7 = vpop.permute.xlu0 %1232  ;;  %v1285_v20 = vrot.slane %v1284_v35, 2 }
 0x543   : > { %v1292_v15 = vadd.f32 %v1291_v28, %v1290_v61  ;;  %v1302_v21 = vadd.f32 %v1301_v6, %v1260_v63  ;;  %v1261_v22 = vmul.f32 %v1233_v7, %v1205_v1  ;;  %v1262_v24 = vmul.f32 %v1233_v7, %v1206_v2 }
 0x544   : > { %v1282_v40 = vadd.f32 %v1281_v11, %v1280_v60  ;;  %v1296_v57 = vadd.f32 %v1295_v18, %v1259_v27  ;;  %v1214_v60 = vunpack.c.h.bf16 %v5401_v34  ;;  %v1275_v1 = vrot.slane %v5405_v47, 1 }
 0x545   : > { %v1293_v32 = vrot.slane %v1292_v15, 1  ;;  %v1303_v36 = vrot.slane %v1302_v21, 2  ;;  %v1307_v37 = vrot.slane %v1261_v22, 4  ;;  %v1313_v38 = vrot.slane %v1262_v24, 4 }
 0x546   : > { %v1238_v39 = vpop.permute.xlu0 %1237  ;;  %v1297_v23 = vrot.slane %v1296_v57, 2  ;;  %v1286_v2 = vadd.f32 %v1285_v20, %v1284_v35 }
 0x547   : > { %v1294_v41 = vadd.f32 %v1293_v32, %v1292_v15  ;;  %v1263_v42 = vmul.f32 %v1238_v39, %v1207_v9  ;;  %v1264_v43 = vmul.f32 %v1238_v39, %v1208_v29  ;;  %v1304_v44 = vadd.f32 %v1303_v36, %v1302_v21 }
 0x548   : > { %v1314_v12 = vadd.f32 %v1313_v38, %v1262_v24  ;;  %v1308_v13 = vadd.f32 %v1307_v37, %v1261_v22  ;;  %v1298_v29 = vadd.f32 %v1297_v23, %v1296_v57  ;;  %v1287_v22 = vrot.slane %v1286_v2, 1 }
 0x549   : > { %v1391_v0 = vsel %vm975_vm1, %v1294_v41, %v1282_v40  ;;  %v1319_v46 = vrot.slane %v1263_v42, 4  ;;  %v1325_v4 = vrot.slane %v1264_v43, 4  ;;  %v1305_v48 = vrot.slane %v1304_v44, 1 }
 0x54a   : > { %v1315_v53 = vrot.slane %v1314_v12, 2  ;;  %v1243_v19 = vpop.permute.xlu0 %1242  ;;  %v1309_v61 = vrot.slane %v1308_v13, 2 }
 0x54b   : > { %v1320_v8 = vadd.f32 %v1319_v46, %v1263_v42  ;;  %v1326_v54 = vadd.f32 %v1325_v4, %v1264_v43  ;;  %v1265_v55 = vmul.f32 %v1243_v19, %v1209_v16  ;;  %v1266_v56 = vmul.f32 %v1243_v19, %v1210_v30 }
 0x54c   : > { %v1306_v58 = vadd.f32 %v1305_v48, %v1304_v44  ;;  %v1316_v59 = vadd.f32 %v1315_v53, %v1314_v12  ;;  %v1310_v16 = vadd.f32 %v1309_v61, %v1308_v13  ;;  %v1288_v46 = vadd.f32 %v1287_v22, %v1286_v2 }
 0x54d   : > { %v1327_v62 = vrot.slane %v1326_v54, 2  ;;  %v1331_v27 = vrot.slane %v1265_v55, 4  ;;  %v1337_v63 = vrot.slane %v1266_v56, 4  ;;  %v1321_v5 = vrot.slane %v1320_v8, 2 }
 0x54e   : > { %v1392_v3 = vsel %vm977_vm2, %v1306_v58, %v1391_v0  ;;  %v1317_v25 = vrot.slane %v1316_v59, 1  ;;  %v1248_v28 = vpop.permute.xlu0 %1247 }
 0x54f   : > { %v1328_v6 = vadd.f32 %v1327_v62, %v1326_v54  ;;  %v1332_v7 = vadd.f32 %v1331_v27, %v1265_v55  ;;  %v1338_v9 = vadd.f32 %v1337_v63, %v1266_v56  ;;  %v1267_v11 = vmul.f32 %v1248_v28, %v1211_v33 }
 0x550   : > { %v1318_v10 = vadd.f32 %v1317_v25, %v1316_v59  ;;  %v1268_v15 = vmul.f32 %v1248_v28, %v1212_v17  ;;  %v1322_v35 = vadd.f32 %v1321_v5, %v1320_v8  ;;  %v1299_v33 = vrot.slane %v1298_v29, 1 }
 0x551   : > { %v1329_v30 = vrot.slane %v1328_v6, 1  ;;  %v1333_v18 = vrot.slane %v1332_v7, 2  ;;  %v1339_v21 = vrot.slane %v1338_v9, 2  ;;  %v1343_v31 = vrot.slane %v1267_v11, 4 }
 0x552   : > { %v1393_v24 = vsel %vm979_vm3, %v1318_v10, %v1392_v3  ;;  %v1349_v32 = vrot.slane %v1268_v15, 4  ;;  %v1253_v34 = vpop.permute.xlu0 %1252  ;;  %v1311_v17 = vrot.slane %v1310_v16, 1  ;;  %v1323_v4 = vrot.slane %v1322_v35, 1 }
 0x553   : > { %v1330_v36 = vadd.f32 %v1329_v30, %v1328_v6  ;;  %v1334_v37 = vadd.f32 %v1333_v18, %v1332_v7  ;;  %v1340_v38 = vadd.f32 %v1339_v21, %v1338_v9  ;;  %v1344_v39 = vadd.f32 %v1343_v31, %v1267_v11  ;;  %v669_v21 = vld [vmem:[#allocation2] sm:$0xff] }
 0x554   : > { %v1350_v40 = vadd.f32 %v1349_v32, %v1268_v15  ;;  %v1269_v41 = vmul.f32 %v1253_v34, %v1213_v45  ;;  %v1270_v42 = vmul.f32 %v1253_v34, %v1214_v60  ;;  %v1276_v45 = vadd.f32 %v1275_v1, %v5405_v47  ;;  %v4044_v31 = vld [vmem:[#allocation13 + $0x200] ss:$16 sps:$4 sm:$0xff]   ;;  %v4047_v32 = vld [vmem:[#allocation13 + $0x208] ss:$16 sps:$4 sm:$0xff]   ;;  %v4052_v34 = vld [vmem:[#allocation13 + $0x224] ss:$16 sps:$4 sm:$0xff]  }
 0x555   : > { %v1394_v43 = vsel %vm981_vm4, %v1330_v36, %v1393_v24  ;;  %v1341_v57 = vrot.slane %v1340_v38, 1  ;;  %v1345_v44 = vrot.slane %v1344_v39, 2  ;;  %v1335_v20 = vrot.slane %v1334_v37, 1 }
 0x556   : > { %v1351_v12 = vrot.slane %v1350_v40, 2  ;;  %v1355_v0 = vrot.slane %v1269_v41, 4  ;;  %v1361_v13 = vrot.slane %v1270_v42, 4  ;;  %v1300_v55 = vadd.f32 %v1299_v33, %v1298_v29  ;;  %v1367_v29 = vld [vmem:[%s5211_s15] sm:$0xff] }
 0x557   : > { %v1342_v48 = vadd.f32 %v1341_v57, %v1340_v38  ;;  %v1346_v53 = vadd.f32 %v1345_v44, %v1344_v39  ;;  %v1312_v56 = vadd.f32 %v1311_v17, %v1310_v16  ;;  %v1384_v62 = vsel %vm975_vm1, %v1288_v46, %v1276_v45  ;;  %v4053_v38 = vld [vmem:[#allocation13 + $0x228] ss:$16 sps:$4 sm:$0xff]   ;;  %v4058_v39 = vld [vmem:[#allocation13 + $0x244] ss:$16 sps:$4 sm:$0xff]   ;;  %v4067_v17 = vld [vmem:[#allocation13 + $0x26c] ss:$16 sps:$4 sm:$0xff]  }
 0x558   : > { %v1352_v19 = vadd.f32 %v1351_v12, %v1350_v40  ;;  %v1356_v8 = vadd.f32 %v1355_v0, %v1269_v41  ;;  %v1362_v54 = vadd.f32 %v1361_v13, %v1270_v42  ;;  %v1324_v27 = vadd.f32 %v1323_v4, %v1322_v35  ;;  %v4055_v35 = vld [vmem:[#allocation13 + $0x22c] ss:$16 sps:$4 sm:$0xff]   ;;  %v4056_v41 = vld [vmem:[#allocation13 + $0x240] ss:$16 sps:$4 sm:$0xff]   ;;  %v4059_v42 = vld [vmem:[#allocation13 + $0x248] ss:$16 sps:$4 sm:$0xff]  }
 0x559   : > { %v1395_v23 = vsel %vm983_vm5, %v1342_v48, %v1394_v43  ;;  %v1347_v58 = vrot.slane %v1346_v53, 1  ;;  %v1336_v63 = vadd.f32 %v1335_v20, %v1334_v37  ;;  %v1385_v28 = vsel %vm977_vm2, %v1300_v55, %v1384_v62  ;;  %v4050_v37 = vld [vmem:[#allocation13 + $0x220] ss:$16 sps:$4 sm:$0xff]   ;;  %v4061_v40 = vld [vmem:[#allocation13 + $0x24c] ss:$16 sps:$4 sm:$0xff]  }
 0x55a   : > { %v1353_v59 = vrot.slane %v1352_v19, 1  ;;  %v1357_v60 = vrot.slane %v1356_v8, 2  ;;  %v1363_v61 = vrot.slane %v1362_v54, 2  ;;  %v1386_v6 = vsel %vm979_vm3, %v1312_v56, %v1385_v28  ;;  %v4064_v33 = vld [vmem:[#allocation13 + $0x264] ss:$16 sps:$4 sm:$0xff]  }
 0x55b   : > { %v1348_v5 = vadd.f32 %v1347_v58, %v1346_v53  ;;  %v1387_v9 = vsel %vm981_vm4, %v1324_v27, %v1386_v6  ;;  %v1400_v18 = vpack.c.bf16 %v1367_v29, %v1367_v29  ;;  %v1403_v36 = vpack.c.bf16 %v669_v21, %v669_v21  ;;  %v4062_v43 = vld [vmem:[#allocation13 + $0x260] ss:$16 sps:$4 sm:$0xff]   ;;  %v4065_v57 = vld [vmem:[#allocation13 + $0x268] ss:$16 sps:$4 sm:$0xff]   ;;  %v4070_v44 = vld [vmem:[#allocation13 + $0x284] ss:$16 sps:$4 sm:$0xff]  }
 0x55c   : > { %v1354_v2 = vadd.f32 %v1353_v59, %v1352_v19  ;;  %v1358_v3 = vadd.f32 %v1357_v60, %v1356_v8  ;;  %v1364_v25 = vadd.f32 %v1363_v61, %v1362_v54  ;;  %v1388_v15 = vsel %vm983_vm5, %v1336_v63, %v1387_v9  ;;  %v4073_v12 = vld [vmem:[#allocation13 + $0x28c] ss:$16 sps:$4 sm:$0xff]   ;;  %v4068_v0 = vld [vmem:[#allocation13 + $0x280] ss:$16 sps:$4 sm:$0xff]   ;;  %v4071_v13 = vld [vmem:[#allocation13 + $0x288] ss:$16 sps:$4 sm:$0xff]  }
 0x55d   : > { %v1389_v16 = vsel %vm985_vm6, %v1348_v5, %v1388_v15  ;;  %v4076_v46 = vld [vmem:[#allocation13 + $0x2a4] ss:$16 sps:$4 sm:$0xff]   ;;  %v4079_v4 = vld [vmem:[#allocation13 + $0x2ac] ss:$16 sps:$4 sm:$0xff]   ;;  %v4074_v20 = vld [vmem:[#allocation13 + $0x2a0] ss:$16 sps:$4 sm:$0xff]  }
 0x55e   : > { %v1359_v47 = vrot.slane %v1358_v3, 1  ;;  %v1365_v1 = vrot.slane %v1364_v25, 1  ;;  %v1396_v7 = vsel %vm985_vm6, %v1354_v2, %v1395_v23  ;;  %v4077_v48 = vld [vmem:[#allocation13 + $0x2a8] ss:$16 sps:$4 sm:$0xff]   ;;  %v4082_v53 = vld [vmem:[#allocation13 + $0x2c4] ss:$16 sps:$4 sm:$0xff]  }
 0x55f   : > { %v4085_v19 = vld [vmem:[#allocation13 + $0x2cc] ss:$16 sps:$4 sm:$0xff]   ;;  %v4080_v8 = vld [vmem:[#allocation13 + $0x2c0] ss:$16 sps:$4 sm:$0xff]   ;;  %v4083_v54 = vld [vmem:[#allocation13 + $0x2c8] ss:$16 sps:$4 sm:$0xff]  }
 0x560   : > { %v1366_v10 = vadd.f32 %v1365_v1, %v1364_v25  ;;  %v1360_v11 = vadd.f32 %v1359_v47, %v1358_v3  ;;  %v4088_v45 = vld [vmem:[#allocation13 + $0x2e4] ss:$16 sps:$4 sm:$0xff]   ;;  %v4091_v55 = vld [vmem:[#allocation13 + $0x2ec] ss:$16 sps:$4 sm:$0xff]   ;;  %v4086_v56 = vld [vmem:[#allocation13 + $0x2e0] ss:$16 sps:$4 sm:$0xff]  }
 0x561   : > { %v4089_v23 = vld [vmem:[#allocation13 + $0x2e8] ss:$16 sps:$4 sm:$0xff]   ;;  %v4094_v58 = vld [vmem:[#allocation13 + $0x304] ss:$16 sps:$4 sm:$0xff]   ;;  %v4097_v59 = vld [vmem:[#allocation13 + $0x30c] ss:$16 sps:$4 sm:$0xff]  }
 0x562   : > { %v1390_v30 = vsel %vm987_vm7, %v1360_v11, %v1389_v16  ;;  %v5424_v22 = vsel %vm987_vm7, %v1366_v10, %v1396_v7  ;;  %v4092_v60 = vld [vmem:[#allocation13 + $0x300] ss:$16 sps:$4 sm:$0xff]   ;;  %v4095_v61 = vld [vmem:[#allocation13 + $0x308] ss:$16 sps:$4 sm:$0xff]   ;;  %v4100_v62 = vld [vmem:[#allocation13 + $0x324] ss:$16 sps:$4 sm:$0xff]  }
 0x563   : > { %v1401_v24 = vpack.c.bf16 %v1390_v30, %v1390_v30  ;;  %v4103_v27 = vld [vmem:[#allocation13 + $0x32c] ss:$16 sps:$4 sm:$0xff]   ;;  %v4098_v63 = vld [vmem:[#allocation13 + $0x320] ss:$16 sps:$4 sm:$0xff]   ;;  %v4101_v2 = vld [vmem:[#allocation13 + $0x328] ss:$16 sps:$4 sm:$0xff]  }
 0x564   : > { %v4106_v3 = vld [vmem:[#allocation13 + $0x344] ss:$16 sps:$4 sm:$0xff]   ;;  %v4109_v25 = vld [vmem:[#allocation13 + $0x34c] ss:$16 sps:$4 sm:$0xff]   ;;  %v4104_v28 = vld [vmem:[#allocation13 + $0x340] ss:$16 sps:$4 sm:$0xff]  }
 0x565   : > { %2226 = vmatprep.mubr.bf16.mxu1 %v1401_v24  ;;  %2308 = vmatprep.mubr.bf16.mxu0 %v1401_v24  ;;  %v4107_v5 = vld [vmem:[#allocation13 + $0x348] ss:$16 sps:$4 sm:$0xff]   ;;  %v4112_v47 = vld [vmem:[#allocation13 + $0x364] ss:$16 sps:$4 sm:$0xff]   ;;  %v4115_v1 = vld [vmem:[#allocation13 + $0x36c] ss:$16 sps:$4 sm:$0xff]  }
 0x566   : > { %2227 = vmatmul.mubr.bf16.vlgmr.msra.gmra.mrb[0].mxu1 %v1400_v18  ;;  %2309 = vmatmul.mubr.bf16.vlgmr.msra.gmra.mrb[4].mxu0 %v1400_v18  ;;  %v4110_v6 = vld [vmem:[#allocation13 + $0x360] ss:$16 sps:$4 sm:$0xff]   ;;  %v4113_v7 = vld [vmem:[#allocation13 + $0x368] ss:$16 sps:$4 sm:$0xff]   ;;  %v4118_v9 = vld [vmem:[#allocation13 + $0x384] ss:$16 sps:$4 sm:$0xff]  }
 0x567   : > { %2236 = vmatpush1.bf16.msra.mxu1 %v4044_v31  ;;  %2318 = vmatpush1.bf16.msra.mxu0 %v4047_v32  ;;  %v4121_v29 = vld [vmem:[#allocation13 + $0x38c] ss:$16 sps:$4 sm:$0xff]   ;;  %v4116_v10 = vld [vmem:[#allocation13 + $0x380] ss:$16 sps:$4 sm:$0xff]   ;;  %v4119_v11 = vld [vmem:[#allocation13 + $0x388] ss:$16 sps:$4 sm:$0xff]  }
 0x568   : > { %2237 = vmatprep.subr.bf16.mxu1 %v4052_v34  ;;  %2319 = vmatprep.subr.bf16.mxu0 %v4055_v35  ;;  %v4124_v15 = vld [vmem:[#allocation13 + $0x3a4] ss:$16 sps:$4 sm:$0xff]   ;;  %v4127_v16 = vld [vmem:[#allocation13 + $0x3ac] ss:$16 sps:$4 sm:$0xff]   ;;  %v4122_v30 = vld [vmem:[#allocation13 + $0x3a0] ss:$16 sps:$4 sm:$0xff]  }
 0x569   : > { %2267 = vmatprep.mubr.bf16.mxu1 %v1403_v36  ;;  %2349 = vmatprep.mubr.bf16.mxu0 %v1403_v36  ;;  %v4125_v18 = vld [vmem:[#allocation13 + $0x3a8] ss:$16 sps:$4 sm:$0xff]   ;;  %v4130_v21 = vld [vmem:[#allocation13 + $0x3c4] ss:$16 sps:$4 sm:$0xff]   ;;  %v4133_v24 = vld [vmem:[#allocation13 + $0x3cc] ss:$16 sps:$4 sm:$0xff]  }
 0x56a   : > { %v4128_v31 = vld [vmem:[#allocation13 + $0x3c0] ss:$16 sps:$4 sm:$0xff]   ;;  %v4131_v32 = vld [vmem:[#allocation13 + $0x3c8] ss:$16 sps:$4 sm:$0xff]   ;;  %v4136_v34 = vld [vmem:[#allocation13 + $0x3e4] ss:$16 sps:$4 sm:$0xff]  }
 0x56b   : > { %2238 = vmatpush1.bf16.msra.mxu1 %v4050_v37  ;;  %2320 = vmatpush1.bf16.msra.mxu0 %v4053_v38  ;;  %v4139_v35 = vld [vmem:[#allocation13 + $0x3ec] ss:$16 sps:$4 sm:$0xff]   ;;  %v4134_v36 = vld [vmem:[#allocation13 + $0x3e0] ss:$16 sps:$4 sm:$0xff]   ;;  %v4137_v37 = vld [vmem:[#allocation13 + $0x3e8] ss:$16 sps:$4 sm:$0xff]  }
 0x56c   : > { %2239 = vmatprep.subr.bf16.mxu1 %v4058_v39  ;;  %2321 = vmatprep.subr.bf16.mxu0 %v4061_v40  ;;  %v4142_v38 = vld [vmem:[#allocation14 + $0x4] ss:$16 sps:$4 sm:$0xff]   ;;  %v4145_v39 = vld [vmem:[#allocation14 + $0xc] ss:$16 sps:$4 sm:$0xff]   ;;  %v4140_v40 = vld [vmem:[#allocation14] ss:$16 sps:$4 sm:$0xff]  }
 0x56f   : > { %2240 = vmatpush1.bf16.msra.mxu1 %v4056_v41  ;;  %2322 = vmatpush1.bf16.msra.mxu0 %v4059_v42  ;;  %v4143_v41 = vld [vmem:[#allocation14 + $0x8] ss:$16 sps:$4 sm:$0xff]   ;;  %v1402_v42 = vpack.c.bf16 %v5424_v22, %v5424_v22  ;;  %v4152_v22 = vld [vmem:[#allocation14 + $0x40] ss:$16 sps:$4 sm:$0xff]  }
 0x570   : > { %2241 = vmatprep.subr.bf16.mxu1 %v4064_v33  ;;  %2323 = vmatprep.subr.bf16.mxu0 %v4067_v17  ;;  %v4148_v33 = vld [vmem:[#allocation14 + $0x24] ss:$16 sps:$4 sm:$0xff]   ;;  %v4151_v17 = vld [vmem:[#allocation14 + $0x2c] ss:$16 sps:$4 sm:$0xff]  }
 0x573   : > { %2242 = vmatpush1.bf16.msra.mxu1 %v4062_v43  ;;  %2324 = vmatpush1.bf16.msra.mxu0 %v4065_v57  ;;  %v4146_v43 = vld [vmem:[#allocation14 + $0x20] ss:$16 sps:$4 sm:$0xff]   ;;  %v4149_v57 = vld [vmem:[#allocation14 + $0x28] ss:$16 sps:$4 sm:$0xff]  }
 0x574   : > { %2243 = vmatprep.subr.bf16.mxu1 %v4070_v44  ;;  %2325 = vmatprep.subr.bf16.mxu0 %v4073_v12  ;;  %v4154_v44 = vld [vmem:[#allocation14 + $0x44] ss:$16 sps:$4 sm:$0xff]   ;;  %v4157_v12 = vld [vmem:[#allocation14 + $0x4c] ss:$16 sps:$4 sm:$0xff]  }
 0x577   : > { %2244 = vmatpush1.bf16.msra.mxu1 %v4068_v0  ;;  %2326 = vmatpush1.bf16.msra.mxu0 %v4071_v13  ;;  %v4155_v0 = vld [vmem:[#allocation14 + $0x48] ss:$16 sps:$4 sm:$0xff]   ;;  %v4160_v13 = vld [vmem:[#allocation14 + $0x64] ss:$16 sps:$4 sm:$0xff]  }
 0x578   : > { %2245 = vmatprep.subr.bf16.mxu1 %v4076_v46  ;;  %2327 = vmatprep.subr.bf16.mxu0 %v4079_v4  ;;  %v4163_v46 = vld [vmem:[#allocation14 + $0x6c] ss:$16 sps:$4 sm:$0xff]   ;;  %v4158_v4 = vld [vmem:[#allocation14 + $0x60] ss:$16 sps:$4 sm:$0xff]  }
 0x57b   : > { %2246 = vmatpush1.bf16.msra.mxu1 %v4074_v20  ;;  %2328 = vmatpush1.bf16.msra.mxu0 %v4077_v48  ;;  %v4161_v20 = vld [vmem:[#allocation14 + $0x68] ss:$16 sps:$4 sm:$0xff]   ;;  %v4166_v48 = vld [vmem:[#allocation14 + $0x84] ss:$16 sps:$4 sm:$0xff]  }
 0x57c   : > { %2247 = vmatprep.subr.bf16.mxu1 %v4082_v53  ;;  %2329 = vmatprep.subr.bf16.mxu0 %v4085_v19  ;;  %v4169_v53 = vld [vmem:[#allocation14 + $0x8c] ss:$16 sps:$4 sm:$0xff]   ;;  %v4164_v19 = vld [vmem:[#allocation14 + $0x80] ss:$16 sps:$4 sm:$0xff]  }
 0x57f   : > { %2248 = vmatpush1.bf16.msra.mxu1 %v4080_v8  ;;  %2330 = vmatpush1.bf16.msra.mxu0 %v4083_v54  ;;  %v4172_v8 = vld [vmem:[#allocation14 + $0xa4] ss:$16 sps:$4 sm:$0xff]   ;;  %v4175_v54 = vld [vmem:[#allocation14 + $0xac] ss:$16 sps:$4 sm:$0xff]  }
 0x580   : > { %2249 = vmatprep.subr.bf16.mxu1 %v4088_v45  ;;  %2331 = vmatprep.subr.bf16.mxu0 %v4091_v55  ;;  %v4170_v45 = vld [vmem:[#allocation14 + $0xa0] ss:$16 sps:$4 sm:$0xff]   ;;  %v4173_v55 = vld [vmem:[#allocation14 + $0xa8] ss:$16 sps:$4 sm:$0xff]  }
 0x583   : > { %2250 = vmatpush1.bf16.msra.mxu1 %v4086_v56  ;;  %2332 = vmatpush1.bf16.msra.mxu0 %v4089_v23  ;;  %v4178_v56 = vld [vmem:[#allocation14 + $0xc4] ss:$16 sps:$4 sm:$0xff]   ;;  %v4181_v23 = vld [vmem:[#allocation14 + $0xcc] ss:$16 sps:$4 sm:$0xff]  }
 0x584   : > { %2251 = vmatprep.subr.bf16.mxu1 %v4094_v58  ;;  %2333 = vmatprep.subr.bf16.mxu0 %v4097_v59  ;;  %v4176_v58 = vld [vmem:[#allocation14 + $0xc0] ss:$16 sps:$4 sm:$0xff]   ;;  %v4179_v59 = vld [vmem:[#allocation14 + $0xc8] ss:$16 sps:$4 sm:$0xff]  }
 0x587   : > { %2252 = vmatpush1.bf16.msra.mxu1 %v4092_v60  ;;  %2334 = vmatpush1.bf16.msra.mxu0 %v4095_v61  ;;  %v4184_v60 = vld [vmem:[#allocation14 + $0xe4] ss:$16 sps:$4 sm:$0xff]   ;;  %v4187_v61 = vld [vmem:[#allocation14 + $0xec] ss:$16 sps:$4 sm:$0xff]  }
 0x588   : > { %2253 = vmatprep.subr.bf16.mxu1 %v4100_v62  ;;  %2335 = vmatprep.subr.bf16.mxu0 %v4103_v27  ;;  %v4182_v62 = vld [vmem:[#allocation14 + $0xe0] ss:$16 sps:$4 sm:$0xff]   ;;  %v4185_v27 = vld [vmem:[#allocation14 + $0xe8] ss:$16 sps:$4 sm:$0xff]  }
 0x58b   : > { %2254 = vmatpush1.bf16.msra.mxu1 %v4098_v63  ;;  %2336 = vmatpush1.bf16.msra.mxu0 %v4101_v2  ;;  %v4190_v63 = vld [vmem:[#allocation14 + $0x104] ss:$16 sps:$4 sm:$0xff]   ;;  %v4193_v2 = vld [vmem:[#allocation14 + $0x10c] ss:$16 sps:$4 sm:$0xff]  }
 0x58c   : > { %2255 = vmatprep.subr.bf16.mxu1 %v4106_v3  ;;  %2337 = vmatprep.subr.bf16.mxu0 %v4109_v25  ;;  %v4188_v3 = vld [vmem:[#allocation14 + $0x100] ss:$16 sps:$4 sm:$0xff]   ;;  %v4191_v25 = vld [vmem:[#allocation14 + $0x108] ss:$16 sps:$4 sm:$0xff]  }
 0x58f   : > { %2256 = vmatpush1.bf16.msra.mxu1 %v4104_v28  ;;  %2338 = vmatpush1.bf16.msra.mxu0 %v4107_v5  ;;  %v4196_v28 = vld [vmem:[#allocation14 + $0x124] ss:$16 sps:$4 sm:$0xff]   ;;  %v4199_v5 = vld [vmem:[#allocation14 + $0x12c] ss:$16 sps:$4 sm:$0xff]  }
 0x590   : > { %2257 = vmatprep.subr.bf16.mxu1 %v4112_v47  ;;  %2339 = vmatprep.subr.bf16.mxu0 %v4115_v1  ;;  %v4194_v47 = vld [vmem:[#allocation14 + $0x120] ss:$16 sps:$4 sm:$0xff]   ;;  %v4197_v1 = vld [vmem:[#allocation14 + $0x128] ss:$16 sps:$4 sm:$0xff]  }
 0x593   : > { %2258 = vmatpush1.bf16.msra.mxu1 %v4110_v6  ;;  %2340 = vmatpush1.bf16.msra.mxu0 %v4113_v7  ;;  %v4202_v6 = vld [vmem:[#allocation14 + $0x144] ss:$16 sps:$4 sm:$0xff]   ;;  %v4205_v7 = vld [vmem:[#allocation14 + $0x14c] ss:$16 sps:$4 sm:$0xff]  }
 0x594   : > { %2259 = vmatprep.subr.bf16.mxu1 %v4118_v9  ;;  %2341 = vmatprep.subr.bf16.mxu0 %v4121_v29  ;;  %v4200_v9 = vld [vmem:[#allocation14 + $0x140] ss:$16 sps:$4 sm:$0xff]   ;;  %v4203_v29 = vld [vmem:[#allocation14 + $0x148] ss:$16 sps:$4 sm:$0xff]  }
 0x597   : > { %2260 = vmatpush1.bf16.msra.mxu1 %v4116_v10  ;;  %2342 = vmatpush1.bf16.msra.mxu0 %v4119_v11  ;;  %v4208_v10 = vld [vmem:[#allocation14 + $0x164] ss:$16 sps:$4 sm:$0xff]   ;;  %v4211_v11 = vld [vmem:[#allocation14 + $0x16c] ss:$16 sps:$4 sm:$0xff]  }
 0x598   : > { %2261 = vmatprep.subr.bf16.mxu1 %v4124_v15  ;;  %2343 = vmatprep.subr.bf16.mxu0 %v4127_v16  ;;  %v4206_v15 = vld [vmem:[#allocation14 + $0x160] ss:$16 sps:$4 sm:$0xff]   ;;  %v4209_v16 = vld [vmem:[#allocation14 + $0x168] ss:$16 sps:$4 sm:$0xff]  }
 0x59b   : > { %2262 = vmatpush1.bf16.msra.mxu1 %v4122_v30  ;;  %2344 = vmatpush1.bf16.msra.mxu0 %v4125_v18  ;;  %v4214_v30 = vld [vmem:[#allocation14 + $0x184] ss:$16 sps:$4 sm:$0xff]   ;;  %v4212_v18 = vld [vmem:[#allocation14 + $0x180] ss:$16 sps:$4 sm:$0xff]  }
 0x59c   : > { %2263 = vmatprep.subr.bf16.mxu1 %v4130_v21  ;;  %2345 = vmatprep.subr.bf16.mxu0 %v4133_v24  ;;  %v4215_v21 = vld [vmem:[#allocation14 + $0x188] ss:$16 sps:$4 sm:$0xff]   ;;  %v4217_v24 = vld [vmem:[#allocation14 + $0x18c] ss:$16 sps:$4 sm:$0xff]  }
 0x59f   : > { %2264 = vmatpush1.bf16.msra.mxu1 %v4128_v31  ;;  %2346 = vmatpush1.bf16.msra.mxu0 %v4131_v32  ;;  %v4220_v31 = vld [vmem:[#allocation14 + $0x1a4] ss:$16 sps:$4 sm:$0xff]   ;;  %v4223_v32 = vld [vmem:[#allocation14 + $0x1ac] ss:$16 sps:$4 sm:$0xff]  }
 0x5a0   : > { %2265 = vmatprep.subr.bf16.mxu1 %v4136_v34  ;;  %2347 = vmatprep.subr.bf16.mxu0 %v4139_v35  ;;  %v4218_v34 = vld [vmem:[#allocation14 + $0x1a0] ss:$16 sps:$4 sm:$0xff]   ;;  %v4221_v35 = vld [vmem:[#allocation14 + $0x1a8] ss:$16 sps:$4 sm:$0xff]  }
 0x5a3   : > { %2266 = vmatpush1.bf16.msra.mxu1 %v4134_v36  ;;  %2348 = vmatpush1.bf16.msra.mxu0 %v4137_v37  ;;  %v4226_v36 = vld [vmem:[#allocation14 + $0x1c4] ss:$16 sps:$4 sm:$0xff]   ;;  %v4229_v37 = vld [vmem:[#allocation14 + $0x1cc] ss:$16 sps:$4 sm:$0xff]  }
 0x5a4   : > { %2789 = vmatprep.subr.bf16.mxu1 %v4142_v38  ;;  %2830 = vmatprep.subr.bf16.mxu0 %v4145_v39  ;;  %v4224_v38 = vld [vmem:[#allocation14 + $0x1c0] ss:$16 sps:$4 sm:$0xff]   ;;  %v4227_v39 = vld [vmem:[#allocation14 + $0x1c8] ss:$16 sps:$4 sm:$0xff]  }
 0x5a6   : > { %2268 = vmatmul.mubr.bf16.vlgmr.msra.gmra.mrb[0].mxu1 %v1402_v42  ;;  %2350 = vmatmul.mubr.bf16.vlgmr.msra.gmra.mrb[4].mxu0 %v1402_v42  ;;  %v4230_v42 = vld [vmem:[#allocation14 + $0x1e0] ss:$16 sps:$4 sm:$0xff]  }
 0x5a7   : > { %2790 = vmatpush1.bf16.msra.mxu1 %v4140_v40  ;;  %2831 = vmatpush1.bf16.msra.mxu0 %v4143_v41  ;;  %v4232_v40 = vld [vmem:[#allocation14 + $0x1e4] ss:$16 sps:$4 sm:$0xff]   ;;  %v4235_v41 = vld [vmem:[#allocation14 + $0x1ec] ss:$16 sps:$4 sm:$0xff]  }
 0x5a8   : > { %2791 = vmatprep.subr.bf16.mxu1 %v4148_v33  ;;  %2832 = vmatprep.subr.bf16.mxu0 %v4151_v17  ;;  %v4233_v33 = vld [vmem:[#allocation14 + $0x1e8] ss:$16 sps:$4 sm:$0xff]   ;;  %v1532_v17 = vld [vmem:[%s5615_s1] sm:$0xf] }
 0x5a9   : > { %2821 = vmatprep.mubr.bf16.mxu1 %v5237_v14  ;;  %2862 = vmatprep.mubr.bf16.mxu0 %v5237_v14  ;;  %v4167_v14 = vld [vmem:[#allocation14 + $0x88] ss:$16 sps:$4 sm:$0xff]  }
 0x5ab   : > { %2792 = vmatpush1.bf16.msra.mxu1 %v4146_v43  ;;  %2833 = vmatpush1.bf16.msra.mxu0 %v4149_v57  ;;  %v1537_v43 = vrot.slane %v1532_v17, %v5248_v26  ;;  %v1541_v57 = vrot.slane %v1532_v17, %v5293_v50 }
 0x5ac   : > { %2793 = vmatprep.subr.bf16.mxu1 %v4154_v44  ;;  %2834 = vmatprep.subr.bf16.mxu0 %v4157_v12 }
 0x5af   : > { %2794 = vmatpush1.bf16.msra.mxu1 %v4152_v22  ;;  %2835 = vmatpush1.bf16.msra.mxu0 %v4155_v0 }
 0x5b0   : > { %2795 = vmatprep.subr.bf16.mxu1 %v4160_v13  ;;  %2836 = vmatprep.subr.bf16.mxu0 %v4163_v46 }
 0x5b3   : > { %2796 = vmatpush1.bf16.msra.mxu1 %v4158_v4  ;;  %2837 = vmatpush1.bf16.msra.mxu0 %v4161_v20 }
 0x5b4   : > { %2797 = vmatprep.subr.bf16.mxu1 %v4166_v48  ;;  %2838 = vmatprep.subr.bf16.mxu0 %v4169_v53 }
 0x5b7   : > { %2798 = vmatpush1.bf16.msra.mxu1 %v4164_v19  ;;  %2839 = vmatpush1.bf16.msra.mxu0 %v4167_v14 }
 0x5b8   : > { %2799 = vmatprep.subr.bf16.mxu1 %v4172_v8  ;;  %2840 = vmatprep.subr.bf16.mxu0 %v4175_v54  ;;  %v1549_v8 = vrot.slane %v1532_v17, %v5299_v52 }
 0x5bb   : > { %2800 = vmatpush1.bf16.msra.mxu1 %v4170_v45  ;;  %2841 = vmatpush1.bf16.msra.mxu0 %v4173_v55  ;;  %v1545_v45 = vrot.slane %v1532_v17, %v5296_v51  ;;  %v4269_v17 = vld [vmem:[#allocation17 + $0xa8] ss:$16 sps:$4 sm:$0xff]  }
 0x5bc   : > { %2801 = vmatprep.subr.bf16.mxu1 %v4178_v56  ;;  %2842 = vmatprep.subr.bf16.mxu0 %v4181_v23 }
 0x5bf   : > { %2802 = vmatpush1.bf16.msra.mxu1 %v4176_v58  ;;  %2843 = vmatpush1.bf16.msra.mxu0 %v4179_v59 }
 0x5c0   : > { %2803 = vmatprep.subr.bf16.mxu1 %v4184_v60  ;;  %2844 = vmatprep.subr.bf16.mxu0 %v4187_v61 }
 0x5c3   : > { %2804 = vmatpush1.bf16.msra.mxu1 %v4182_v62  ;;  %2845 = vmatpush1.bf16.msra.mxu0 %v4185_v27  ;;  %v672_v27 = vld [vmem:[#allocation3] sm:$0xff] }
 0x5c4   : > { %2805 = vmatprep.subr.bf16.mxu1 %v4190_v63  ;;  %2846 = vmatprep.subr.bf16.mxu0 %v4193_v2 }
 0x5c7   : > { %2806 = vmatpush1.bf16.msra.mxu1 %v4188_v3  ;;  %2847 = vmatpush1.bf16.msra.mxu0 %v4191_v25 }
 0x5c8   : > { %2807 = vmatprep.subr.bf16.mxu1 %v4196_v28  ;;  %2848 = vmatprep.subr.bf16.mxu0 %v4199_v5 }
 0x5cb   : > { %2808 = vmatpush1.bf16.msra.mxu1 %v4194_v47  ;;  %2849 = vmatpush1.bf16.msra.mxu0 %v4197_v1 }
 0x5cc   : > { %2809 = vmatprep.subr.bf16.mxu1 %v4202_v6  ;;  %2850 = vmatprep.subr.bf16.mxu0 %v4205_v7 }
 0x5cf   : > { %2810 = vmatpush1.bf16.msra.mxu1 %v4200_v9  ;;  %2851 = vmatpush1.bf16.msra.mxu0 %v4203_v29  ;;  %v4238_v9 = vld [vmem:[#allocation17 + $0x4] ss:$16 sps:$4 sm:$0xff]   ;;  %v4241_v29 = vld [vmem:[#allocation17 + $0xc] ss:$16 sps:$4 sm:$0xff]  }
 0x5d0   : > { %2811 = vmatprep.subr.bf16.mxu1 %v4208_v10  ;;  %2852 = vmatprep.subr.bf16.mxu0 %v4211_v11  ;;  %v4236_v10 = vld [vmem:[#allocation17] ss:$16 sps:$4 sm:$0xff]   ;;  %v4239_v11 = vld [vmem:[#allocation17 + $0x8] ss:$16 sps:$4 sm:$0xff]  }
 0x5d3   : > { %2812 = vmatpush1.bf16.msra.mxu1 %v4206_v15  ;;  %2853 = vmatpush1.bf16.msra.mxu0 %v4209_v16  ;;  %v4244_v15 = vld [vmem:[#allocation17 + $0x24] ss:$16 sps:$4 sm:$0xff]   ;;  %v4247_v16 = vld [vmem:[#allocation17 + $0x2c] ss:$16 sps:$4 sm:$0xff]  }
 0x5d4   : > { %2813 = vmatprep.subr.bf16.mxu1 %v4214_v30  ;;  %2854 = vmatprep.subr.bf16.mxu0 %v4217_v24  ;;  %v4242_v30 = vld [vmem:[#allocation17 + $0x20] ss:$16 sps:$4 sm:$0xff]   ;;  %v4253_v24 = vld [vmem:[#allocation17 + $0x4c] ss:$16 sps:$4 sm:$0xff]  }
 0x5d7   : > { %2814 = vmatpush1.bf16.msra.mxu1 %v4212_v18  ;;  %2855 = vmatpush1.bf16.msra.mxu0 %v4215_v21  ;;  %v4245_v18 = vld [vmem:[#allocation17 + $0x28] ss:$16 sps:$4 sm:$0xff]   ;;  %v4250_v21 = vld [vmem:[#allocation17 + $0x44] ss:$16 sps:$4 sm:$0xff]  }
 0x5d8   : > { %2815 = vmatprep.subr.bf16.mxu1 %v4220_v31  ;;  %2856 = vmatprep.subr.bf16.mxu0 %v4223_v32  ;;  %v4248_v31 = vld [vmem:[#allocation17 + $0x40] ss:$16 sps:$4 sm:$0xff]   ;;  %v4256_v32 = vld [vmem:[#allocation17 + $0x64] ss:$16 sps:$4 sm:$0xff]  }
 0x5db   : > { %2816 = vmatpush1.bf16.msra.mxu1 %v4218_v34  ;;  %2857 = vmatpush1.bf16.msra.mxu0 %v4221_v35  ;;  %v4259_v34 = vld [vmem:[#allocation17 + $0x6c] ss:$16 sps:$4 sm:$0xff]   ;;  %v4254_v35 = vld [vmem:[#allocation17 + $0x60] ss:$16 sps:$4 sm:$0xff]  }
 0x5dc   : > { %2817 = vmatprep.subr.bf16.mxu1 %v4226_v36  ;;  %2858 = vmatprep.subr.bf16.mxu0 %v4229_v37  ;;  %v4257_v36 = vld [vmem:[#allocation17 + $0x68] ss:$16 sps:$4 sm:$0xff]   ;;  %v4262_v37 = vld [vmem:[#allocation17 + $0x84] ss:$16 sps:$4 sm:$0xff]  }
 0x5df   : > { %2818 = vmatpush1.bf16.msra.mxu1 %v4224_v38  ;;  %2859 = vmatpush1.bf16.msra.mxu0 %v4227_v39  ;;  %v4265_v38 = vld [vmem:[#allocation17 + $0x8c] ss:$16 sps:$4 sm:$0xff]   ;;  %v4260_v39 = vld [vmem:[#allocation17 + $0x80] ss:$16 sps:$4 sm:$0xff]  }
 0x5e0   : > { %2819 = vmatprep.subr.bf16.mxu1 %v4232_v40  ;;  %2860 = vmatprep.subr.bf16.mxu0 %v4235_v41  ;;  %v4263_v40 = vld [vmem:[#allocation17 + $0x88] ss:$16 sps:$4 sm:$0xff]   ;;  %v4268_v41 = vld [vmem:[#allocation17 + $0xa4] ss:$16 sps:$4 sm:$0xff]  }
 0x5e3   : > { %2820 = vmatpush1.bf16.msra.mxu1 %v4230_v42  ;;  %2861 = vmatpush1.bf16.msra.mxu0 %v4233_v33  ;;  %v4271_v42 = vld [vmem:[#allocation17 + $0xac] ss:$16 sps:$4 sm:$0xff]   ;;  %v4266_v33 = vld [vmem:[#allocation17 + $0xa0] ss:$16 sps:$4 sm:$0xff]  }
 0x5e4   : > { %3122 = vmatprep.subr.bf16.mxu1 %v4238_v9  ;;  %3163 = vmatprep.subr.bf16.mxu0 %v4241_v29 }
 0x679   : > { %v2269_v44 = vpop.f32.mrb[0].mxu1  ;;  %v2351_v12 = vpop.f32.mrb[4].mxu0 }
 0x67a   : > { %v3757_v22 = vadd.f32 %v2269_v44, %v1537_v43  ;;  %v2271_v0 = vpop.f32.mrb[1].mxu1  ;;  %v2353_v13 = vpop.f32.mrb[5].mxu0  ;;  %v3759_v56 = vadd.f32 %v2351_v12, %v1545_v45  ;;  %v4274_v43 = vld [vmem:[#allocation17 + $0xc4] ss:$16 sps:$4 sm:$0xff]   ;;  %v4272_v44 = vld [vmem:[#allocation17 + $0xc0] ss:$16 sps:$4 sm:$0xff]  }
 0x67b   : > { %v3758_v46 = vadd.f32 %v2271_v0, %v1541_v57  ;;  %v2273_v4 = vpop.f32.mrb[2].mxu1  ;;  %v2355_v20 = vpop.f32.mrb[6].mxu0  ;;  %v3760_v54 = vadd.f32 %v2353_v13, %v1549_v8  ;;  %v4277_v57 = vld [vmem:[#allocation17 + $0xcc] ss:$16 sps:$4 sm:$0xff]   ;;  %v4275_v12 = vld [vmem:[#allocation17 + $0xc8] ss:$16 sps:$4 sm:$0xff]  }
 0x67c   : > { %v3596_v48 = vmul.f32 -1.442695, %v3757_v22  ;;  %v2274_v53 = vpop.f32.mrb[3].mxu1  ;;  %v2356_v19 = vpop.f32.mrb[7].mxu0  ;;  %v4280_v22 = vld [vmem:[#allocation17 + $0xe4] ss:$16 sps:$4 sm:$0xff]  }
 0x67d   : > { %v3597_v14 = vmul.f32 -1.442695, %v3758_v46  ;;  %v3598_v55 = vmul.f32 -1.442695, %v3760_v54  ;;  %v4283_v0 = vld [vmem:[#allocation17 + $0xec] ss:$16 sps:$4 sm:$0xff]  }
 0x67e   : > { %4332 = vpow2.f32 %v3596_v48  ;;  %v4278_v13 = vld [vmem:[#allocation17 + $0xe0] ss:$16 sps:$4 sm:$0xff]   ;;  %v4281_v46 = vld [vmem:[#allocation17 + $0xe8] ss:$16 sps:$4 sm:$0xff]   ;;  %v2447_v4 = vld [vmem:[#allocation16] sm:$0xf] }
 0x67f   : > { %4334 = vpow2.f32 %v3597_v14  ;;  %v2452_v20 = vrot.slane %v2447_v4, %v5248_v26  ;;  %v2456_v48 = vrot.slane %v2447_v4, %v5293_v50 }
 0x680   : > { %4336 = vpow2.f32 %v3598_v55 }
 0x681   : > { %4338 = vtanh.f32 %v3759_v56 }
 0x688   : > { %v4333_v23 = vpop.eup %4332 }
 0x689   : > { %v4335_v58 = vpop.eup %4334  ;;  %v2361_v59 = vadd.f32 1.0, %v4333_v23 }
 0x68a   : > { %v2367_v60 = vadd.f32 1.0, %v4335_v58  ;;  %v4337_v61 = vpop.eup %4336 }
 0x68b   : > { %4340 = vrcp.f32 %v2361_v59  ;;  %v4339_v62 = vpop.eup %4338  ;;  %v2374_v25 = vadd.f32 1.0, %v4337_v61  ;;  %v2464_v61 = vrot.slane %v2447_v4, %v5299_v52 }
 0x68c   : > { %4342 = vrcp.f32 %v2367_v60 }
 0x68d   : > { %4344 = vrcp.f32 %v2374_v25 }
 0x695   : > { %v4341_v63 = vpop.eup %4340 }
 0x696   : > { %v4343_v2 = vpop.eup %4342  ;;  %v2378_v3 = vmul.f32 %v4341_v63, %v4339_v62 }
 0x697   : > { %v2377_v28 = vmul.f32 %v4343_v2, %v672_v27  ;;  %v4345_v47 = vpop.eup %4344  ;;  %v2460_v27 = vrot.slane %v2447_v4, %v5296_v51 }
 0x699   : > { %v2379_v5 = vadd.f32 %v2378_v3, %v2377_v28 }
 0x69b   : > { %4346 = vtanh.f32 %v2379_v5  ;;  %2897 = vst [vmem:[#allocation3] sm:$0xff] %v2379_v5  ;;  %2904 = vst [vmem:[#allocation23] sm:$0xff] %v2379_v5 }
 0x6a5   : > { %v4347_v1 = vpop.eup %4346 }
 0x6a6   : > { %v2381_v6 = vmul.f32 %v4347_v1, %v4345_v47 }
 0x6a8   : > { %v2382_v7 = vpack.c.bf16 %v2381_v6, %v2381_v6  ;;  %2895 = vst [vmem:[#allocation2] sm:$0xff] %v2381_v6  ;;  %2901 = vst [vmem:[#allocation21] sm:$0xff] %v2381_v6  ;;  %v674_v6 = vld [vmem:[#allocation3 + $0x8] sm:$0xff] }
 0x6aa   : > { %2822 = vmatmul.mubr.bf16.vlgmr.msra.gmra.mrb[4].mxu1 %v2382_v7  ;;  %2863 = vmatmul.mubr.bf16.vlgmr.msra.gmra.mrb[8].mxu0 %v2382_v7 }
 0x6ab   : > { %3154 = vmatprep.mubr.bf16.mxu1 %v4792_v49  ;;  %3195 = vmatprep.mubr.bf16.mxu0 %v4792_v49  ;;  %v4251_v49 = vld [vmem:[#allocation17 + $0x48] ss:$16 sps:$4 sm:$0xff]  }
 0x6ac   : > { %3123 = vmatpush1.bf16.msra.mxu1 %v4236_v10  ;;  %3164 = vmatpush1.bf16.msra.mxu0 %v4239_v11 }
 0x6ad   : > { %3124 = vmatprep.subr.bf16.mxu1 %v4244_v15  ;;  %3165 = vmatprep.subr.bf16.mxu0 %v4247_v16 }
 0x6b0   : > { %3125 = vmatpush1.bf16.msra.mxu1 %v4242_v30  ;;  %3166 = vmatpush1.bf16.msra.mxu0 %v4245_v18 }
 0x6b1   : > { %3126 = vmatprep.subr.bf16.mxu1 %v4250_v21  ;;  %3167 = vmatprep.subr.bf16.mxu0 %v4253_v24 }
 0x6b4   : > { %3127 = vmatpush1.bf16.msra.mxu1 %v4248_v31  ;;  %3168 = vmatpush1.bf16.msra.mxu0 %v4251_v49 }
 0x6b5   : > { %3128 = vmatprep.subr.bf16.mxu1 %v4256_v32  ;;  %3169 = vmatprep.subr.bf16.mxu0 %v4259_v34 }
 0x6b8   : > { %3129 = vmatpush1.bf16.msra.mxu1 %v4254_v35  ;;  %3170 = vmatpush1.bf16.msra.mxu0 %v4257_v36 }
 0x6b9   : > { %3130 = vmatprep.subr.bf16.mxu1 %v4262_v37  ;;  %3171 = vmatprep.subr.bf16.mxu0 %v4265_v38 }
 0x6bc   : > { %3131 = vmatpush1.bf16.msra.mxu1 %v4260_v39  ;;  %3172 = vmatpush1.bf16.msra.mxu0 %v4263_v40 }
 0x6bd   : > { %3132 = vmatprep.subr.bf16.mxu1 %v4268_v41  ;;  %3173 = vmatprep.subr.bf16.mxu0 %v4271_v42 }
 0x6c0   : > { %3133 = vmatpush1.bf16.msra.mxu1 %v4266_v33  ;;  %3174 = vmatpush1.bf16.msra.mxu0 %v4269_v17 }
 0x6c1   : > { %3134 = vmatprep.subr.bf16.mxu1 %v4274_v43  ;;  %3175 = vmatprep.subr.bf16.mxu0 %v4277_v57 }
 0x6c4   : > { %3135 = vmatpush1.bf16.msra.mxu1 %v4272_v44  ;;  %3176 = vmatpush1.bf16.msra.mxu0 %v4275_v12 }
 0x6c5   : > { %3136 = vmatprep.subr.bf16.mxu1 %v4280_v22  ;;  %3177 = vmatprep.subr.bf16.mxu0 %v4283_v0 }
 0x6c8   : > { %3137 = vmatpush1.bf16.msra.mxu1 %v4278_v13  ;;  %3178 = vmatpush1.bf16.msra.mxu0 %v4281_v46 }
 0x77d   : > { %v2823_v53 = vpop.f32.mrb[4].mxu1  ;;  %v2864_v19 = vpop.f32.mrb[8].mxu0 }
 0x77e   : > { %v2824_v14 = vadd.f32 %v2823_v53, %v2452_v20  ;;  %v2825_v8 = vpop.f32.mrb[5].mxu1  ;;  %v2866_v54 = vpop.f32.mrb[9].mxu0  ;;  %v2865_v2 = vadd.f32 %v2864_v19, %v2460_v27 }
 0x77f   : > { %v2826_v45 = vadd.f32 %v2825_v8, %v2456_v48  ;;  %v2827_v55 = vpop.f32.mrb[6].mxu1  ;;  %v2868_v56 = vpop.f32.mrb[10].mxu0  ;;  %v2867_v62 = vadd.f32 %v2866_v54, %v2464_v61 }
 0x780   : > { %v3663_v23 = vmul.f32 -1.442695, %v2824_v14  ;;  %v2828_v58 = vpop.f32.mrb[7].mxu1  ;;  %v2869_v59 = vpop.f32.mrb[11].mxu0 }
 0x781   : > { %v3664_v60 = vmul.f32 -1.442695, %v2826_v45  ;;  %v3665_v63 = vmul.f32 -1.442695, %v2867_v62 }
 0x782   : > { %4348 = vpow2.f32 %v3663_v23 }
 0x783   : > { %4350 = vpow2.f32 %v3664_v60 }
 0x784   : > { %4352 = vpow2.f32 %v3665_v63 }
 0x785   : > { %4354 = vtanh.f32 %v2865_v2 }
 0x78c   : > { %v4349_v3 = vpop.eup %4348 }
 0x78d   : > { %v4351_v25 = vpop.eup %4350  ;;  %v2874_v28 = vadd.f32 1.0, %v4349_v3 }
 0x78e   : > { %v2880_v5 = vadd.f32 1.0, %v4351_v25  ;;  %v4353_v47 = vpop.eup %4352 }
 0x78f   : > { %4356 = vrcp.f32 %v2874_v28  ;;  %v4355_v1 = vpop.eup %4354  ;;  %v2887_v10 = vadd.f32 1.0, %v4353_v47 }
 0x790   : > { %4358 = vrcp.f32 %v2880_v5 }
 0x791   : > { %4360 = vrcp.f32 %v2887_v10 }
 0x799   : > { %v4357_v7 = vpop.eup %4356 }
 0x79a   : > { %v4359_v9 = vpop.eup %4358  ;;  %v2891_v29 = vmul.f32 %v4357_v7, %v4355_v1 }
 0x79b   : > { %v2890_v11 = vmul.f32 %v4359_v9, %v674_v6  ;;  %v4361_v16 = vpop.eup %4360 }
 0x79d   : > { %v2892_v15 = vadd.f32 %v2891_v29, %v2890_v11 }
 0x79f   : > { %4362 = vtanh.f32 %v2892_v15  ;;  %2898 = vst [vmem:[#allocation3 + $0x8] sm:$0xff] %v2892_v15  ;;  %2906 = vst [vmem:[#allocation23 + $0x8] sm:$0xff] %v2892_v15 }
 0x7a9   : > { %v4363_v30 = vpop.eup %4362 }
 0x7aa   : > { %v2894_v18 = vmul.f32 %v4363_v30, %v4361_v16 }
 0x7ac   : > { %2896 = vst [vmem:[#allocation2 + $0x8] sm:$0xff] %v2894_v18  ;;  %v2899_v21 = vpack.c.bf16 %v2894_v18, %v2894_v18  ;;  %2903 = vst [vmem:[#allocation21 + $0x8] sm:$0xff] %v2894_v18 }
 0x7ae   : > { %2900 = vst [vmem:[#allocation4] sm:$0xf] %v2899_v21 }
 0x7b5   : > { %v2907_v24 = vld [vmem:[#allocation4] sm:$0xf] }
 0x7b6   : > { %3155 = vmatmul.mubr.bf16.vlgmr.msra.gmra.mrb[8].mxu1 %v2907_v24  ;;  %3196 = vmatmul.mubr.bf16.vlgmr.msra.gmra.mrb[12].mxu0 %v2907_v24 }
 0x7b7   : > { %4631 = shalt.err (!%p4628_p3)
}
 0x7b8   : > { %s5617_s27 = sld [smem:[#allocation42_spill]] }
 0x7be   : > { %s4632_s21 = scalar_lea.hbm %s5617_s27, 256 }
 0x7bf   : > { %p4633_p6 = scmp.ne.s32.totalorder %s5617_s27, %s4632_s21  ;;  %p4638_p0 = scmp.lt.u32.totalorder %s4632_s21, %s5617_s27 }
 0x7c1   : > { %p4634_p9 = pnand %p4633_p6, %p5616_p4 }
 0x7c3   : > { %p4635_p10 = pneg %p4634_p9 }
 0x7c5   : > { %p4640_p5 = pnand %p4638_p0, %p4635_p10 }
 0x7c7   : > { %4643 = shalt.err (!%p4640_p5)
}
 0x7c8   : > { %s4794_s4 = smov 128   ;;  %s4795_s25 = smov 8  }
 0x7c9   : > { %3805 = dma.vmem_to_hbm [thread:$0]  (%p5616_p4), %s3236_s26, 256, %s5617_s27, [#allocation22], %s4794_s4, %s4794_s4, %s4795_s25  }
 0x7ca   : > { %s4796_s28 = smov [#allocation23]  }
 0x7cb   : > { %s3248_s15 = sshll.u32 %s4796_s28, 4  ;;  %s3249_s15 = int_to_ptr.vmem [resolvable:$true] %s3248_s15 }
 0x7cc   : > { %s4644_s0 = scalar_lea.vmem %s3249_s15, 256  ;;  %p4651_p8 = scmp.lt.s32.totalorder %s3249_s15, %s3249_s15 }
 0x7cd   : > { %p4645_p11 = scmp.ne.s32.totalorder %s3249_s15, %s4644_s0  ;;  %p4652_p13 = scmp.lt.s32.totalorder %s4644_s0, %s4644_s0 }
 0x7cf   : > { %p4646_p12 = pnand %p4645_p11, %p5616_p4  ;;  %p4653_p2 = por %p4652_p13, %p4651_p8 }
 0x7d1   : > { %p4647_p1 = pneg %p4646_p12 }
 0x7d3   : > { %p4654_p7 = pnand %p4653_p2, %p4647_p1 }
 0x7d5   : > { %4657 = shalt.err (!%p4654_p7)
}
 0x7d6   : > { %s5618_s1 = sld [smem:[#allocation43_spill]] }
 0x7dc   : > { %s4658_s7 = scalar_lea.hbm %s5618_s1, 256 }
 0x7dd   : > { %p4659_p3 = scmp.ne.s32.totalorder %s5618_s1, %s4658_s7  ;;  %p4664_p10 = scmp.lt.u32.totalorder %s4658_s7, %s5618_s1 }
 0x7df   : > { %p4660_p6 = pnand %p4659_p3, %p5616_p4 }
 0x7e1   : > { %p4661_p9 = pneg %p4660_p6 }
 0x7e3   : > { %p4666_p0 = pnand %p4664_p10, %p4661_p9 }
 0x7e5   : > { %4669 = shalt.err (!%p4666_p0)
}
 0x7e6   : > { %s5619_s21 = sld [smem:[#allocation31_spill]]  ;;  %v2940_v31 = vld [vmem:[#allocation19] sm:$0xf]  ;;  %s3225_s3 = sshll.u32 %s5235_s2, 4  ;;  %s5490_s3 = int_to_ptr.vmem [resolvable:$true] %s3225_s3 }
 0x7e7   : > { %3807 = dma.vmem_to_hbm [thread:$0]  (%p5616_p4), %s3249_s15, 256, %s5618_s1, [#allocation22], %s4794_s4, %s4794_s4, %s4795_s25   ;;  %v2945_v49 = vrot.slane %v2940_v31, %v5248_v26  ;;  %v2953_v32 = vrot.slane %v2940_v31, %v5296_v51  ;;  %v2949_v34 = vrot.slane %v2940_v31, %v5293_v50  ;;  %v2957_v35 = vrot.slane %v2940_v31, %v5299_v52 }
 0x7e8   : > { %s5620_s25 = sld [smem:[#allocation41_spill]]  ;;  %s3209_s16 = scalar_lea.sflag [#allocation7], %s5207_s5 }
 0x7e9   : > { %s4670_s26 = scalar_lea.vmem %s5490_s3, 512  ;;  %p5621_p11 = scmp.ne.s32.totalorder %s5605_s13, 0 }
 0x7ea   : > { %p4671_p5 = scmp.ne.s32.totalorder %s5490_s3, %s4670_s26  ;;  %s4797_s14 = smov [#allocation20]  }
 0x7eb   : > { %s4674_s28 = sshll.u32 %s4797_s14, 4  ;;  %s4675_s28 = int_to_ptr.vmem [resolvable:$false] %s4674_s28 }
 0x7ec   : > { %s3708_s7 = sshll.u32 %s5619_s21, 9  ;;  %p4672_p12 = pnand %p4671_p5, %p5621_p11 }
 0x7ed   : > { %s4676_s0 = scalar_lea.vmem %s4675_s28, 1024  ;;  %p4677_p8 = scmp.lt.s32.totalorder %s5490_s3, %s4675_s28 }
 0x7ee   : > { %s5488_s15 = scalar_lea.hbm %s5620_s25, %s3708_s7  ;;  %p4673_p1 = pneg %p4672_p12 }
 0x7ef   : > { %p4678_p13 = scmp.lt.s32.totalorder %s4676_s0, %s4670_s26 }
 0x7f1   : > { %p4679_p2 = por %p4678_p13, %p4677_p8 }
 0x7f3   : > { %p4680_p7 = pnand %p4679_p2, %p4673_p1 }
 0x889   : > { %v3156_v36 = vpop.f32.mrb[8].mxu1  ;;  %v3197_v37 = vpop.f32.mrb[12].mxu0 }
 0x88a   : > { %v3157_v38 = vadd.f32 %v3156_v36, %v2945_v49  ;;  %v3198_v39 = vadd.f32 %v3197_v37, %v2953_v32  ;;  %v3158_v40 = vpop.f32.mrb[9].mxu1  ;;  %v3199_v41 = vpop.f32.mrb[13].mxu0 }
 0x88b   : > { %v3159_v26 = vadd.f32 %v3158_v40, %v2949_v34  ;;  %v3200_v51 = vadd.f32 %v3199_v41, %v2957_v35  ;;  %v3160_v42 = vpop.f32.mrb[10].mxu1  ;;  %v3201_v50 = vpop.f32.mrb[14].mxu0 }
 0x88c   : > { %3204 = vst [vmem:[%s5235_s2] sm:$0xff] %v3157_v38  ;;  %3206 = vst [vmem:[%s5235_s2 + $0x10] sm:$0xff] %v3198_v39  ;;  %v3161_v52 = vpop.f32.mrb[11].mxu1  ;;  %v3202_v33 = vpop.f32.mrb[15].mxu0 }
 0x88d   : > { %3205 = vst [vmem:[%s5235_s2 + $0x8] sm:$0xff] %v3159_v26  ;;  %3207 = vst [vmem:[%s5235_s2 + $0x18] sm:$0xff] %v3200_v51 }
 0x88e   : > { %4683 = shalt.err (!%p4680_p7)
}
 0x88f   : > { %s4684_s5 = scalar_lea.hbm %s5488_s15, 512  ;;  %s4688_s7 = scalar_lea.hbm %s5620_s25, 1536 }
 0x890   : > { %p4685_p3 = scmp.ne.s32.totalorder %s5488_s15, %s4684_s5  ;;  %p4689_p10 = scmp.lt.u32.totalorder %s5488_s15, %s5620_s25 }
 0x891   : > { %p4690_p0 = scmp.lt.u32.totalorder %s4688_s7, %s4684_s5  ;;  %p4692_p12 = scmp.lt.u32.totalorder %s4684_s5, %s5488_s15 }
 0x892   : > { %p4686_p6 = pnand %p4685_p3, %p5621_p11 }
 0x893   : > { %p4691_p5 = por %p4690_p0, %p4689_p10 }
 0x894   : > { %p4687_p9 = pneg %p4686_p6 }
 0x895   : > { %p4693_p1 = por %p4692_p12, %p4691_p5 }
 0x897   : > { %p4694_p8 = pnand %p4693_p1, %p4687_p9 }
 0x899   : > { %4697 = shalt.err (!%p4694_p8)
}
 0x89a   : > { %3803 = dma.vmem_to_hbm [thread:$0]  (%p5621_p11), %s5490_s3, 512, %s5488_s15, %s3209_s16  }
 0x89b   : > { %4743 = dma.done.wait (%p5616_p4), [#allocation22], 512  }
 0x89c   : > { %4745 = vsyncadd (%p5616_p4), [#allocation22], 4294966784 }
 0x89d PF: > { %p3867_p13 = scmp.ge.s32.totalorder %s4772_s23, 2  ;;  %s3271_s26 = sand.u32 1, %s4752_s18  }
 0x89e   : > { %p5622_p2 = scmp.ne.s32.totalorder %s5606_s30, 0  ;;  %s3272_s14 = scalar_lea.sflag [#allocation7], %s3271_s26 }
 0x8a0   : > { %p3843_p7 = pnand %p3867_p13, %p5622_p2 }
 0x8a2   : > { %4747 = dma.done.wait (!%p3843_p7), %s3272_s14, 512  }
 0x8a3   : > { %4749 = vsyncadd (!%p3843_p7), %s3272_s14, 4294966784  ;;  %s37_s23 = sadd.s32 1, %s4772_s23   ;;  %s5623_s18 = smov %s4756_s19 }
 0x8a4   : > { %p34_p3 = scmp.ge.s32.totalorder %s37_s23, 5   ;;  %s5624_s19 = smov %s4760_s20 }
 0x8a5   : > { %s5625_s20 = smov %s5157_s6  ;;  %s5626_s21 = smov %s4768_s22 }
 0x8a6   : > { %s5627_s22 = smov %s5629_s17  ;;  %36 = sbr.rel (!%p34_p3) target bundleno = 24 (0x18), region = 179 }
 0x8ad   :  { %3277 = vsyncpa [#allocation6], 1 }
 0x8ae   :  { %3279 = vsyncpa [#allocation6 + $0x1], 1 }
 0x8af   :  { %3280 = vsyncpa [#allocation9], 1 }
 0x8b0   :  { %3281 = vsyncpa [#allocation12], 1 }
 0x8b1   :  { %3282 = vsyncpa [#allocation15], 1 }
 0x8b2   :  { %3283 = vsyncpa [#allocation18], 1 }
 0x8b3   :  { %3284 = vsyncpa [#allocation7], 1 }
 0x8b4   :  { %3286 = vsyncpa [#allocation7 + $0x1], 1 }
 0x8b5   :  { %3287 = vsyncpa [#allocation22], 1 }

// kernel: tpu_custom_call.1
= control target key start
LH: loop header
LB: loop body
LE: loop exit
PB: predicated region body
PF: predicated region fallthrough
CT: control target
= control target key end

     0   :  { %s5544_s0 = inlined_call_operand.hbm [shape: f32[3,8,128], index: 0, kind: input, shape index: {}]   ;;  %s5545_s1 = inlined_call_operand.vmem [shape: bf16[8,8,128], index: 1, kind: input, shape index: {}]   ;;  %s5546_s2 = inlined_call_operand.vmem [shape: bf16[8,8,256], index: 2, kind: input, shape index: {}]   ;;  %s5547_s3 = inlined_call_operand.hbm [shape: f32[2,8,128], index: 3, kind: input, shape index: {}, may-alias: {3,14}]   ;;  %s5548_s4 = inlined_call_operand.hbm [shape: f32[2,8,128], index: 4, kind: input, shape index: {}, may-alias: {4,15}]   ;;  %s5549_s5 = inlined_call_operand.hbm [shape: bf16[128,128], index: 5, kind: input, shape index: {}]   ;;  %s5550_s6 = inlined_call_operand.vmem [shape: f32[1,128], index: 6, kind: input, shape index: {}]   ;;  %s5551_s7 = inlined_call_operand.hbm [shape: bf16[512,512], index: 7, kind: input, shape index: {}]   ;;  %s5552_s8 = inlined_call_operand.vmem [shape: f32[1,512], index: 8, kind: input, shape index: {}]   ;;  %s5553_s9 = inlined_call_operand.hbm [shape: bf16[256,512], index: 9, kind: input, shape index: {}]   ;;  %s5554_s10 = inlined_call_operand.hbm [shape: f32[1,512], index: 10, kind: input, shape index: {}]   ;;  %s5555_s11 = inlined_call_operand.hbm [shape: bf16[128,512], index: 11, kind: input, shape index: {}]   ;;  %s5556_s12 = inlined_call_operand.hbm [shape: f32[1,512], index: 12, kind: input, shape index: {}]   ;;  %s5557_s13 = inlined_call_operand.hbm [shape: f32[3,8,512], index: 13, kind: output, shape index: {0}]   ;;  %s5558_s14 = inlined_call_operand.hbm [shape: f32[2,8,128], index: 14, kind: output, shape index: {1}, may-alias: {3,14}]   ;;  %s5559_s15 = inlined_call_operand.hbm [shape: f32[2,8,128], index: 15, kind: output, shape index: {2}, may-alias: {4,15}]  }
   0x1   :  { %5576 = sst [smem:[#allocation32_spill]] %s5544_s0 }
   0x2   :  { %5577 = sst [smem:[#allocation33_spill]] %s5545_s1 }
   0x3   :  { %5578 = sst [smem:[#allocation34_spill]] %s5546_s2 }
   0x4   :  { %5579 = sst [smem:[#allocation35_spill]] %s5547_s3 }
   0x5   :  { %5580 = sst [smem:[#allocation36_spill]] %s5548_s4 }
   0x6   :  { %5581 = sst [smem:[#allocation37_spill]] %s5549_s5 }
   0x7   :  { %5582 = sst [smem:[#allocation38_spill]] %s5550_s6 }
   0x8   :  { %5583 = sst [smem:[#allocation39_spill]] %s5551_s7 }
   0x9   :  { %5584 = sst [smem:[#allocation40_spill]] %s5552_s8 }
   0xa   :  { %5585 = sst [smem:[#allocation41_spill]] %s5557_s13 }
   0xb   :  { %5586 = sst [smem:[#allocation42_spill]] %s5558_s14 }
   0xc   :  { %5587 = sst [smem:[#allocation43_spill]] %s5559_s15 }
   0xd   :  { %21 = vsyncpa [#allocation6], 0 }
   0xe   :  { %23 = vsyncpa [#allocation6 + $0x1], 0 }
   0xf   :  { %24 = vsyncpa [#allocation9], 0 }
  0x10   :  { %25 = vsyncpa [#allocation12], 0 }
  0x11   :  { %26 = vsyncpa [#allocation15], 0 }
  0x12   :  { %27 = vsyncpa [#allocation18], 0 }
  0x13   :  { %28 = vsyncpa [#allocation7], 0 }
  0x14   :  { %30 = vsyncpa [#allocation7 + $0x1], 0 }
  0x15   :  { %31 = vsyncpa [#allocation22], 0  ;;  %s4878_s18 = smov 0   ;;  %s4880_s19 = smov 0  }
  0x16   :  { %s4882_s20 = smov 0   ;;  %s4884_s21 = smov 0  }
  0x17   :  { %s4886_s22 = smov 0   ;;  %s4888_s23 = smov 0  }
  0x18 LB: > { %5588 = sst [smem:[#allocation31_spill]] %s4764_s21  ;;  %s5560_s24 = sadd.s32 4294967295, %s4772_s23   ;;  %s4772_s23 = sphi %s4888_s23, %s37_s23   ;;  %s4768_s22 = sphi %s4886_s22, %s5627_s22   ;;  %s4764_s21 = sphi %s4884_s21, %s5626_s21   ;;  %s4760_s20 = sphi %s4882_s20, %s5625_s20   ;;  %s4756_s19 = sphi %s4880_s19, %s5624_s19   ;;  %s4752_s18 = sphi %s4878_s18, %s5623_s18  }
  0x19   : > { %p3435_p0 = scmp.ge.s32.totalorder %s4772_s23, 1  ;;  %p4912_p1 = scmp.eq.s32.totalorder %s5560_s24, 0 }
  0x1a   : > { %p412_p2 = scmp.lt.s32.totalorder %s4772_s23, 4  ;;  %s4774_s27 = smov [#allocation8]  }
  0x1b   : > { %s5589_s25 = scalar_select %p4912_p1, 1, 0 }
  0x1c   : > { %p4917_p3 = pnand %p3435_p0, %p412_p2  ;;  %s430_s28 = sshll.u32 %s4774_s27, 4  ;;  %s431_s28 = int_to_ptr.vmem [resolvable:$true] %s430_s28 }
  0x1d   : > { %s4775_s30 = smov [#allocation11]   ;;  %s5592_s3 = sld [smem:[#allocation35_spill]] }
  0x1e   : > { %s5590_s26 = scalar_select %p4917_p3, 1, 0 }
  0x1f   : > { %p3813_p4 = pneg %p4917_p3  ;;  %s456_s16 = sshll.u32 %s4775_s30, 4  ;;  %s4929_s16 = int_to_ptr.vmem [resolvable:$true] %s456_s16 }
  0x21   : > { %p4925_p5 = pnand %p3813_p4, %p4912_p1 }
  0x23   : > { %s4364_s13 = scalar_lea.hbm %s5592_s3, 256  ;;  %p4939_p7 = pneg %p4925_p5 }
  0x24   : > { %p4365_p6 = scmp.ne.s32.totalorder %s5592_s3, %s4364_s13  ;;  %p4371_p10 = scmp.lt.u32.totalorder %s4364_s13, %s5592_s3 }
  0x26   : > { %p4367_p8 = pnand %p4939_p7, %p4365_p6 }
  0x28   : > { %p4368_p9 = pneg %p4367_p8 }
  0x2a   : > { %p4373_p11 = pnand %p4371_p10, %p4368_p9 }
  0x2c   : > { %4376 = shalt.err (!%p4373_p11)
}
  0x2d   : > { %s4377_s24 = scalar_lea.vmem %s431_s28, 256  ;;  %p4385_p2 = scmp.lt.s32.totalorder %s431_s28, %s431_s28 }
  0x2e   : > { %p4378_p12 = scmp.ne.s32.totalorder %s431_s28, %s4377_s24  ;;  %p4386_p4 = scmp.lt.s32.totalorder %s4377_s24, %s4377_s24 }
  0x30   : > { %p4380_p13 = pnand %p4378_p12, %p4939_p7  ;;  %p4387_p3 = por %p4386_p4, %p4385_p2 }
  0x32   : > { %p4381_p0 = pneg %p4380_p13 }
  0x34   : > { %p4388_p1 = pnand %p4387_p3, %p4381_p0 }
  0x36   : > { %4391 = shalt.err (!%p4388_p1)
}
  0x37   : > { %s5569_s14 = smov 128   ;;  %s5570_s15 = smov 8  }
  0x38   : > { %3816 = dma.hbm_to_vmem [thread:$0]  (!%p4925_p5), %s5592_s3, 256, %s431_s28, [#allocation9], %s5569_s14, %s5569_s14, %s5570_s15  }
  0x39   : > { %s5594_s5 = sld [smem:[#allocation37_spill]] }
  0x3f   : > { %s4392_s2 = scalar_lea.hbm %s5594_s5, 1024 }
  0x40   : > { %p4393_p1 = scmp.ne.s32.totalorder %s5594_s5, %s4392_s2  ;;  %p4399_p8 = scmp.lt.u32.totalorder %s4392_s2, %s5594_s5 }
  0x42   : > { %p4395_p3 = pnand %p4393_p1, %p4939_p7 }
  0x44   : > { %p4396_p6 = pneg %p4395_p3 }
  0x46   : > { %p4401_p9 = pnand %p4399_p8, %p4396_p6 }
  0x48   : > { %4404 = shalt.err (!%p4401_p9)
}
  0x49   : > { %s4405_s28 = scalar_lea.vmem %s4929_s16, 1024  ;;  %p4413_p13 = scmp.lt.s32.totalorder %s4929_s16, %s4929_s16 }
  0x4a   : > { %p4406_p10 = scmp.ne.s32.totalorder %s4929_s16, %s4405_s28  ;;  %p4414_p0 = scmp.lt.s32.totalorder %s4405_s28, %s4405_s28 }
  0x4c   : > { %p4408_p11 = pnand %p4406_p10, %p4939_p7  ;;  %p4415_p2 = por %p4414_p0, %p4413_p13 }
  0x4e   : > { %p4409_p12 = pneg %p4408_p11 }
  0x50   : > { %p4416_p4 = pnand %p4415_p2, %p4409_p12 }
  0x52   : > { %4419 = shalt.err (!%p4416_p4)
}
  0x53   : > { %s4778_s6 = smov 64   ;;  %s4779_s1 = smov 4  }
  0x54   : > { %3822 = dma.hbm_to_vmem [thread:$0]  (!%p4925_p5), %s5594_s5, 1024, %s4929_s16, [#allocation12], %s4778_s6, %s4778_s6, %s4779_s1  }
  0x55   : > { %s4780_s8 = smov [#allocation14]   ;;  %s4781_s17 = smov [#allocation17]  }
  0x56   : > { %s488_s13 = sshll.u32 %s4780_s8, 4  ;;  %s515_s30 = sshll.u32 %s4781_s17, 4  ;;  %s489_s13 = int_to_ptr.vmem [resolvable:$true] %s488_s13  ;;  %s4981_s30 = int_to_ptr.vmem [resolvable:$true] %s515_s30 }
  0x57   : > { %s4420_s14 = scalar_lea.hbm %s5553_s9, 8192 }
  0x58   : > { %p4421_p1 = scmp.ne.s32.totalorder %s5553_s9, %s4420_s14  ;;  %p4427_p8 = scmp.lt.u32.totalorder %s4420_s14, %s5553_s9 }
  0x5a   : > { %p4423_p3 = pnand %p4421_p1, %p4939_p7 }
  0x5c   : > { %p4424_p6 = pneg %p4423_p3 }
  0x5e   : > { %p4429_p9 = pnand %p4427_p8, %p4424_p6 }
  0x60   : > { %4432 = shalt.err (!%p4429_p9)
}
  0x61   : > { %s4433_s6 = scalar_lea.vmem %s489_s13, 8192  ;;  %p4441_p13 = scmp.lt.s32.totalorder %s489_s13, %s489_s13 }
  0x62   : > { %p4434_p10 = scmp.ne.s32.totalorder %s489_s13, %s4433_s6  ;;  %p4442_p0 = scmp.lt.s32.totalorder %s4433_s6, %s4433_s6 }
  0x64   : > { %p4436_p11 = pnand %p4434_p10, %p4939_p7  ;;  %p4443_p2 = por %p4442_p0, %p4441_p13 }
  0x66   : > { %p4437_p12 = pneg %p4436_p11 }
  0x68   : > { %p4444_p4 = pnand %p4443_p2, %p4437_p12 }
  0x6a   : > { %4447 = shalt.err (!%p4444_p4)
}
  0x6b   : > { %s5571_s3 = smov 256   ;;  %s4783_s15 = smov 16  }
  0x6c   : > { %3828 = dma.hbm_to_vmem [thread:$0]  (!%p4925_p5), %s5553_s9, 8192, %s489_s13, [#allocation15], %s5571_s3, %s5571_s3, %s4783_s15  }
  0x6d   : > { %s4448_s17 = scalar_lea.hbm %s5555_s11, 4096 }
  0x6e   : > { %p4449_p1 = scmp.ne.s32.totalorder %s5555_s11, %s4448_s17  ;;  %p4455_p8 = scmp.lt.u32.totalorder %s4448_s17, %s5555_s11 }
  0x70   : > { %p4451_p3 = pnand %p4449_p1, %p4939_p7 }
  0x72   : > { %p4452_p6 = pneg %p4451_p3 }
  0x74   : > { %p4457_p9 = pnand %p4455_p8, %p4452_p6 }
  0x76   : > { %4460 = shalt.err (!%p4457_p9)
}
  0x77   : > { %s4461_s13 = scalar_lea.vmem %s4981_s30, 4096  ;;  %p4469_p13 = scmp.lt.s32.totalorder %s4981_s30, %s4981_s30 }
  0x78   : > { %p4462_p10 = scmp.ne.s32.totalorder %s4981_s30, %s4461_s13  ;;  %p4470_p0 = scmp.lt.s32.totalorder %s4461_s13, %s4461_s13 }
  0x7a   : > { %p4464_p11 = pnand %p4462_p10, %p4939_p7  ;;  %p4471_p2 = por %p4470_p0, %p4469_p13 }
  0x7c   : > { %p4465_p12 = pneg %p4464_p11 }
  0x7e   : > { %p4472_p4 = pnand %p4471_p2, %p4465_p12 }
  0x80   : > { %4475 = shalt.err (!%p4472_p4)
}
  0x81   : > { %3834 = dma.hbm_to_vmem [thread:$0]  (!%p4925_p5), %s5555_s11, 4096, %s4981_s30, [#allocation18], %s5571_s3, %s5571_s3, %s4783_s15  }
  0x82   : > { %s4784_s1 = smov [#allocation10]   ;;  %s4785_s8 = smov [#allocation13]  }
  0x83   : > { %s443_s21 = sshll.u32 %s4784_s1, 4  ;;  %s472_s17 = sshll.u32 %s4785_s8, 4  ;;  %s444_s21 = int_to_ptr.vmem [resolvable:$true] %s443_s21  ;;  %s5030_s17 = int_to_ptr.vmem [resolvable:$true] %s472_s17 }
  0x84   : > { %s5595_s4 = sld [smem:[#allocation36_spill]] }
  0x8a   : > { %s4476_s2 = scalar_lea.hbm %s5595_s4, 256 }
  0x8b   : > { %p4477_p1 = scmp.ne.s32.totalorder %s5595_s4, %s4476_s2  ;;  %p4483_p8 = scmp.lt.u32.totalorder %s4476_s2, %s5595_s4 }
  0x8d   : > { %p4479_p3 = pnand %p4477_p1, %p4939_p7 }
  0x8f   : > { %p4480_p6 = pneg %p4479_p3 }
  0x91   : > { %p4485_p9 = pnand %p4483_p8, %p4480_p6 }
  0x93   : > { %4488 = shalt.err (!%p4485_p9)
}
  0x94   : > { %s4489_s14 = scalar_lea.vmem %s444_s21, 256  ;;  %p4497_p13 = scmp.lt.s32.totalorder %s444_s21, %s444_s21 }
  0x95   : > { %p4490_p10 = scmp.ne.s32.totalorder %s444_s21, %s4489_s14  ;;  %p4498_p0 = scmp.lt.s32.totalorder %s4489_s14, %s4489_s14 }
  0x97   : > { %p4492_p11 = pnand %p4490_p10, %p4939_p7  ;;  %p4499_p2 = por %p4498_p0, %p4497_p13 }
  0x99   : > { %p4493_p12 = pneg %p4492_p11 }
  0x9b   : > { %p4500_p4 = pnand %p4499_p2, %p4493_p12 }
  0x9d   : > { %4503 = shalt.err (!%p4500_p4)
}
  0x9e   : > { %s5596_s1 = smov 8   ;;  %s5597_s8 = smov 128  }
  0x9f   : > { %3819 = dma.hbm_to_vmem [thread:$0]  (!%p4925_p5), %s5595_s4, 256, %s444_s21, [#allocation9], %s5597_s8, %s5597_s8, %s5596_s1  }
  0xa0   : > { %s5598_s7 = sld [smem:[#allocation39_spill]] }
  0xa6   : > { %s4504_s13 = scalar_lea.hbm %s5598_s7, 16384 }
  0xa7   : > { %p4505_p1 = scmp.ne.s32.totalorder %s5598_s7, %s4504_s13  ;;  %p4511_p8 = scmp.lt.u32.totalorder %s4504_s13, %s5598_s7 }
  0xa9   : > { %p4507_p3 = pnand %p4505_p1, %p4939_p7 }
  0xab   : > { %p4508_p6 = pneg %p4507_p3 }
  0xad   : > { %p4513_p9 = pnand %p4511_p8, %p4508_p6 }
  0xaf   : > { %4516 = shalt.err (!%p4513_p9)
}
  0xb0   : > { %s4517_s21 = scalar_lea.vmem %s5030_s17, 16384  ;;  %p4525_p13 = scmp.lt.s32.totalorder %s5030_s17, %s5030_s17 }
  0xb1   : > { %p4518_p10 = scmp.ne.s32.totalorder %s5030_s17, %s4517_s21  ;;  %p4526_p0 = scmp.lt.s32.totalorder %s4517_s21, %s4517_s21 }
  0xb3   : > { %p4520_p11 = pnand %p4518_p10, %p4939_p7  ;;  %p4527_p2 = por %p4526_p0, %p4525_p13 }
  0xb5   : > { %p4521_p12 = pneg %p4520_p11 }
  0xb7   : > { %p4528_p4 = pnand %p4527_p2, %p4521_p12 }
  0xb9   : > { %4531 = shalt.err (!%p4528_p4)
}
  0xba   : > { %s5599_s3 = smov 256   ;;  %s4786_s24 = smov [#allocation16]  }
  0xbb   : > { %3825 = dma.hbm_to_vmem [thread:$0]  (!%p4925_p5), %s5598_s7, 16384, %s5030_s17, [#allocation12], %s5599_s3, %s5599_s3, %s4783_s15  }
  0xbc   : > { %s502_s28 = sshll.u32 %s4786_s24, 4  ;;  %s4787_s2 = smov [#allocation19]   ;;  %s503_s28 = int_to_ptr.vmem [resolvable:$true] %s502_s28 }
  0xbd   : > { %s532_s16 = sshll.u32 %s4787_s2, 4  ;;  %s4532_s30 = scalar_lea.hbm %s5554_s10, 64  ;;  %s5079_s16 = int_to_ptr.vmem [resolvable:$true] %s532_s16 }
  0xbe   : > { %p4533_p1 = scmp.ne.s32.totalorder %s5554_s10, %s4532_s30  ;;  %p4539_p8 = scmp.lt.u32.totalorder %s4532_s30, %s5554_s10 }
  0xc0   : > { %p4535_p3 = pnand %p4533_p1, %p4939_p7 }
  0xc2   : > { %p4536_p6 = pneg %p4535_p3 }
  0xc4   : > { %p4541_p9 = pnand %p4539_p8, %p4536_p6 }
  0xc6   : > { %4544 = shalt.err (!%p4541_p9)
}
  0xc7   : > { %s4545_s17 = scalar_lea.vmem %s503_s28, 64  ;;  %p4553_p13 = scmp.lt.s32.totalorder %s503_s28, %s503_s28 }
  0xc8   : > { %p4546_p10 = scmp.ne.s32.totalorder %s503_s28, %s4545_s17  ;;  %p4554_p0 = scmp.lt.s32.totalorder %s4545_s17, %s4545_s17 }
  0xca   : > { %p4548_p11 = pnand %p4546_p10, %p4939_p7  ;;  %p4555_p2 = por %p4554_p0, %p4553_p13 }
  0xcc   : > { %p4549_p12 = pneg %p4548_p11 }
  0xce   : > { %p4556_p4 = pnand %p4555_p2, %p4549_p12 }
  0xd0   : > { %4559 = shalt.err (!%p4556_p4)
}
  0xd1   : > { %3831 = dma.hbm_to_vmem [thread:$0]  (!%p4925_p5), %s5554_s10, 64, %s503_s28, [#allocation15]  }
  0xd2   : > { %s4560_s13 = scalar_lea.hbm %s5556_s12, 64 }
  0xd3   : > { %p4561_p1 = scmp.ne.s32.totalorder %s5556_s12, %s4560_s13  ;;  %p4567_p8 = scmp.lt.u32.totalorder %s4560_s13, %s5556_s12 }
  0xd5   : > { %p4563_p3 = pnand %p4561_p1, %p4939_p7 }
  0xd7   : > { %p4564_p6 = pneg %p4563_p3 }
  0xd9   : > { %p4569_p9 = pnand %p4567_p8, %p4564_p6 }
  0xdb   : > { %4572 = shalt.err (!%p4569_p9)
}
  0xdc   : > { %s4573_s28 = scalar_lea.vmem %s5079_s16, 64  ;;  %p4581_p13 = scmp.lt.s32.totalorder %s5079_s16, %s5079_s16 }
  0xdd   : > { %p4574_p10 = scmp.ne.s32.totalorder %s5079_s16, %s4573_s28  ;;  %p4582_p0 = scmp.lt.s32.totalorder %s4573_s28, %s4573_s28 }
  0xdf   : > { %p4576_p11 = pnand %p4574_p10, %p4939_p7  ;;  %p4583_p2 = por %p4582_p0, %p4581_p13 }
  0xe1   : > { %p4577_p12 = pneg %p4576_p11 }
  0xe3   : > { %p4584_p4 = pnand %p4583_p2, %p4577_p12 }
  0xe5   : > { %4587 = shalt.err (!%p4584_p4)
}
  0xe6   : > { %3837 = dma.hbm_to_vmem [thread:$0]  (!%p4925_p5), %s5556_s12, 64, %s5079_s16, [#allocation18]  }
  0xe7   : > { %s3434_s27 = sadd.s32 4294967294, %s4772_s23   ;;  %s49_s17 = sadd.s32 1, %s4768_s22 }
  0xe8   : > { %p51_p7 = scmp.ge.s32.totalorder %s49_s17, 3  ;;  %s56_s29 = sadd.s32 1, %s4760_s20 }
  0xe9   : > { %p63_p1 = scmp.ne.s32.totalorder %s4760_s20, %s4756_s19  ;;  %p64_p3 = scmp.eq.s32.totalorder %s4772_s23, 0 }
  0xea   : > { %s5629_s17 = smov (%p51_p7, %s49_s17), 0  ;;  %p69_p8 = scmp.ne.s32.totalorder %s4756_s19, %s4752_s18 }
  0xeb   : > { %p5130_p6 = por %p64_p3, %p63_p1  ;;  %s53_s16 = ssub.s32 %s4768_s22, %s5629_s17 }
  0xec   : > { %s5601_s8 = sadd.s32 4294967295, %s4772_s23   ;;  %p54_p9 = scmp.eq.s32.totalorder %s53_s16, 0 }
  0xed   : > { %p5140_p5 = scmp.eq.s32.totalorder %s5601_s8, 2  ;;  %p5603_p10 = scmp.ne.s32.totalorder %s5589_s25, 0 }
  0xee   : > { %p363_p13 = scmp.eq.s32.totalorder %s3434_s27, 2  ;;  %p3854_p2 = scmp.lt.s32.totalorder %s4772_s23, 3 }
  0xef   : > { %s5602_s24 = scalar_select %p5140_p5, 1, 0 }
  0xf0   : > { %p5146_p11 = por %p5603_p10, %p69_p8  ;;  %p5152_p12 = por %p5140_p5, %p63_p1 }
  0xf1   : > { %s5157_s6 = scalar_select %p54_p9, %s4760_s20, %s56_s29  }
  0xf2   : > { %s5605_s13 = scalar_select %p5152_p12, 1, 0 }
  0xf3   : > { %p5159_p0 = por %p363_p13, %p69_p8  ;;  %s543_s14 = sand.u32 1, %s4760_s20  }
  0xf4   : > { %s3446_s21 = sshll.u32 %s4768_s22, 7  ;;  %s3445_s28 = sshll.u32 %s543_s14, 3 }
  0xf5   : > { %s5606_s30 = scalar_select %p5159_p0, 1, 0 }
  0xf6   : > { %s5607_s0 = sld [smem:[#allocation32_spill]]  ;;  %s547_s27 = scalar_lea.vmem [#allocation5], %s3445_s28 }
  0xf7   : > { %s554_s29 = sshll.u32 %s547_s27, 4  ;;  %p5173_p4 = pnand %p3854_p2, %p5130_p6  ;;  %s5177_s29 = int_to_ptr.vmem [resolvable:$true] %s554_s29 }
  0xf8   : > { %s544_s4 = scalar_lea.sflag [#allocation6], %s543_s14 }
  0xf9   : > { %p4590_p1 = pneg %p5173_p4 }
  0xfc   : > { %s5169_s16 = scalar_lea.hbm %s5607_s0, %s3446_s21  ;;  %s4593_s3 = scalar_lea.hbm %s5607_s0, 384 }
  0xfd   : > { %s4588_s5 = scalar_lea.hbm %s5169_s16, 128  ;;  %p4594_p6 = scmp.lt.u32.totalorder %s5169_s16, %s5607_s0 }
  0xfe   : > { %p4589_p7 = scmp.ne.s32.totalorder %s5169_s16, %s4588_s5  ;;  %p4595_p9 = scmp.lt.u32.totalorder %s4593_s3, %s4588_s5 }
  0xff   : > { %p4597_p13 = scmp.lt.u32.totalorder %s4588_s5, %s5169_s16 }
 0x100   : > { %p4591_p3 = pnand %p4590_p1, %p4589_p7  ;;  %p4596_p10 = por %p4595_p9, %p4594_p6 }
 0x102   : > { %p4592_p8 = pneg %p4591_p3  ;;  %p4598_p2 = por %p4597_p13, %p4596_p10 }
 0x104   : > { %p4599_p0 = pnand %p4598_p2, %p4592_p8 }
 0x106   : > { %4602 = shalt.err (!%p4599_p0)
}
 0x107   : > { %s4603_s14 = scalar_lea.vmem %s5177_s29, 128  ;;  %s4788_s27 = smov [#allocation5]  }
 0x108   : > { %p4604_p7 = scmp.ne.s32.totalorder %s5177_s29, %s4603_s14  ;;  %s4608_s21 = sshll.u32 %s4788_s27, 4  ;;  %s4609_s21 = int_to_ptr.vmem [resolvable:$false] %s4608_s21 }
 0x109   : > { %s4610_s28 = scalar_lea.vmem %s4609_s21, 256  ;;  %p4611_p5 = scmp.lt.s32.totalorder %s5177_s29, %s4609_s21 }
 0x10a   : > { %p4606_p3 = pnand %p4604_p7, %p4590_p1  ;;  %p4612_p6 = scmp.lt.s32.totalorder %s4610_s28, %s4603_s14 }
 0x10c   : > { %p4607_p12 = pneg %p4606_p3  ;;  %p4613_p9 = por %p4612_p6, %p4611_p5 }
 0x10e   : > { %p4614_p10 = pnand %p4613_p9, %p4607_p12 }
 0x110   : > { %4617 = shalt.err (!%p4614_p10)
}
 0x111   : > { %3841 = dma.hbm_to_vmem [thread:$0]  (!%p5173_p4), %s5169_s16, 128, %s5177_s29, %s544_s4  }
 0x112   : > { %p5609_p0 = scmp.ne.s32.totalorder %s5590_s26, 0 }
 0x113   : > { %s5207_s5 = sand.u32 (!%p5609_p0), 1, %s4756_s19  }
 0x114   : > { %563 = sbr.rel (%p5609_p0) target bundleno = 2205 (0x89d), region = 72  ;;  %s3448_s3 = sshll.u32 (!%p5609_p0), %s5207_s5, 3 }
 0x115   : > { %s566_s1 = scalar_lea.sflag (!%p5609_p0), [#allocation6], %s5207_s5  ;;  %s5211_s15 = scalar_lea.vmem (!%p5609_p0), [#allocation5], %s3448_s3 }
 0x11b   : > { %4723 = dma.done.wait (%p5146_p11), %s566_s1, 128  }
 0x11c   : > { %4725 = vsyncadd (%p5146_p11), %s566_s1, 4294967168  ;;  %p5610_p5 = scmp.ne.s32.totalorder %s5589_s25, 0 }
 0x11e   : > { %4727 = dma.done.wait (%p5610_p5), [#allocation9], 512  }
 0x11f   : > { %4729 = vsyncadd (%p5610_p5), [#allocation9], 4294966784 }
 0x120   : > { %4731 = dma.done.wait (%p5610_p5), [#allocation12], 17408  }
 0x121   : > { %4733 = vsyncadd (%p5610_p5), [#allocation12], 4294949888 }
 0x122   : > { %4735 = dma.done.wait (%p5610_p5), [#allocation15], 8256  }
 0x123   : > { %4737 = vsyncadd (%p5610_p5), [#allocation15], 4294959040 }
 0x124   : > { %4739 = dma.done.wait (%p5610_p5), [#allocation18], 4160  }
 0x125   : > { %4741 = vsyncadd (%p5610_p5), [#allocation18], 4294963136  ;;  %s5611_s4 = sld [smem:[#allocation31_spill]]  ;;  %s3457_s26 = sshll.u32 %s5207_s5, 5 }
 0x126   : > { %s5235_s2 = scalar_lea.vmem [#allocation20], %s3457_s26 }
 0x12b   : > { %p652_p11 = scmp.eq.s32.totalorder %s5611_s4, 0 }
 0x12c   : > { %v658_v0 = vld [vmem:[#allocation8] sm:$0xff] (%p652_p11)  ;;  %v659_v1 = vld [vmem:[#allocation8 + $0x8] sm:$0xff] (%p652_p11)  ;;  %v662_v2 = vld [vmem:[#allocation10] sm:$0xff] (%p652_p11) }
 0x12d   : > { %657 = sbr.rel (!%p652_p11) target bundleno = 308 (0x134), region = 112  ;;  %660 = vst [vmem:[#allocation2] sm:$0xff] (%p652_p11), %v658_v0  ;;  %661 = vst [vmem:[#allocation2 + $0x8] sm:$0xff] (%p652_p11), %v659_v1  ;;  %v663_v3 = vld [vmem:[#allocation10 + $0x8] sm:$0xff] (%p652_p11) }
 0x12e   : > { %664 = vst [vmem:[#allocation3] sm:$0xff] (%p652_p11), %v662_v2  ;;  %665 = vst [vmem:[#allocation3 + $0x8] sm:$0xff] (%p652_p11), %v663_v3 }
 0x134 PF: > { %v3940_v4 = vld [vmem:[#allocation11] sm:$0xff]   ;;  %v4789_v5 = vmov 0.0   ;;  %v3941_v6 = vld [vmem:[#allocation11 + $0x8] sm:$0xff]   ;;  %vm4790_vm0 = vmmov 0   ;;  %v3942_v7 = vld [vmem:[#allocation11 + $0x10] sm:$0xff]   ;;  %v801_v17 = vlaneseq  ;;  %s5612_s29 = sld [smem:[#allocation33_spill]] }
 0x135   : > { %3737 = vmatprep.subr.bf16.mxu0 %v4789_v5  ;;  %3753 = vmatprep.mubr.msk.bf16.mxu0 %vm4790_vm0, %v4789_v5  ;;  %v3943_v8 = vld [vmem:[#allocation11 + $0x18] sm:$0xff]   ;;  %v3944_v9 = vld [vmem:[#allocation11 + $0x20] sm:$0xff]   ;;  %v3945_v10 = vld [vmem:[#allocation11 + $0x28] sm:$0xff]   ;;  %v4791_v15 = vmov 1966171168   ;;  %s5613_s26 = sld [smem:[#allocation38_spill]] }
 0x136   : > { %3738 = vmatpush3.bf16.msra.mxu0 %v3940_v4  ;;  %v3946_v11 = vld [vmem:[#allocation11 + $0x30] sm:$0xff]   ;;  %v3947_v12 = vld [vmem:[#allocation11 + $0x38] sm:$0xff]   ;;  %v799_v16 = vunpack.c.l.s4 %v4791_v15  ;;  %v5241_v19 = vshrl.u32 %v801_v17, 7  ;;  %vm975_vm1 = vcmask 1041409   ;;  %vm977_vm2 = vcmask 1042434   ;;  %s5614_s8 = sld [smem:[#allocation34_spill]] }
 0x137   : > { %3739 = vmatprep.subr.bf16.mxu0 %v4789_v5  ;;  %v671_v13 = vld [vmem:[#allocation2 + $0x8] sm:$0xff]  ;;  %vm979_vm3 = vcmask 1043459   ;;  %vm981_vm4 = vcmask 1044484   ;;  %vm983_vm5 = vcmask 1045509   ;;  %vm985_vm6 = vcmask 1046534   ;;  %s5615_s1 = sld [smem:[#allocation40_spill]] }
 0x138   : > { %v5237_v14 = vpack.c.bf16 %v671_v13, %v671_v13  ;;  %v800_v18 = vunpack.c.0.s8 %v799_v16  ;;  %v5248_v26 = vsub.s32 0, %v5241_v19  ;;  %vm987_vm7 = vcmask 1047559   ;;  %s4793_s4 = smov [#allocation21]   ;;  %p5616_p4 = scmp.ne.s32.totalorder %s5602_s24, 0 }
 0x139   : > { %vm990_vm8 = vcmask 64512  }
 0x13a   : > { %3740 = vmatpush3.bf16.msra.mxu0 %v3941_v6  ;;  %v803_v20 = vsub.s32 %v800_v18, %v5241_v19  ;;  %v3710_v22 = vld [vmem:[%s5612_s29] sm:$0xff]   ;;  %v3725_v28 = vld [vmem:[%s5612_s29 + $0x8] sm:$0xff]   ;;  %v3726_v34 = vld [vmem:[%s5612_s29 + $0x10] sm:$0xff]  }
 0x13b   : > { %3741 = vmatprep.subr.bf16.mxu0 %v4789_v5  ;;  %v3711_v33 = vunpack.c.l.bf16 %v3710_v22  ;;  %v3712_v39 = vunpack.c.h.bf16 %v3710_v22  ;;  %v3715_v40 = vunpack.c.l.bf16 %v3725_v28  ;;  %v3716_v41 = vunpack.c.h.bf16 %v3725_v28  ;;  %v3727_v51 = vld [vmem:[%s5612_s29 + $0x18] sm:$0xff]   ;;  %v3467_v2 = vld [vmem:[%s5613_s26] ss:$0 sm:$0xff]  ;;  %s3235_s26 = sshll.u32 %s4793_s4, 4  ;;  %s3236_s26 = int_to_ptr.vmem [resolvable:$true] %s3235_s26 }
 0x13c   : > { %v3719_v43 = vunpack.c.l.bf16 %v3726_v34  ;;  %v3720_v55 = vunpack.c.h.bf16 %v3726_v34  ;;  %v3723_v59 = vunpack.c.l.bf16 %v3727_v51  ;;  %v3724_v0 = vunpack.c.h.bf16 %v3727_v51  ;;  %s4618_s25 = scalar_lea.vmem %s3236_s26, 256  ;;  %p4625_p13 = scmp.lt.s32.totalorder %s3236_s26, %s3236_s26 }
 0x13d   : > { %v5296_v51 = vsub.s32 2, %v5241_v19  ;;  %p4619_p12 = scmp.ne.s32.totalorder %s3236_s26, %s4618_s25  ;;  %p4626_p2 = scmp.lt.s32.totalorder %s4618_s25, %s4618_s25 }
 0x13e   : > { %3742 = vmatpush3.bf16.msra.mxu0 %v3942_v7 }
 0x13f   : > { %3743 = vmatprep.subr.bf16.mxu0 %v4789_v5  ;;  %p4620_p1 = pnand %p4619_p12, %p5616_p4  ;;  %p4627_p7 = por %p4626_p2, %p4625_p13 }
 0x141   : > { %p4621_p8 = pneg %p4620_p1 }
 0x142   : > { %3744 = vmatpush3.bf16.msra.mxu0 %v3943_v8 }
 0x143   : > { %3745 = vmatprep.subr.bf16.mxu0 %v4789_v5  ;;  %p4628_p3 = pnand %p4627_p7, %p4621_p8 }
 0x146   : > { %3746 = vmatpush3.bf16.msra.mxu0 %v3944_v9 }
 0x147   : > { %3747 = vmatprep.subr.bf16.mxu0 %v4789_v5 }
 0x14a   : > { %3748 = vmatpush3.bf16.msra.mxu0 %v3945_v10 }
 0x14b   : > { %3749 = vmatprep.subr.bf16.mxu0 %v4789_v5 }
 0x14e   : > { %3750 = vmatpush3.bf16.msra.mxu0 %v3946_v11 }
 0x14f   : > { %3751 = vmatprep.subr.bf16.mxu0 %v4789_v5 }
 0x152   : > { %3752 = vmatpush3.bf16.msra.mxu0 %v3947_v12 }
 0x155   : > { %3754 = vmatmul.mubr.bf16.vlgmr.msra.gmra.mrb[0].mxu0 %v5237_v14 }
 0x228   : > { %v774_v21 = vpop.f32.mrb[0].mxu0 }
 0x229   : > { %v797_v23 = vcombine.high %v774_v21, %v774_v21  ;;  %v804_v24 = vrot.slane %v774_v21, %v803_v20  ;;  %v3755_v25 = vpop.f32.mrb[1].mxu0 }
 0x22a   : > { %v777_v27 = vpop.f32.mrb[2].mxu0 }
 0x22b   : > { %v811_v29 = vrot.slane %v797_v23, %v803_v20  ;;  %v812_v30 = vcombine.high %v804_v24, %v804_v24  ;;  %v820_v31 = vrot.slane %v804_v24, %v803_v20  ;;  %v3756_v32 = vpop.f32.mrb[3].mxu0  ;;  %v942_v23 = vand.u32 127, %v801_v17 }
 0x22d   : > { %v813_v35 = vcombine.high %v811_v29, %v811_v29  ;;  %v827_v36 = vrot.slane %v811_v29, %v803_v20  ;;  %v834_v37 = vrot.slane %v812_v30, %v803_v20  ;;  %v842_v38 = vcombine.high %v820_v31, %v820_v31 }
 0x22e   : > { %v849_v42 = vrot.slane %v820_v31, %v5248_v26  ;;  %v5272_v25 = vsub.s32 %v942_v23, %v5241_v19 }
 0x22f   : > { %v841_v44 = vrot.slane %v813_v35, %v803_v20  ;;  %v844_v45 = vcombine.high %v834_v37, %v834_v37  ;;  %v853_v46 = vrot.slane %v834_v37, %v5248_v26  ;;  %v843_v47 = vcombine.high %v827_v36, %v827_v36 }
 0x230   : > { %v857_v48 = vrot.slane %v842_v38, %v5248_v26  ;;  %v865_v49 = vrot.slane %v827_v36, %v5248_v26  ;;  %v886_v50 = vadd.f32 %v3711_v33, %v849_v42 }
 0x231   : > { %v861_v52 = vrot.slane %v844_v45, %v5248_v26  ;;  %v887_v53 = vadd.f32 %v3712_v39, %v853_v46  ;;  %v845_v56 = vcombine.high %v841_v44, %v841_v44  ;;  %v869_v57 = vrot.slane %v841_v44, %v5248_v26 }
 0x232   : > { %v888_v54 = vadd.f32 %v3715_v40, %v857_v48  ;;  %4284 = vtanh.f32 %v886_v50  ;;  %v873_v60 = vrot.slane %v843_v47, %v5248_v26  ;;  %v890_v61 = vadd.f32 %v3719_v43, %v865_v49 }
 0x233   : > { %v889_v58 = vadd.f32 %v3716_v41, %v861_v52  ;;  %4286 = vtanh.f32 %v887_v53  ;;  %v877_v62 = vrot.slane %v845_v56, %v5248_v26  ;;  %v891_v63 = vadd.f32 %v3720_v55, %v869_v57 }
 0x234   : > { %4288 = vtanh.f32 %v888_v54  ;;  %v892_v1 = vadd.f32 %v3723_v59, %v873_v60  ;;  %v4792_v49 = vmov 0   ;;  %v5293_v50 = vsub.s32 1, %v5241_v19 }
 0x235   : > { %4290 = vtanh.f32 %v889_v58  ;;  %v893_v3 = vadd.f32 %v3724_v0, %v877_v62  ;;  %3939 = vset.pattern.permute.xlu0 %v4792_v49  ;;  %3938 = vset.pattern.permute.xlu1 %v4792_v49  ;;  %v5299_v52 = vsub.s32 3, %v5241_v19  ;;  %v1013_v57 = vsub.s32 4, %v5241_v19 }
 0x236   : > { %4292 = vtanh.f32 %v890_v61  ;;  %v1017_v0 = vsub.s32 5, %v5241_v19 }
 0x237   : > { %4294 = vtanh.f32 %v891_v63 }
 0x238   : > { %4296 = vtanh.f32 %v892_v1 }
 0x239   : > { %4298 = vtanh.f32 %v893_v3 }
 0x23c   : > { %v4285_v4 = vpop.eup %4284 }
 0x23d   : > { %v909_v5 = vmul.f32 %v4285_v4, %v3467_v2  ;;  %v4287_v6 = vpop.eup %4286  ;;  %v1021_v4 = vsub.s32 6, %v5241_v19 }
 0x23e   : > { %v4289_v7 = vpop.eup %4288  ;;  %v910_v10 = vmul.f32 %v4287_v6, %v3467_v2 }
 0x23f   : > { %917 = vadd.xlane.f32.xlu0 %v909_v5  ;;  %v911_v8 = vmul.f32 %v4289_v7, %v3467_v2  ;;  %v4291_v9 = vpop.eup %4290 }
 0x240   : > { %v4293_v11 = vpop.eup %4292  ;;  %v912_v12 = vmul.f32 %v4291_v9, %v3467_v2 }
 0x241   : > { %921 = vadd.xlane.f32.xlu1 %v911_v8  ;;  %v4295_v13 = vpop.eup %4294  ;;  %v913_v15 = vmul.f32 %v4293_v11, %v3467_v2  ;;  %v1025_v8 = vsub.s32 7, %v5241_v19  ;;  %v3990_v19 = vld [vmem:[#allocation13 + $0xe4] ss:$16 sps:$4 sm:$0xff]  }
 0x242   : > { %v4297_v16 = vpop.eup %4296  ;;  %v914_v18 = vmul.f32 %v4295_v13, %v3467_v2 }
 0x243   : > { %919 = vadd.xlane.f32.xlu0 %v910_v10  ;;  %v4299_v20 = vpop.eup %4298  ;;  %v915_v21 = vmul.f32 %v4297_v16, %v3467_v2 }
 0x244   : > { %v916_v22 = vmul.f32 %v4299_v20, %v3467_v2 }
 0x245   : > { %923 = vadd.xlane.f32.xlu1 %v912_v12 }
 0x247   : > { %925 = vadd.xlane.f32.xlu0 %v913_v15 }
 0x249   : > { %927 = vadd.xlane.f32.xlu1 %v914_v18 }
 0x24b   : > { %929 = vadd.xlane.f32.xlu0 %v915_v21 }
 0x24d   : > { %931 = vadd.xlane.f32.xlu1 %v916_v22 }
 0x2cc   : > { %v918_v24 = vpop.xlane.xlu0 %917 }
 0x2cd   : > { %v946_v29 = vrot.slane %v918_v24, %v5272_v25 }
 0x2ce   : > { %v922_v27 = vpop.xlane.xlu1 %921 }
 0x2cf   : > { %v954_v31 = vrot.slane %v922_v27, %v5272_v25 }
 0x2d0   : > { %v920_v28 = vpop.xlane.xlu0 %919 }
 0x2d1   : > { %v950_v30 = vrot.slane %v920_v28, %v5272_v25 }
 0x2d2   : > { %v924_v33 = vpop.xlane.xlu1 %923 }
 0x2d3   : > { %v976_v32 = vsel %vm975_vm1, %v950_v30, %v946_v29  ;;  %v958_v34 = vrot.slane %v924_v33, %v5272_v25 }
 0x2d4   : > { %v978_v17 = vsel %vm977_vm2, %v954_v31, %v976_v32  ;;  %v926_v35 = vpop.xlane.xlu0 %925 }
 0x2d5   : > { %v962_v36 = vrot.slane %v926_v35, %v5272_v25  ;;  %v980_v37 = vsel %vm979_vm3, %v958_v34, %v978_v17 }
 0x2d6   : > { %v928_v39 = vpop.xlane.xlu1 %927 }
 0x2d7   : > { %v982_v38 = vsel %vm981_vm4, %v962_v36, %v980_v37  ;;  %v966_v40 = vrot.slane %v928_v39, %v5272_v25 }
 0x2d8   : > { %v930_v41 = vpop.xlane.xlu0 %929 }
 0x2d9   : > { %v970_v42 = vrot.slane %v930_v41, %v5272_v25  ;;  %v984_v43 = vsel %vm983_vm5, %v966_v40, %v982_v38 }
 0x2da   : > { %v932_v44 = vpop.xlane.xlu1 %931 }
 0x2db   : > { %v986_v45 = vsel %vm985_vm6, %v970_v42, %v984_v43  ;;  %v974_v46 = vrot.slane %v932_v44, %v5272_v25 }
 0x2dd   : > { %v988_v47 = vsel %vm987_vm7, %v974_v46, %v986_v45 }
 0x2de   : > { %v991_v48 = vsel %vm990_vm8, %v988_v47, -inf }
 0x2df   : > { %992 = vmax.xlane.f32.xlu0 %v991_v48 }
 0x36c   : > { %v993_v53 = vpop.xlane.xlu0 %992 }
 0x36d   : > { %v998_v54 = vrot.slane %v993_v53, %v5248_v26  ;;  %v1002_v55 = vrot.slane %v993_v53, %v5293_v50  ;;  %v1006_v56 = vrot.slane %v993_v53, %v5296_v51  ;;  %v1010_v58 = vrot.slane %v993_v53, %v5299_v52 }
 0x36e   : > { %v1014_v1 = vrot.slane %v993_v53, %v1013_v57  ;;  %v1018_v5 = vrot.slane %v993_v53, %v1017_v0  ;;  %v1022_v9 = vrot.slane %v993_v53, %v1021_v4  ;;  %v1026_v15 = vrot.slane %v993_v53, %v1025_v8 }
 0x36f   : > { %v1035_v59 = vsub.f32 %v918_v24, %v998_v54  ;;  %v1036_v60 = vsub.f32 %v920_v28, %v1002_v55  ;;  %v1037_v61 = vsub.f32 %v922_v27, %v1006_v56  ;;  %v1038_v2 = vsub.f32 %v924_v33, %v1010_v58 }
 0x370   : > { %v1039_v6 = vsub.f32 %v926_v35, %v1014_v1  ;;  %v1040_v10 = vsub.f32 %v928_v39, %v1018_v5  ;;  %v1041_v16 = vsub.f32 %v930_v41, %v1022_v9  ;;  %v1042_v21 = vsub.f32 %v932_v44, %v1026_v15  ;;  %v3958_v1 = vld [vmem:[#allocation13 + $0x2c] ss:$16 sps:$4 sm:$0xff]   ;;  %v3966_v9 = vld [vmem:[#allocation13 + $0x64] ss:$16 sps:$4 sm:$0xff]   ;;  %v3971_v15 = vld [vmem:[#allocation13 + $0x60] ss:$16 sps:$4 sm:$0xff]  }
 0x371   : > { %v1043_v62 = vmul.f32 1.442695, %v1035_v59  ;;  %v1045_v63 = vmul.f32 1.442695, %v1036_v60  ;;  %v1047_v3 = vmul.f32 1.442695, %v1037_v61 }
 0x372   : > { %v1049_v7 = vmul.f32 1.442695, %v1038_v2  ;;  %v1051_v11 = vmul.f32 1.442695, %v1039_v6  ;;  %v1053_v18 = vmul.f32 1.442695, %v1040_v10 }
 0x373   : > { %4300 = vpow2.f32 %v1043_v62  ;;  %v1055_v22 = vmul.f32 1.442695, %v1041_v16  ;;  %v1057_v24 = vmul.f32 1.442695, %v1042_v21  ;;  %v3948_v59 = vld [vmem:[#allocation13 + $0x4] ss:$16 sps:$4 sm:$0xff]  }
 0x374   : > { %4302 = vpow2.f32 %v1045_v63  ;;  %v3950_v60 = vld [vmem:[#allocation13 + $0x8] ss:$16 sps:$4 sm:$0xff]   ;;  %v3952_v61 = vld [vmem:[#allocation13 + $0xc] ss:$16 sps:$4 sm:$0xff]   ;;  %v3953_v62 = vld [vmem:[#allocation13] ss:$16 sps:$4 sm:$0xff]   ;;  %2194 = vmatprep.subr.bf16.mxu1 %v3948_v59 }
 0x375   : > { %4304 = vpow2.f32 %v1047_v3  ;;  %v3954_v63 = vld [vmem:[#allocation13 + $0x24] ss:$16 sps:$4 sm:$0xff]   ;;  %2276 = vmatprep.subr.bf16.mxu0 %v3952_v61  ;;  %2195 = vmatpush1.bf16.msra.mxu1 %v3953_v62  ;;  %v3956_v2 = vld [vmem:[#allocation13 + $0x28] ss:$16 sps:$4 sm:$0xff]   ;;  %v3959_v3 = vld [vmem:[#allocation13 + $0x20] ss:$16 sps:$4 sm:$0xff]  }
 0x376   : > { %4306 = vpow2.f32 %v1049_v7  ;;  %2277 = vmatpush1.bf16.msra.mxu0 %v3950_v60  ;;  %2196 = vmatprep.subr.bf16.mxu1 %v3954_v63  ;;  %v3964_v5 = vld [vmem:[#allocation13 + $0x4c] ss:$16 sps:$4 sm:$0xff]   ;;  %v3962_v6 = vld [vmem:[#allocation13 + $0x48] ss:$16 sps:$4 sm:$0xff]   ;;  %v3965_v7 = vld [vmem:[#allocation13 + $0x40] ss:$16 sps:$4 sm:$0xff]  }
 0x377   : > { %4308 = vpow2.f32 %v1051_v11  ;;  %2278 = vmatprep.subr.bf16.mxu0 %v3958_v1  ;;  %v3970_v10 = vld [vmem:[#allocation13 + $0x6c] ss:$16 sps:$4 sm:$0xff]   ;;  %v3968_v11 = vld [vmem:[#allocation13 + $0x68] ss:$16 sps:$4 sm:$0xff]   ;;  %v3972_v16 = vld [vmem:[#allocation13 + $0x84] ss:$16 sps:$4 sm:$0xff]  }
 0x378   : > { %4310 = vpow2.f32 %v1053_v18  ;;  %v3976_v18 = vld [vmem:[#allocation13 + $0x8c] ss:$16 sps:$4 sm:$0xff]   ;;  %v3974_v21 = vld [vmem:[#allocation13 + $0x88] ss:$16 sps:$4 sm:$0xff]   ;;  %v4001_v62 = vld [vmem:[#allocation13 + $0x100] ss:$16 sps:$4 sm:$0xff]  }
 0x379   : > { %4312 = vpow2.f32 %v1055_v22  ;;  %2197 = vmatpush1.bf16.msra.mxu1 %v3959_v3  ;;  %v3977_v22 = vld [vmem:[#allocation13 + $0x80] ss:$16 sps:$4 sm:$0xff]   ;;  %v4000_v59 = vld [vmem:[#allocation13 + $0x10c] ss:$16 sps:$4 sm:$0xff]   ;;  %v3998_v61 = vld [vmem:[#allocation13 + $0x108] ss:$16 sps:$4 sm:$0xff]  }
 0x37a   : > { %4314 = vpow2.f32 %v1057_v24  ;;  %2279 = vmatpush1.bf16.msra.mxu0 %v3956_v2  ;;  %v4002_v63 = vld [vmem:[#allocation13 + $0x124] ss:$16 sps:$4 sm:$0xff]   ;;  %v4006_v1 = vld [vmem:[#allocation13 + $0x12c] ss:$16 sps:$4 sm:$0xff]   ;;  %v4004_v3 = vld [vmem:[#allocation13 + $0x128] ss:$16 sps:$4 sm:$0xff]  }
 0x37b   : > { %2280 = vmatprep.subr.bf16.mxu0 %v3964_v5  ;;  %v4008_v5 = vld [vmem:[#allocation13 + $0x144] ss:$16 sps:$4 sm:$0xff]  }
 0x37d   : > { %v5315_v12 = vpop.eup %4300 }
 0x37e   : > { %v5317_v13 = vpop.eup %4302  ;;  %1068 = vperm.xlu1 %3938, %v5315_v12   ;;  %2281 = vmatpush1.bf16.msra.mxu0 %v3962_v6  ;;  %v4012_v6 = vld [vmem:[#allocation13 + $0x14c] ss:$16 sps:$4 sm:$0xff]  }
 0x37f   : > { %1071 = vperm.xlu0 %3939, %v5317_v13   ;;  %v5323_v20 = vpop.eup %4304  ;;  %2282 = vmatprep.subr.bf16.mxu0 %v3970_v10  ;;  %v4018_v10 = vld [vmem:[#allocation13 + $0x16c] ss:$16 sps:$4 sm:$0xff]  }
 0x380   : > { %v5326_v23 = vpop.eup %4306 }
 0x381   : > { %v5329_v27 = vpop.eup %4308 }
 0x382   : > { %1074 = vperm.xlu1 %3938, %v5323_v20   ;;  %v5332_v28 = vpop.eup %4310  ;;  %2283 = vmatpush1.bf16.msra.mxu0 %v3968_v11  ;;  %v4016_v11 = vld [vmem:[#allocation13 + $0x168] ss:$16 sps:$4 sm:$0xff]  }
 0x383   : > { %v5335_v29 = vpop.eup %4312  ;;  %2284 = vmatprep.subr.bf16.mxu0 %v3976_v18  ;;  %v4022_v18 = vld [vmem:[#allocation13 + $0x188] ss:$16 sps:$4 sm:$0xff]  }
 0x384   : > { %v5338_v30 = vpop.eup %4314 }
 0x386   : > { %1077 = vperm.xlu1 %3938, %v5326_v23   ;;  %2285 = vmatpush1.bf16.msra.mxu0 %v3974_v21  ;;  %v4025_v21 = vld [vmem:[#allocation13 + $0x180] ss:$16 sps:$4 sm:$0xff]  }
 0x38a   : > { %1080 = vperm.xlu1 %3938, %v5329_v27  }
 0x38e   : > { %1083 = vperm.xlu1 %3938, %v5332_v28  }
 0x392   : > { %1086 = vperm.xlu1 %3938, %v5335_v29  }
 0x396   : > { %1089 = vperm.xlu1 %3938, %v5338_v30  }
 0x3fd   : > { %v1069_v31 = vpop.permute.xlu1 %1068 }
 0x3fe   : > { %v1072_v34 = vpop.permute.xlu0 %1071  ;;  %v1094_v37 = vrot.slane %v1069_v31, %v5272_v25 }
 0x3ff   : > { %v1098_v36 = vrot.slane %v1072_v34, %v5272_v25 }
 0x401   : > { %v1075_v32 = vpop.permute.xlu1 %1074  ;;  %v1123_v42 = vsel %vm975_vm1, %v1098_v36, %v1094_v37 }
 0x402   : > { %v1102_v38 = vrot.slane %v1075_v32, %v5272_v25 }
 0x404   : > { %v1124_v44 = vsel %vm977_vm2, %v1102_v38, %v1123_v42 }
 0x405   : > { %v1078_v33 = vpop.permute.xlu1 %1077 }
 0x406   : > { %v1106_v39 = vrot.slane %v1078_v33, %v5272_v25 }
 0x408   : > { %v1125_v46 = vsel %vm979_vm3, %v1106_v39, %v1124_v44 }
 0x409   : > { %v1081_v17 = vpop.permute.xlu1 %1080 }
 0x40a   : > { %v1110_v40 = vrot.slane %v1081_v17, %v5272_v25 }
 0x40c   : > { %v1126_v47 = vsel %vm981_vm4, %v1110_v40, %v1125_v46  ;;  %v3984_v46 = vld [vmem:[#allocation13 + $0xc4] ss:$16 sps:$4 sm:$0xff]  }
 0x40d   : > { %v1084_v35 = vpop.permute.xlu1 %1083 }
 0x40e   : > { %v1114_v43 = vrot.slane %v1084_v35, %v5272_v25 }
 0x410   : > { %v1127_v53 = vsel %vm983_vm5, %v1114_v43, %v1126_v47  ;;  %v3978_v43 = vld [vmem:[#allocation13 + $0xa4] ss:$16 sps:$4 sm:$0xff]  }
 0x411   : > { %v1087_v41 = vpop.permute.xlu1 %1086 }
 0x412   : > { %v1118_v45 = vrot.slane %v1087_v41, %v5272_v25 }
 0x414   : > { %v1128_v55 = vsel %vm985_vm6, %v1118_v45, %v1127_v53  ;;  %v3983_v45 = vld [vmem:[#allocation13 + $0xa0] ss:$16 sps:$4 sm:$0xff]  }
 0x415   : > { %v1090_v48 = vpop.permute.xlu1 %1089 }
 0x416   : > { %v1122_v54 = vrot.slane %v1090_v48, %v5272_v25  ;;  %v3960_v25 = vld [vmem:[#allocation13 + $0x44] ss:$16 sps:$4 sm:$0xff]   ;;  %v3989_v48 = vld [vmem:[#allocation13 + $0xc0] ss:$16 sps:$4 sm:$0xff]  }
 0x417   : > { %2198 = vmatprep.subr.bf16.mxu1 %v3960_v25  ;;  %v4007_v25 = vld [vmem:[#allocation13 + $0x120] ss:$16 sps:$4 sm:$0xff]  }
 0x418   : > { %v1129_v56 = vsel %vm987_vm7, %v1122_v54, %v1128_v55  ;;  %2199 = vmatpush1.bf16.msra.mxu1 %v3965_v7  ;;  %v3992_v55 = vld [vmem:[#allocation13 + $0xe8] ss:$16 sps:$4 sm:$0xff]  }
 0x419   : > { %v1131_v58 = vsel %vm990_vm8, %v1129_v56, 0.0  ;;  %2200 = vmatprep.subr.bf16.mxu1 %v3966_v9  ;;  %v3995_v56 = vld [vmem:[#allocation13 + $0xe0] ss:$16 sps:$4 sm:$0xff]   ;;  %v4010_v7 = vld [vmem:[#allocation13 + $0x148] ss:$16 sps:$4 sm:$0xff]  }
 0x41a   : > { %1132 = vadd.xlane.f32.xlu1 %v1131_v58  ;;  %v3996_v58 = vld [vmem:[#allocation13 + $0x104] ss:$16 sps:$4 sm:$0xff]   ;;  %v4013_v9 = vld [vmem:[#allocation13 + $0x140] ss:$16 sps:$4 sm:$0xff]  }
 0x41c   : > { %2201 = vmatpush1.bf16.msra.mxu1 %v3971_v15  ;;  %v4019_v15 = vld [vmem:[#allocation13 + $0x160] ss:$16 sps:$4 sm:$0xff]  }
 0x41d   : > { %2202 = vmatprep.subr.bf16.mxu1 %v3972_v16  ;;  %v4020_v16 = vld [vmem:[#allocation13 + $0x184] ss:$16 sps:$4 sm:$0xff]  }
 0x420   : > { %2203 = vmatpush1.bf16.msra.mxu1 %v3977_v22  ;;  %v4026_v22 = vld [vmem:[#allocation13 + $0x1a4] ss:$16 sps:$4 sm:$0xff]  }
 0x421   : > { %2204 = vmatprep.subr.bf16.mxu1 %v3978_v43 }
 0x424   : > { %2205 = vmatpush1.bf16.msra.mxu1 %v3983_v45 }
 0x425   : > { %2206 = vmatprep.subr.bf16.mxu1 %v3984_v46 }
 0x428   : > { %2207 = vmatpush1.bf16.msra.mxu1 %v3989_v48 }
 0x429   : > { %2208 = vmatprep.subr.bf16.mxu1 %v3990_v19 }
 0x42c   : > { %2209 = vmatpush1.bf16.msra.mxu1 %v3995_v56 }
 0x42d   : > { %2210 = vmatprep.subr.bf16.mxu1 %v3996_v58 }
 0x430   : > { %2211 = vmatpush1.bf16.msra.mxu1 %v4001_v62  ;;  %v1195_v62 = vld [vmem:[%s5614_s8 + $0x20] sm:$0xff] }
 0x431   : > { %2212 = vmatprep.subr.bf16.mxu1 %v4002_v63 }
 0x434   : > { %2213 = vmatpush1.bf16.msra.mxu1 %v4007_v25 }
 0x435   : > { %2214 = vmatprep.subr.bf16.mxu1 %v4008_v5 }
 0x438   : > { %2215 = vmatpush1.bf16.msra.mxu1 %v4013_v9  ;;  %v1207_v9 = vunpack.c.l.bf16 %v1195_v62 }
 0x4a7   : > { %v1133_v24 = vpop.xlane.xlu1 %1132 }
 0x4a8   : > { %v1138_v31 = vrot.slane %v1133_v24, %v5248_v26  ;;  %v1142_v32 = vrot.slane %v1133_v24, %v5293_v50  ;;  %v1146_v33 = vrot.slane %v1133_v24, %v5296_v51  ;;  %v1150_v17 = vrot.slane %v1133_v24, %v5299_v52 }
 0x4a9   : > { %v1154_v35 = vrot.slane %v1133_v24, %v1013_v57  ;;  %v1158_v38 = vrot.slane %v1133_v24, %v1017_v0  ;;  %v1162_v41 = vrot.slane %v1133_v24, %v1021_v4  ;;  %v3982_v57 = vld [vmem:[#allocation13 + $0xac] ss:$16 sps:$4 sm:$0xff]   ;;  %v1166_v0 = vrot.slane %v1133_v24, %v1025_v8 }
 0x4aa   : > { %4316 = vrcp.f32 %v1138_v31  ;;  %2286 = vmatprep.subr.bf16.mxu0 %v3982_v57  ;;  %v3988_v4 = vld [vmem:[#allocation13 + $0xcc] ss:$16 sps:$4 sm:$0xff]   ;;  %v4028_v31 = vld [vmem:[#allocation13 + $0x1a8] ss:$16 sps:$4 sm:$0xff]  }
 0x4ab   : > { %4318 = vrcp.f32 %v1142_v32  ;;  %v3994_v8 = vld [vmem:[#allocation13 + $0xec] ss:$16 sps:$4 sm:$0xff]   ;;  %v4031_v32 = vld [vmem:[#allocation13 + $0x1a0] ss:$16 sps:$4 sm:$0xff]   ;;  %v1192_v57 = vld [vmem:[%s5614_s8 + $0x8] sm:$0xff] }
 0x4ac   : > { %4320 = vrcp.f32 %v1146_v33  ;;  %v4030_v24 = vld [vmem:[#allocation13 + $0x1ac] ss:$16 sps:$4 sm:$0xff]   ;;  %v4032_v33 = vld [vmem:[#allocation13 + $0x1c4] ss:$16 sps:$4 sm:$0xff]  }
 0x4ad   : > { %4322 = vrcp.f32 %v1150_v17  ;;  %v4036_v17 = vld [vmem:[#allocation13 + $0x1cc] ss:$16 sps:$4 sm:$0xff]  }
 0x4ae   : > { %4324 = vrcp.f32 %v1154_v35  ;;  %v4037_v35 = vld [vmem:[#allocation13 + $0x1c0] ss:$16 sps:$4 sm:$0xff]  }
 0x4af   : > { %4326 = vrcp.f32 %v1158_v38  ;;  %v4043_v38 = vld [vmem:[#allocation13 + $0x1e0] ss:$16 sps:$4 sm:$0xff]  }
 0x4b0   : > { %4328 = vrcp.f32 %v1162_v41  ;;  %v4049_v41 = vld [vmem:[#allocation13 + $0x20c] ss:$16 sps:$4 sm:$0xff]  }
 0x4b1   : > { %4330 = vrcp.f32 %v1166_v0  ;;  %v1202_v0 = vunpack.c.h.bf16 %v1192_v57 }
 0x4b4   : > { %v4317_v34 = vpop.eup %4316 }
 0x4b5   : > { %v1176_v36 = vmul.f32 %v4317_v34, %v5315_v12  ;;  %v4319_v37 = vpop.eup %4318  ;;  %v3980_v12 = vld [vmem:[#allocation13 + $0xa8] ss:$16 sps:$4 sm:$0xff]  }
 0x4b6   : > { %v1178_v39 = vmul.f32 %v4319_v37, %v5317_v13  ;;  %v4321_v40 = vpop.eup %4320  ;;  %2287 = vmatpush1.bf16.msra.mxu0 %v3980_v12  ;;  %v4034_v34 = vld [vmem:[#allocation13 + $0x1c8] ss:$16 sps:$4 sm:$0xff]   ;;  %v4042_v37 = vld [vmem:[#allocation13 + $0x1ec] ss:$16 sps:$4 sm:$0xff]  }
 0x4b7   : > { %1217 = vperm.xlu0 %3939, %v1176_v36   ;;  %v1180_v42 = vmul.f32 %v4321_v40, %v5323_v20  ;;  %v4323_v44 = vpop.eup %4322  ;;  %v3986_v20 = vld [vmem:[#allocation13 + $0xc8] ss:$16 sps:$4 sm:$0xff]   ;;  %2288 = vmatprep.subr.bf16.mxu0 %v3988_v4  ;;  %v4038_v36 = vld [vmem:[#allocation13 + $0x1e4] ss:$16 sps:$4 sm:$0xff]   ;;  %v1193_v4 = vld [vmem:[%s5614_s8 + $0x10] sm:$0xff] }
 0x4b8   : > { %v1182_v13 = vmul.f32 %v4323_v44, %v5326_v23  ;;  %v4325_v47 = vpop.eup %4324  ;;  %v4046_v40 = vld [vmem:[#allocation13 + $0x204] ss:$16 sps:$4 sm:$0xff]   ;;  %v1203_v19 = vunpack.c.l.bf16 %v1193_v4 }
 0x4b9   : > { %v1184_v53 = vmul.f32 %v4325_v47, %v5329_v27  ;;  %v4327_v54 = vpop.eup %4326  ;;  %v1201_v47 = vunpack.c.l.bf16 %v1192_v57 }
 0x4ba   : > { %2289 = vmatpush1.bf16.msra.mxu0 %v3986_v20  ;;  %v1186_v23 = vmul.f32 %v4327_v54, %v5332_v28  ;;  %v4329_v60 = vpop.eup %4328 }
 0x4bb   : > { %1222 = vperm.xlu0 %3939, %v1178_v39   ;;  %2290 = vmatprep.subr.bf16.mxu0 %v3994_v8  ;;  %v1188_v27 = vmul.f32 %v4329_v60, %v5335_v29  ;;  %v4331_v2 = vpop.eup %4330  ;;  %v4014_v29 = vld [vmem:[#allocation13 + $0x164] ss:$16 sps:$4 sm:$0xff]   ;;  %v4040_v39 = vld [vmem:[#allocation13 + $0x1e8] ss:$16 sps:$4 sm:$0xff]   ;;  %v1204_v8 = vunpack.c.h.bf16 %v1193_v4 }
 0x4bc   : > { %v1190_v28 = vmul.f32 %v4331_v2, %v5338_v30  ;;  %2216 = vmatprep.subr.bf16.mxu1 %v4014_v29  ;;  %v4024_v30 = vld [vmem:[#allocation13 + $0x18c] ss:$16 sps:$4 sm:$0xff]   ;;  %v1208_v29 = vunpack.c.h.bf16 %v1195_v62 }
 0x4bd   : > { %2217 = vmatpush1.bf16.msra.mxu1 %v4019_v15 }
 0x4be   : > { %2291 = vmatpush1.bf16.msra.mxu0 %v3992_v55  ;;  %2218 = vmatprep.subr.bf16.mxu1 %v4020_v16 }
 0x4bf   : > { %1227 = vperm.xlu0 %3939, %v1180_v42   ;;  %2292 = vmatprep.subr.bf16.mxu0 %v4000_v59  ;;  %v1191_v42 = vld [vmem:[%s5614_s8] sm:$0xff] }
 0x4c0   : > { %v1200_v43 = vunpack.c.h.bf16 %v1191_v42  ;;  %v1199_v44 = vunpack.c.l.bf16 %v1191_v42 }
 0x4c1   : > { %2219 = vmatpush1.bf16.msra.mxu1 %v4025_v21 }
 0x4c2   : > { %2293 = vmatpush1.bf16.msra.mxu0 %v3998_v61  ;;  %2220 = vmatprep.subr.bf16.mxu1 %v4026_v22 }
 0x4c3   : > { %1232 = vperm.xlu0 %3939, %v1182_v13   ;;  %2294 = vmatprep.subr.bf16.mxu0 %v4006_v1 }
 0x4c5   : > { %2221 = vmatpush1.bf16.msra.mxu1 %v4031_v32 }
 0x4c6   : > { %2295 = vmatpush1.bf16.msra.mxu0 %v4004_v3  ;;  %2222 = vmatprep.subr.bf16.mxu1 %v4032_v33  ;;  %v1196_v3 = vld [vmem:[%s5614_s8 + $0x28] sm:$0xff] }
 0x4c7   : > { %1237 = vperm.xlu0 %3939, %v1184_v53   ;;  %2296 = vmatprep.subr.bf16.mxu0 %v4012_v6  ;;  %v1209_v16 = vunpack.c.l.bf16 %v1196_v3 }
 0x4c9   : > { %2223 = vmatpush1.bf16.msra.mxu1 %v4037_v35 }
 0x4ca   : > { %2297 = vmatpush1.bf16.msra.mxu0 %v4010_v7  ;;  %2224 = vmatprep.subr.bf16.mxu1 %v4038_v36 }
 0x4cb   : > { %1242 = vperm.xlu0 %3939, %v1186_v23   ;;  %2298 = vmatprep.subr.bf16.mxu0 %v4018_v10  ;;  %v1194_v23 = vld [vmem:[%s5614_s8 + $0x18] sm:$0xff]  ;;  %v1197_v10 = vld [vmem:[%s5614_s8 + $0x30] sm:$0xff] }
 0x4cc   : > { %v1205_v1 = vunpack.c.l.bf16 %v1194_v23  ;;  %v1206_v2 = vunpack.c.h.bf16 %v1194_v23  ;;  %v1211_v33 = vunpack.c.l.bf16 %v1197_v10 }
 0x4cd   : > { %2225 = vmatpush1.bf16.msra.mxu1 %v4043_v38 }
 0x4ce   : > { %2299 = vmatpush1.bf16.msra.mxu0 %v4016_v11  ;;  %2235 = vmatprep.subr.bf16.mxu1 %v4046_v40 }
 0x4cf   : > { %1247 = vperm.xlu0 %3939, %v1188_v27   ;;  %2300 = vmatprep.subr.bf16.mxu0 %v4024_v30  ;;  %v1210_v30 = vunpack.c.h.bf16 %v1196_v3 }
 0x4d2   : > { %2301 = vmatpush1.bf16.msra.mxu0 %v4022_v18 }
 0x4d3   : > { %1252 = vperm.xlu0 %3939, %v1190_v28   ;;  %2302 = vmatprep.subr.bf16.mxu0 %v4030_v24 }
 0x4d6   : > { %2303 = vmatpush1.bf16.msra.mxu0 %v4028_v31 }
 0x4d7   : > { %2304 = vmatprep.subr.bf16.mxu0 %v4036_v17  ;;  %v1212_v17 = vunpack.c.h.bf16 %v1197_v10 }
 0x4da   : > { %2305 = vmatpush1.bf16.msra.mxu0 %v4034_v34  ;;  %v5401_v34 = vld [vmem:[%s5614_s8 + $0x38] sm:$0xff] }
 0x4db   : > { %2306 = vmatprep.subr.bf16.mxu0 %v4042_v37 }
 0x4de   : > { %2307 = vmatpush1.bf16.msra.mxu0 %v4040_v39 }
 0x4df   : > { %2317 = vmatprep.subr.bf16.mxu0 %v4049_v41 }
 0x536   : > { %v1218_v12 = vpop.permute.xlu0 %1217 }
 0x537   : > { %v1256_v45 = vmul.f32 %v1218_v12, %v1200_v43  ;;  %v1255_v13 = vmul.f32 %v1218_v12, %v1199_v44 }
 0x539   : > { %v1277_v46 = vrot.slane %v1256_v45, 4  ;;  %v1271_v54 = vrot.slane %v1255_v13, 4 }
 0x53a   : > { %v1223_v20 = vpop.permute.xlu0 %1222 }
 0x53b   : > { %v1278_v48 = vadd.f32 %v1277_v46, %v1256_v45  ;;  %v1258_v53 = vmul.f32 %v1223_v20, %v1202_v0  ;;  %v1257_v58 = vmul.f32 %v1223_v20, %v1201_v47  ;;  %v1272_v25 = vadd.f32 %v1271_v54, %v1255_v13 }
 0x53c   : > { %v1213_v45 = vunpack.c.l.bf16 %v5401_v34 }
 0x53d   : > { %v1279_v55 = vrot.slane %v1278_v48, 2  ;;  %v1289_v56 = vrot.slane %v1258_v53, 4  ;;  %v1283_v5 = vrot.slane %v1257_v58, 4  ;;  %v1273_v31 = vrot.slane %v1272_v25, 2 }
 0x53e   : > { %v1228_v59 = vpop.permute.xlu0 %1227 }
 0x53f   : > { %v1280_v60 = vadd.f32 %v1279_v55, %v1278_v48  ;;  %v1290_v61 = vadd.f32 %v1289_v56, %v1258_v53  ;;  %v1259_v27 = vmul.f32 %v1228_v59, %v1203_v19  ;;  %v1260_v63 = vmul.f32 %v1228_v59, %v1204_v8 }
 0x540   : > { %v1284_v35 = vadd.f32 %v1283_v5, %v1257_v58  ;;  %v5405_v47 = vadd.f32 %v1273_v31, %v1272_v25 }
 0x541   : > { %v1291_v28 = vrot.slane %v1290_v61, 2  ;;  %v1301_v6 = vrot.slane %v1260_v63, 4  ;;  %v1281_v11 = vrot.slane %v1280_v60, 1  ;;  %v1295_v18 = vrot.slane %v1259_v27, 4 }
 0x542   : > { %v1233_v7 = vpop.permute.xlu0 %1232  ;;  %v1285_v20 = vrot.slane %v1284_v35, 2 }
 0x543   : > { %v1292_v15 = vadd.f32 %v1291_v28, %v1290_v61  ;;  %v1302_v21 = vadd.f32 %v1301_v6, %v1260_v63  ;;  %v1261_v22 = vmul.f32 %v1233_v7, %v1205_v1  ;;  %v1262_v24 = vmul.f32 %v1233_v7, %v1206_v2 }
 0x544   : > { %v1282_v40 = vadd.f32 %v1281_v11, %v1280_v60  ;;  %v1296_v57 = vadd.f32 %v1295_v18, %v1259_v27  ;;  %v1214_v60 = vunpack.c.h.bf16 %v5401_v34  ;;  %v1275_v1 = vrot.slane %v5405_v47, 1 }
 0x545   : > { %v1293_v32 = vrot.slane %v1292_v15, 1  ;;  %v1303_v36 = vrot.slane %v1302_v21, 2  ;;  %v1307_v37 = vrot.slane %v1261_v22, 4  ;;  %v1313_v38 = vrot.slane %v1262_v24, 4 }
 0x546   : > { %v1238_v39 = vpop.permute.xlu0 %1237  ;;  %v1297_v23 = vrot.slane %v1296_v57, 2  ;;  %v1286_v2 = vadd.f32 %v1285_v20, %v1284_v35 }
 0x547   : > { %v1294_v41 = vadd.f32 %v1293_v32, %v1292_v15  ;;  %v1263_v42 = vmul.f32 %v1238_v39, %v1207_v9  ;;  %v1264_v43 = vmul.f32 %v1238_v39, %v1208_v29  ;;  %v1304_v44 = vadd.f32 %v1303_v36, %v1302_v21 }
 0x548   : > { %v1314_v12 = vadd.f32 %v1313_v38, %v1262_v24  ;;  %v1308_v13 = vadd.f32 %v1307_v37, %v1261_v22  ;;  %v1298_v29 = vadd.f32 %v1297_v23, %v1296_v57  ;;  %v1287_v22 = vrot.slane %v1286_v2, 1 }
 0x549   : > { %v1391_v0 = vsel %vm975_vm1, %v1294_v41, %v1282_v40  ;;  %v1319_v46 = vrot.slane %v1263_v42, 4  ;;  %v1325_v4 = vrot.slane %v1264_v43, 4  ;;  %v1305_v48 = vrot.slane %v1304_v44, 1 }
 0x54a   : > { %v1315_v53 = vrot.slane %v1314_v12, 2  ;;  %v1243_v19 = vpop.permute.xlu0 %1242  ;;  %v1309_v61 = vrot.slane %v1308_v13, 2 }
 0x54b   : > { %v1320_v8 = vadd.f32 %v1319_v46, %v1263_v42  ;;  %v1326_v54 = vadd.f32 %v1325_v4, %v1264_v43  ;;  %v1265_v55 = vmul.f32 %v1243_v19, %v1209_v16  ;;  %v1266_v56 = vmul.f32 %v1243_v19, %v1210_v30 }
 0x54c   : > { %v1306_v58 = vadd.f32 %v1305_v48, %v1304_v44  ;;  %v1316_v59 = vadd.f32 %v1315_v53, %v1314_v12  ;;  %v1310_v16 = vadd.f32 %v1309_v61, %v1308_v13  ;;  %v1288_v46 = vadd.f32 %v1287_v22, %v1286_v2 }
 0x54d   : > { %v1327_v62 = vrot.slane %v1326_v54, 2  ;;  %v1331_v27 = vrot.slane %v1265_v55, 4  ;;  %v1337_v63 = vrot.slane %v1266_v56, 4  ;;  %v1321_v5 = vrot.slane %v1320_v8, 2 }
 0x54e   : > { %v1392_v3 = vsel %vm977_vm2, %v1306_v58, %v1391_v0  ;;  %v1317_v25 = vrot.slane %v1316_v59, 1  ;;  %v1248_v28 = vpop.permute.xlu0 %1247 }
 0x54f   : > { %v1328_v6 = vadd.f32 %v1327_v62, %v1326_v54  ;;  %v1332_v7 = vadd.f32 %v1331_v27, %v1265_v55  ;;  %v1338_v9 = vadd.f32 %v1337_v63, %v1266_v56  ;;  %v1267_v11 = vmul.f32 %v1248_v28, %v1211_v33 }
 0x550   : > { %v1318_v10 = vadd.f32 %v1317_v25, %v1316_v59  ;;  %v1268_v15 = vmul.f32 %v1248_v28, %v1212_v17  ;;  %v1322_v35 = vadd.f32 %v1321_v5, %v1320_v8  ;;  %v1299_v33 = vrot.slane %v1298_v29, 1 }
 0x551   : > { %v1329_v30 = vrot.slane %v1328_v6, 1  ;;  %v1333_v18 = vrot.slane %v1332_v7, 2  ;;  %v1339_v21 = vrot.slane %v1338_v9, 2  ;;  %v1343_v31 = vrot.slane %v1267_v11, 4 }
 0x552   : > { %v1393_v24 = vsel %vm979_vm3, %v1318_v10, %v1392_v3  ;;  %v1349_v32 = vrot.slane %v1268_v15, 4  ;;  %v1253_v34 = vpop.permute.xlu0 %1252  ;;  %v1311_v17 = vrot.slane %v1310_v16, 1  ;;  %v1323_v4 = vrot.slane %v1322_v35, 1 }
 0x553   : > { %v1330_v36 = vadd.f32 %v1329_v30, %v1328_v6  ;;  %v1334_v37 = vadd.f32 %v1333_v18, %v1332_v7  ;;  %v1340_v38 = vadd.f32 %v1339_v21, %v1338_v9  ;;  %v1344_v39 = vadd.f32 %v1343_v31, %v1267_v11  ;;  %v669_v21 = vld [vmem:[#allocation2] sm:$0xff] }
 0x554   : > { %v1350_v40 = vadd.f32 %v1349_v32, %v1268_v15  ;;  %v1269_v41 = vmul.f32 %v1253_v34, %v1213_v45  ;;  %v1270_v42 = vmul.f32 %v1253_v34, %v1214_v60  ;;  %v1276_v45 = vadd.f32 %v1275_v1, %v5405_v47  ;;  %v4044_v31 = vld [vmem:[#allocation13 + $0x200] ss:$16 sps:$4 sm:$0xff]   ;;  %v4047_v32 = vld [vmem:[#allocation13 + $0x208] ss:$16 sps:$4 sm:$0xff]   ;;  %v4052_v34 = vld [vmem:[#allocation13 + $0x224] ss:$16 sps:$4 sm:$0xff]  }
 0x555   : > { %v1394_v43 = vsel %vm981_vm4, %v1330_v36, %v1393_v24  ;;  %v1341_v57 = vrot.slane %v1340_v38, 1  ;;  %v1345_v44 = vrot.slane %v1344_v39, 2  ;;  %v1335_v20 = vrot.slane %v1334_v37, 1 }
 0x556   : > { %v1351_v12 = vrot.slane %v1350_v40, 2  ;;  %v1355_v0 = vrot.slane %v1269_v41, 4  ;;  %v1361_v13 = vrot.slane %v1270_v42, 4  ;;  %v1300_v55 = vadd.f32 %v1299_v33, %v1298_v29  ;;  %v1367_v29 = vld [vmem:[%s5211_s15] sm:$0xff] }
 0x557   : > { %v1342_v48 = vadd.f32 %v1341_v57, %v1340_v38  ;;  %v1346_v53 = vadd.f32 %v1345_v44, %v1344_v39  ;;  %v1312_v56 = vadd.f32 %v1311_v17, %v1310_v16  ;;  %v1384_v62 = vsel %vm975_vm1, %v1288_v46, %v1276_v45  ;;  %v4053_v38 = vld [vmem:[#allocation13 + $0x228] ss:$16 sps:$4 sm:$0xff]   ;;  %v4058_v39 = vld [vmem:[#allocation13 + $0x244] ss:$16 sps:$4 sm:$0xff]   ;;  %v4067_v17 = vld [vmem:[#allocation13 + $0x26c] ss:$16 sps:$4 sm:$0xff]  }
 0x558   : > { %v1352_v19 = vadd.f32 %v1351_v12, %v1350_v40  ;;  %v1356_v8 = vadd.f32 %v1355_v0, %v1269_v41  ;;  %v1362_v54 = vadd.f32 %v1361_v13, %v1270_v42  ;;  %v1324_v27 = vadd.f32 %v1323_v4, %v1322_v35  ;;  %v4055_v35 = vld [vmem:[#allocation13 + $0x22c] ss:$16 sps:$4 sm:$0xff]   ;;  %v4056_v41 = vld [vmem:[#allocation13 + $0x240] ss:$16 sps:$4 sm:$0xff]   ;;  %v4059_v42 = vld [vmem:[#allocation13 + $0x248] ss:$16 sps:$4 sm:$0xff]  }
 0x559   : > { %v1395_v23 = vsel %vm983_vm5, %v1342_v48, %v1394_v43  ;;  %v1347_v58 = vrot.slane %v1346_v53, 1  ;;  %v1336_v63 = vadd.f32 %v1335_v20, %v1334_v37  ;;  %v1385_v28 = vsel %vm977_vm2, %v1300_v55, %v1384_v62  ;;  %v4050_v37 = vld [vmem:[#allocation13 + $0x220] ss:$16 sps:$4 sm:$0xff]   ;;  %v4061_v40 = vld [vmem:[#allocation13 + $0x24c] ss:$16 sps:$4 sm:$0xff]  }
 0x55a   : > { %v1353_v59 = vrot.slane %v1352_v19, 1  ;;  %v1357_v60 = vrot.slane %v1356_v8, 2  ;;  %v1363_v61 = vrot.slane %v1362_v54, 2  ;;  %v1386_v6 = vsel %vm979_vm3, %v1312_v56, %v1385_v28  ;;  %v4064_v33 = vld [vmem:[#allocation13 + $0x264] ss:$16 sps:$4 sm:$0xff]  }
 0x55b   : > { %v1348_v5 = vadd.f32 %v1347_v58, %v1346_v53  ;;  %v1387_v9 = vsel %vm981_vm4, %v1324_v27, %v1386_v6  ;;  %v1400_v18 = vpack.c.bf16 %v1367_v29, %v1367_v29  ;;  %v1403_v36 = vpack.c.bf16 %v669_v21, %v669_v21  ;;  %v4062_v43 = vld [vmem:[#allocation13 + $0x260] ss:$16 sps:$4 sm:$0xff]   ;;  %v4065_v57 = vld [vmem:[#allocation13 + $0x268] ss:$16 sps:$4 sm:$0xff]   ;;  %v4070_v44 = vld [vmem:[#allocation13 + $0x284] ss:$16 sps:$4 sm:$0xff]  }
 0x55c   : > { %v1354_v2 = vadd.f32 %v1353_v59, %v1352_v19  ;;  %v1358_v3 = vadd.f32 %v1357_v60, %v1356_v8  ;;  %v1364_v25 = vadd.f32 %v1363_v61, %v1362_v54  ;;  %v1388_v15 = vsel %vm983_vm5, %v1336_v63, %v1387_v9  ;;  %v4073_v12 = vld [vmem:[#allocation13 + $0x28c] ss:$16 sps:$4 sm:$0xff]   ;;  %v4068_v0 = vld [vmem:[#allocation13 + $0x280] ss:$16 sps:$4 sm:$0xff]   ;;  %v4071_v13 = vld [vmem:[#allocation13 + $0x288] ss:$16 sps:$4 sm:$0xff]  }
 0x55d   : > { %v1389_v16 = vsel %vm985_vm6, %v1348_v5, %v1388_v15  ;;  %v4076_v46 = vld [vmem:[#allocation13 + $0x2a4] ss:$16 sps:$4 sm:$0xff]   ;;  %v4079_v4 = vld [vmem:[#allocation13 + $0x2ac] ss:$16 sps:$4 sm:$0xff]   ;;  %v4074_v20 = vld [vmem:[#allocation13 + $0x2a0] ss:$16 sps:$4 sm:$0xff]  }
 0x55e   : > { %v1359_v47 = vrot.slane %v1358_v3, 1  ;;  %v1365_v1 = vrot.slane %v1364_v25, 1  ;;  %v1396_v7 = vsel %vm985_vm6, %v1354_v2, %v1395_v23  ;;  %v4077_v48 = vld [vmem:[#allocation13 + $0x2a8] ss:$16 sps:$4 sm:$0xff]   ;;  %v4082_v53 = vld [vmem:[#allocation13 + $0x2c4] ss:$16 sps:$4 sm:$0xff]  }
 0x55f   : > { %v4085_v19 = vld [vmem:[#allocation13 + $0x2cc] ss:$16 sps:$4 sm:$0xff]   ;;  %v4080_v8 = vld [vmem:[#allocation13 + $0x2c0] ss:$16 sps:$4 sm:$0xff]   ;;  %v4083_v54 = vld [vmem:[#allocation13 + $0x2c8] ss:$16 sps:$4 sm:$0xff]  }
 0x560   : > { %v1366_v10 = vadd.f32 %v1365_v1, %v1364_v25  ;;  %v1360_v11 = vadd.f32 %v1359_v47, %v1358_v3  ;;  %v4088_v45 = vld [vmem:[#allocation13 + $0x2e4] ss:$16 sps:$4 sm:$0xff]   ;;  %v4091_v55 = vld [vmem:[#allocation13 + $0x2ec] ss:$16 sps:$4 sm:$0xff]   ;;  %v4086_v56 = vld [vmem:[#allocation13 + $0x2e0] ss:$16 sps:$4 sm:$0xff]  }
 0x561   : > { %v4089_v23 = vld [vmem:[#allocation13 + $0x2e8] ss:$16 sps:$4 sm:$0xff]   ;;  %v4094_v58 = vld [vmem:[#allocation13 + $0x304] ss:$16 sps:$4 sm:$0xff]   ;;  %v4097_v59 = vld [vmem:[#allocation13 + $0x30c] ss:$16 sps:$4 sm:$0xff]  }
 0x562   : > { %v1390_v30 = vsel %vm987_vm7, %v1360_v11, %v1389_v16  ;;  %v5424_v22 = vsel %vm987_vm7, %v1366_v10, %v1396_v7  ;;  %v4092_v60 = vld [vmem:[#allocation13 + $0x300] ss:$16 sps:$4 sm:$0xff]   ;;  %v4095_v61 = vld [vmem:[#allocation13 + $0x308] ss:$16 sps:$4 sm:$0xff]   ;;  %v4100_v62 = vld [vmem:[#allocation13 + $0x324] ss:$16 sps:$4 sm:$0xff]  }
 0x563   : > { %v1401_v24 = vpack.c.bf16 %v1390_v30, %v1390_v30  ;;  %v4103_v27 = vld [vmem:[#allocation13 + $0x32c] ss:$16 sps:$4 sm:$0xff]   ;;  %v4098_v63 = vld [vmem:[#allocation13 + $0x320] ss:$16 sps:$4 sm:$0xff]   ;;  %v4101_v2 = vld [vmem:[#allocation13 + $0x328] ss:$16 sps:$4 sm:$0xff]  }
 0x564   : > { %v4106_v3 = vld [vmem:[#allocation13 + $0x344] ss:$16 sps:$4 sm:$0xff]   ;;  %v4109_v25 = vld [vmem:[#allocation13 + $0x34c] ss:$16 sps:$4 sm:$0xff]   ;;  %v4104_v28 = vld [vmem:[#allocation13 + $0x340] ss:$16 sps:$4 sm:$0xff]  }
 0x565   : > { %2226 = vmatprep.mubr.bf16.mxu1 %v1401_v24  ;;  %2308 = vmatprep.mubr.bf16.mxu0 %v1401_v24  ;;  %v4107_v5 = vld [vmem:[#allocation13 + $0x348] ss:$16 sps:$4 sm:$0xff]   ;;  %v4112_v47 = vld [vmem:[#allocation13 + $0x364] ss:$16 sps:$4 sm:$0xff]   ;;  %v4115_v1 = vld [vmem:[#allocation13 + $0x36c] ss:$16 sps:$4 sm:$0xff]  }
 0x566   : > { %2227 = vmatmul.mubr.bf16.vlgmr.msra.gmra.mrb[0].mxu1 %v1400_v18  ;;  %2309 = vmatmul.mubr.bf16.vlgmr.msra.gmra.mrb[4].mxu0 %v1400_v18  ;;  %v4110_v6 = vld [vmem:[#allocation13 + $0x360] ss:$16 sps:$4 sm:$0xff]   ;;  %v4113_v7 = vld [vmem:[#allocation13 + $0x368] ss:$16 sps:$4 sm:$0xff]   ;;  %v4118_v9 = vld [vmem:[#allocation13 + $0x384] ss:$16 sps:$4 sm:$0xff]  }
 0x567   : > { %2236 = vmatpush1.bf16.msra.mxu1 %v4044_v31  ;;  %2318 = vmatpush1.bf16.msra.mxu0 %v4047_v32  ;;  %v4121_v29 = vld [vmem:[#allocation13 + $0x38c] ss:$16 sps:$4 sm:$0xff]   ;;  %v4116_v10 = vld [vmem:[#allocation13 + $0x380] ss:$16 sps:$4 sm:$0xff]   ;;  %v4119_v11 = vld [vmem:[#allocation13 + $0x388] ss:$16 sps:$4 sm:$0xff]  }
 0x568   : > { %2237 = vmatprep.subr.bf16.mxu1 %v4052_v34  ;;  %2319 = vmatprep.subr.bf16.mxu0 %v4055_v35  ;;  %v4124_v15 = vld [vmem:[#allocation13 + $0x3a4] ss:$16 sps:$4 sm:$0xff]   ;;  %v4127_v16 = vld [vmem:[#allocation13 + $0x3ac] ss:$16 sps:$4 sm:$0xff]   ;;  %v4122_v30 = vld [vmem:[#allocation13 + $0x3a0] ss:$16 sps:$4 sm:$0xff]  }
 0x569   : > { %2267 = vmatprep.mubr.bf16.mxu1 %v1403_v36  ;;  %2349 = vmatprep.mubr.bf16.mxu0 %v1403_v36  ;;  %v4125_v18 = vld [vmem:[#allocation13 + $0x3a8] ss:$16 sps:$4 sm:$0xff]   ;;  %v4130_v21 = vld [vmem:[#allocation13 + $0x3c4] ss:$16 sps:$4 sm:$0xff]   ;;  %v4133_v24 = vld [vmem:[#allocation13 + $0x3cc] ss:$16 sps:$4 sm:$0xff]  }
 0x56a   : > { %v4128_v31 = vld [vmem:[#allocation13 + $0x3c0] ss:$16 sps:$4 sm:$0xff]   ;;  %v4131_v32 = vld [vmem:[#allocation13 + $0x3c8] ss:$16 sps:$4 sm:$0xff]   ;;  %v4136_v34 = vld [vmem:[#allocation13 + $0x3e4] ss:$16 sps:$4 sm:$0xff]  }
 0x56b   : > { %2238 = vmatpush1.bf16.msra.mxu1 %v4050_v37  ;;  %2320 = vmatpush1.bf16.msra.mxu0 %v4053_v38  ;;  %v4139_v35 = vld [vmem:[#allocation13 + $0x3ec] ss:$16 sps:$4 sm:$0xff]   ;;  %v4134_v36 = vld [vmem:[#allocation13 + $0x3e0] ss:$16 sps:$4 sm:$0xff]   ;;  %v4137_v37 = vld [vmem:[#allocation13 + $0x3e8] ss:$16 sps:$4 sm:$0xff]  }
 0x56c   : > { %2239 = vmatprep.subr.bf16.mxu1 %v4058_v39  ;;  %2321 = vmatprep.subr.bf16.mxu0 %v4061_v40  ;;  %v4142_v38 = vld [vmem:[#allocation14 + $0x4] ss:$16 sps:$4 sm:$0xff]   ;;  %v4145_v39 = vld [vmem:[#allocation14 + $0xc] ss:$16 sps:$4 sm:$0xff]   ;;  %v4140_v40 = vld [vmem:[#allocation14] ss:$16 sps:$4 sm:$0xff]  }
 0x56f   : > { %2240 = vmatpush1.bf16.msra.mxu1 %v4056_v41  ;;  %2322 = vmatpush1.bf16.msra.mxu0 %v4059_v42  ;;  %v4143_v41 = vld [vmem:[#allocation14 + $0x8] ss:$16 sps:$4 sm:$0xff]   ;;  %v1402_v42 = vpack.c.bf16 %v5424_v22, %v5424_v22  ;;  %v4152_v22 = vld [vmem:[#allocation14 + $0x40] ss:$16 sps:$4 sm:$0xff]  }
 0x570   : > { %2241 = vmatprep.subr.bf16.mxu1 %v4064_v33  ;;  %2323 = vmatprep.subr.bf16.mxu0 %v4067_v17  ;;  %v4148_v33 = vld [vmem:[#allocation14 + $0x24] ss:$16 sps:$4 sm:$0xff]   ;;  %v4151_v17 = vld [vmem:[#allocation14 + $0x2c] ss:$16 sps:$4 sm:$0xff]  }
 0x573   : > { %2242 = vmatpush1.bf16.msra.mxu1 %v4062_v43  ;;  %2324 = vmatpush1.bf16.msra.mxu0 %v4065_v57  ;;  %v4146_v43 = vld [vmem:[#allocation14 + $0x20] ss:$16 sps:$4 sm:$0xff]   ;;  %v4149_v57 = vld [vmem:[#allocation14 + $0x28] ss:$16 sps:$4 sm:$0xff]  }
 0x574   : > { %2243 = vmatprep.subr.bf16.mxu1 %v4070_v44  ;;  %2325 = vmatprep.subr.bf16.mxu0 %v4073_v12  ;;  %v4154_v44 = vld [vmem:[#allocation14 + $0x44] ss:$16 sps:$4 sm:$0xff]   ;;  %v4157_v12 = vld [vmem:[#allocation14 + $0x4c] ss:$16 sps:$4 sm:$0xff]  }
 0x577   : > { %2244 = vmatpush1.bf16.msra.mxu1 %v4068_v0  ;;  %2326 = vmatpush1.bf16.msra.mxu0 %v4071_v13  ;;  %v4155_v0 = vld [vmem:[#allocation14 + $0x48] ss:$16 sps:$4 sm:$0xff]   ;;  %v4160_v13 = vld [vmem:[#allocation14 + $0x64] ss:$16 sps:$4 sm:$0xff]  }
 0x578   : > { %2245 = vmatprep.subr.bf16.mxu1 %v4076_v46  ;;  %2327 = vmatprep.subr.bf16.mxu0 %v4079_v4  ;;  %v4163_v46 = vld [vmem:[#allocation14 + $0x6c] ss:$16 sps:$4 sm:$0xff]   ;;  %v4158_v4 = vld [vmem:[#allocation14 + $0x60] ss:$16 sps:$4 sm:$0xff]  }
 0x57b   : > { %2246 = vmatpush1.bf16.msra.mxu1 %v4074_v20  ;;  %2328 = vmatpush1.bf16.msra.mxu0 %v4077_v48  ;;  %v4161_v20 = vld [vmem:[#allocation14 + $0x68] ss:$16 sps:$4 sm:$0xff]   ;;  %v4166_v48 = vld [vmem:[#allocation14 + $0x84] ss:$16 sps:$4 sm:$0xff]  }
 0x57c   : > { %2247 = vmatprep.subr.bf16.mxu1 %v4082_v53  ;;  %2329 = vmatprep.subr.bf16.mxu0 %v4085_v19  ;;  %v4169_v53 = vld [vmem:[#allocation14 + $0x8c] ss:$16 sps:$4 sm:$0xff]   ;;  %v4164_v19 = vld [vmem:[#allocation14 + $0x80] ss:$16 sps:$4 sm:$0xff]  }
 0x57f   : > { %2248 = vmatpush1.bf16.msra.mxu1 %v4080_v8  ;;  %2330 = vmatpush1.bf16.msra.mxu0 %v4083_v54  ;;  %v4172_v8 = vld [vmem:[#allocation14 + $0xa4] ss:$16 sps:$4 sm:$0xff]   ;;  %v4175_v54 = vld [vmem:[#allocation14 + $0xac] ss:$16 sps:$4 sm:$0xff]  }
 0x580   : > { %2249 = vmatprep.subr.bf16.mxu1 %v4088_v45  ;;  %2331 = vmatprep.subr.bf16.mxu0 %v4091_v55  ;;  %v4170_v45 = vld [vmem:[#allocation14 + $0xa0] ss:$16 sps:$4 sm:$0xff]   ;;  %v4173_v55 = vld [vmem:[#allocation14 + $0xa8] ss:$16 sps:$4 sm:$0xff]  }
 0x583   : > { %2250 = vmatpush1.bf16.msra.mxu1 %v4086_v56  ;;  %2332 = vmatpush1.bf16.msra.mxu0 %v4089_v23  ;;  %v4178_v56 = vld [vmem:[#allocation14 + $0xc4] ss:$16 sps:$4 sm:$0xff]   ;;  %v4181_v23 = vld [vmem:[#allocation14 + $0xcc] ss:$16 sps:$4 sm:$0xff]  }
 0x584   : > { %2251 = vmatprep.subr.bf16.mxu1 %v4094_v58  ;;  %2333 = vmatprep.subr.bf16.mxu0 %v4097_v59  ;;  %v4176_v58 = vld [vmem:[#allocation14 + $0xc0] ss:$16 sps:$4 sm:$0xff]   ;;  %v4179_v59 = vld [vmem:[#allocation14 + $0xc8] ss:$16 sps:$4 sm:$0xff]  }
 0x587   : > { %2252 = vmatpush1.bf16.msra.mxu1 %v4092_v60  ;;  %2334 = vmatpush1.bf16.msra.mxu0 %v4095_v61  ;;  %v4184_v60 = vld [vmem:[#allocation14 + $0xe4] ss:$16 sps:$4 sm:$0xff]   ;;  %v4187_v61 = vld [vmem:[#allocation14 + $0xec] ss:$16 sps:$4 sm:$0xff]  }
 0x588   : > { %2253 = vmatprep.subr.bf16.mxu1 %v4100_v62  ;;  %2335 = vmatprep.subr.bf16.mxu0 %v4103_v27  ;;  %v4182_v62 = vld [vmem:[#allocation14 + $0xe0] ss:$16 sps:$4 sm:$0xff]   ;;  %v4185_v27 = vld [vmem:[#allocation14 + $0xe8] ss:$16 sps:$4 sm:$0xff]  }
 0x58b   : > { %2254 = vmatpush1.bf16.msra.mxu1 %v4098_v63  ;;  %2336 = vmatpush1.bf16.msra.mxu0 %v4101_v2  ;;  %v4190_v63 = vld [vmem:[#allocation14 + $0x104] ss:$16 sps:$4 sm:$0xff]   ;;  %v4193_v2 = vld [vmem:[#allocation14 + $0x10c] ss:$16 sps:$4 sm:$0xff]  }
 0x58c   : > { %2255 = vmatprep.subr.bf16.mxu1 %v4106_v3  ;;  %2337 = vmatprep.subr.bf16.mxu0 %v4109_v25  ;;  %v4188_v3 = vld [vmem:[#allocation14 + $0x100] ss:$16 sps:$4 sm:$0xff]   ;;  %v4191_v25 = vld [vmem:[#allocation14 + $0x108] ss:$16 sps:$4 sm:$0xff]  }
 0x58f   : > { %2256 = vmatpush1.bf16.msra.mxu1 %v4104_v28  ;;  %2338 = vmatpush1.bf16.msra.mxu0 %v4107_v5  ;;  %v4196_v28 = vld [vmem:[#allocation14 + $0x124] ss:$16 sps:$4 sm:$0xff]   ;;  %v4199_v5 = vld [vmem:[#allocation14 + $0x12c] ss:$16 sps:$4 sm:$0xff]  }
 0x590   : > { %2257 = vmatprep.subr.bf16.mxu1 %v4112_v47  ;;  %2339 = vmatprep.subr.bf16.mxu0 %v4115_v1  ;;  %v4194_v47 = vld [vmem:[#allocation14 + $0x120] ss:$16 sps:$4 sm:$0xff]   ;;  %v4197_v1 = vld [vmem:[#allocation14 + $0x128] ss:$16 sps:$4 sm:$0xff]  }
 0x593   : > { %2258 = vmatpush1.bf16.msra.mxu1 %v4110_v6  ;;  %2340 = vmatpush1.bf16.msra.mxu0 %v4113_v7  ;;  %v4202_v6 = vld [vmem:[#allocation14 + $0x144] ss:$16 sps:$4 sm:$0xff]   ;;  %v4205_v7 = vld [vmem:[#allocation14 + $0x14c] ss:$16 sps:$4 sm:$0xff]  }
 0x594   : > { %2259 = vmatprep.subr.bf16.mxu1 %v4118_v9  ;;  %2341 = vmatprep.subr.bf16.mxu0 %v4121_v29  ;;  %v4200_v9 = vld [vmem:[#allocation14 + $0x140] ss:$16 sps:$4 sm:$0xff]   ;;  %v4203_v29 = vld [vmem:[#allocation14 + $0x148] ss:$16 sps:$4 sm:$0xff]  }
 0x597   : > { %2260 = vmatpush1.bf16.msra.mxu1 %v4116_v10  ;;  %2342 = vmatpush1.bf16.msra.mxu0 %v4119_v11  ;;  %v4208_v10 = vld [vmem:[#allocation14 + $0x164] ss:$16 sps:$4 sm:$0xff]   ;;  %v4211_v11 = vld [vmem:[#allocation14 + $0x16c] ss:$16 sps:$4 sm:$0xff]  }
 0x598   : > { %2261 = vmatprep.subr.bf16.mxu1 %v4124_v15  ;;  %2343 = vmatprep.subr.bf16.mxu0 %v4127_v16  ;;  %v4206_v15 = vld [vmem:[#allocation14 + $0x160] ss:$16 sps:$4 sm:$0xff]   ;;  %v4209_v16 = vld [vmem:[#allocation14 + $0x168] ss:$16 sps:$4 sm:$0xff]  }
 0x59b   : > { %2262 = vmatpush1.bf16.msra.mxu1 %v4122_v30  ;;  %2344 = vmatpush1.bf16.msra.mxu0 %v4125_v18  ;;  %v4214_v30 = vld [vmem:[#allocation14 + $0x184] ss:$16 sps:$4 sm:$0xff]   ;;  %v4212_v18 = vld [vmem:[#allocation14 + $0x180] ss:$16 sps:$4 sm:$0xff]  }
 0x59c   : > { %2263 = vmatprep.subr.bf16.mxu1 %v4130_v21  ;;  %2345 = vmatprep.subr.bf16.mxu0 %v4133_v24  ;;  %v4215_v21 = vld [vmem:[#allocation14 + $0x188] ss:$16 sps:$4 sm:$0xff]   ;;  %v4217_v24 = vld [vmem:[#allocation14 + $0x18c] ss:$16 sps:$4 sm:$0xff]  }
 0x59f   : > { %2264 = vmatpush1.bf16.msra.mxu1 %v4128_v31  ;;  %2346 = vmatpush1.bf16.msra.mxu0 %v4131_v32  ;;  %v4220_v31 = vld [vmem:[#allocation14 + $0x1a4] ss:$16 sps:$4 sm:$0xff]   ;;  %v4223_v32 = vld [vmem:[#allocation14 + $0x1ac] ss:$16 sps:$4 sm:$0xff]  }
 0x5a0   : > { %2265 = vmatprep.subr.bf16.mxu1 %v4136_v34  ;;  %2347 = vmatprep.subr.bf16.mxu0 %v4139_v35  ;;  %v4218_v34 = vld [vmem:[#allocation14 + $0x1a0] ss:$16 sps:$4 sm:$0xff]   ;;  %v4221_v35 = vld [vmem:[#allocation14 + $0x1a8] ss:$16 sps:$4 sm:$0xff]  }
 0x5a3   : > { %2266 = vmatpush1.bf16.msra.mxu1 %v4134_v36  ;;  %2348 = vmatpush1.bf16.msra.mxu0 %v4137_v37  ;;  %v4226_v36 = vld [vmem:[#allocation14 + $0x1c4] ss:$16 sps:$4 sm:$0xff]   ;;  %v4229_v37 = vld [vmem:[#allocation14 + $0x1cc] ss:$16 sps:$4 sm:$0xff]  }
 0x5a4   : > { %2789 = vmatprep.subr.bf16.mxu1 %v4142_v38  ;;  %2830 = vmatprep.subr.bf16.mxu0 %v4145_v39  ;;  %v4224_v38 = vld [vmem:[#allocation14 + $0x1c0] ss:$16 sps:$4 sm:$0xff]   ;;  %v4227_v39 = vld [vmem:[#allocation14 + $0x1c8] ss:$16 sps:$4 sm:$0xff]  }
 0x5a6   : > { %2268 = vmatmul.mubr.bf16.vlgmr.msra.gmra.mrb[0].mxu1 %v1402_v42  ;;  %2350 = vmatmul.mubr.bf16.vlgmr.msra.gmra.mrb[4].mxu0 %v1402_v42  ;;  %v4230_v42 = vld [vmem:[#allocation14 + $0x1e0] ss:$16 sps:$4 sm:$0xff]  }
 0x5a7   : > { %2790 = vmatpush1.bf16.msra.mxu1 %v4140_v40  ;;  %2831 = vmatpush1.bf16.msra.mxu0 %v4143_v41  ;;  %v4232_v40 = vld [vmem:[#allocation14 + $0x1e4] ss:$16 sps:$4 sm:$0xff]   ;;  %v4235_v41 = vld [vmem:[#allocation14 + $0x1ec] ss:$16 sps:$4 sm:$0xff]  }
 0x5a8   : > { %2791 = vmatprep.subr.bf16.mxu1 %v4148_v33  ;;  %2832 = vmatprep.subr.bf16.mxu0 %v4151_v17  ;;  %v4233_v33 = vld [vmem:[#allocation14 + $0x1e8] ss:$16 sps:$4 sm:$0xff]   ;;  %v1532_v17 = vld [vmem:[%s5615_s1] sm:$0xf] }
 0x5a9   : > { %2821 = vmatprep.mubr.bf16.mxu1 %v5237_v14  ;;  %2862 = vmatprep.mubr.bf16.mxu0 %v5237_v14  ;;  %v4167_v14 = vld [vmem:[#allocation14 + $0x88] ss:$16 sps:$4 sm:$0xff]  }
 0x5ab   : > { %2792 = vmatpush1.bf16.msra.mxu1 %v4146_v43  ;;  %2833 = vmatpush1.bf16.msra.mxu0 %v4149_v57  ;;  %v1537_v43 = vrot.slane %v1532_v17, %v5248_v26  ;;  %v1541_v57 = vrot.slane %v1532_v17, %v5293_v50 }
 0x5ac   : > { %2793 = vmatprep.subr.bf16.mxu1 %v4154_v44  ;;  %2834 = vmatprep.subr.bf16.mxu0 %v4157_v12 }
 0x5af   : > { %2794 = vmatpush1.bf16.msra.mxu1 %v4152_v22  ;;  %2835 = vmatpush1.bf16.msra.mxu0 %v4155_v0 }
 0x5b0   : > { %2795 = vmatprep.subr.bf16.mxu1 %v4160_v13  ;;  %2836 = vmatprep.subr.bf16.mxu0 %v4163_v46 }
 0x5b3   : > { %2796 = vmatpush1.bf16.msra.mxu1 %v4158_v4  ;;  %2837 = vmatpush1.bf16.msra.mxu0 %v4161_v20 }
 0x5b4   : > { %2797 = vmatprep.subr.bf16.mxu1 %v4166_v48  ;;  %2838 = vmatprep.subr.bf16.mxu0 %v4169_v53 }
 0x5b7   : > { %2798 = vmatpush1.bf16.msra.mxu1 %v4164_v19  ;;  %2839 = vmatpush1.bf16.msra.mxu0 %v4167_v14 }
 0x5b8   : > { %2799 = vmatprep.subr.bf16.mxu1 %v4172_v8  ;;  %2840 = vmatprep.subr.bf16.mxu0 %v4175_v54  ;;  %v1549_v8 = vrot.slane %v1532_v17, %v5299_v52 }
 0x5bb   : > { %2800 = vmatpush1.bf16.msra.mxu1 %v4170_v45  ;;  %2841 = vmatpush1.bf16.msra.mxu0 %v4173_v55  ;;  %v1545_v45 = vrot.slane %v1532_v17, %v5296_v51  ;;  %v4269_v17 = vld [vmem:[#allocation17 + $0xa8] ss:$16 sps:$4 sm:$0xff]  }
 0x5bc   : > { %2801 = vmatprep.subr.bf16.mxu1 %v4178_v56  ;;  %2842 = vmatprep.subr.bf16.mxu0 %v4181_v23 }
 0x5bf   : > { %2802 = vmatpush1.bf16.msra.mxu1 %v4176_v58  ;;  %2843 = vmatpush1.bf16.msra.mxu0 %v4179_v59 }
 0x5c0   : > { %2803 = vmatprep.subr.bf16.mxu1 %v4184_v60  ;;  %2844 = vmatprep.subr.bf16.mxu0 %v4187_v61 }
 0x5c3   : > { %2804 = vmatpush1.bf16.msra.mxu1 %v4182_v62  ;;  %2845 = vmatpush1.bf16.msra.mxu0 %v4185_v27  ;;  %v672_v27 = vld [vmem:[#allocation3] sm:$0xff] }
 0x5c4   : > { %2805 = vmatprep.subr.bf16.mxu1 %v4190_v63  ;;  %2846 = vmatprep.subr.bf16.mxu0 %v4193_v2 }
 0x5c7   : > { %2806 = vmatpush1.bf16.msra.mxu1 %v4188_v3  ;;  %2847 = vmatpush1.bf16.msra.mxu0 %v4191_v25 }
 0x5c8   : > { %2807 = vmatprep.subr.bf16.mxu1 %v4196_v28  ;;  %2848 = vmatprep.subr.bf16.mxu0 %v4199_v5 }
 0x5cb   : > { %2808 = vmatpush1.bf16.msra.mxu1 %v4194_v47  ;;  %2849 = vmatpush1.bf16.msra.mxu0 %v4197_v1 }
 0x5cc   : > { %2809 = vmatprep.subr.bf16.mxu1 %v4202_v6  ;;  %2850 = vmatprep.subr.bf16.mxu0 %v4205_v7 }
 0x5cf   : > { %2810 = vmatpush1.bf16.msra.mxu1 %v4200_v9  ;;  %2851 = vmatpush1.bf16.msra.mxu0 %v4203_v29  ;;  %v4238_v9 = vld [vmem:[#allocation17 + $0x4] ss:$16 sps:$4 sm:$0xff]   ;;  %v4241_v29 = vld [vmem:[#allocation17 + $0xc] ss:$16 sps:$4 sm:$0xff]  }
 0x5d0   : > { %2811 = vmatprep.subr.bf16.mxu1 %v4208_v10  ;;  %2852 = vmatprep.subr.bf16.mxu0 %v4211_v11  ;;  %v4236_v10 = vld [vmem:[#allocation17] ss:$16 sps:$4 sm:$0xff]   ;;  %v4239_v11 = vld [vmem:[#allocation17 + $0x8] ss:$16 sps:$4 sm:$0xff]  }
 0x5d3   : > { %2812 = vmatpush1.bf16.msra.mxu1 %v4206_v15  ;;  %2853 = vmatpush1.bf16.msra.mxu0 %v4209_v16  ;;  %v4244_v15 = vld [vmem:[#allocation17 + $0x24] ss:$16 sps:$4 sm:$0xff]   ;;  %v4247_v16 = vld [vmem:[#allocation17 + $0x2c] ss:$16 sps:$4 sm:$0xff]  }
 0x5d4   : > { %2813 = vmatprep.subr.bf16.mxu1 %v4214_v30  ;;  %2854 = vmatprep.subr.bf16.mxu0 %v4217_v24  ;;  %v4242_v30 = vld [vmem:[#allocation17 + $0x20] ss:$16 sps:$4 sm:$0xff]   ;;  %v4253_v24 = vld [vmem:[#allocation17 + $0x4c] ss:$16 sps:$4 sm:$0xff]  }
 0x5d7   : > { %2814 = vmatpush1.bf16.msra.mxu1 %v4212_v18  ;;  %2855 = vmatpush1.bf16.msra.mxu0 %v4215_v21  ;;  %v4245_v18 = vld [vmem:[#allocation17 + $0x28] ss:$16 sps:$4 sm:$0xff]   ;;  %v4250_v21 = vld [vmem:[#allocation17 + $0x44] ss:$16 sps:$4 sm:$0xff]  }
 0x5d8   : > { %2815 = vmatprep.subr.bf16.mxu1 %v4220_v31  ;;  %2856 = vmatprep.subr.bf16.mxu0 %v4223_v32  ;;  %v4248_v31 = vld [vmem:[#allocation17 + $0x40] ss:$16 sps:$4 sm:$0xff]   ;;  %v4256_v32 = vld [vmem:[#allocation17 + $0x64] ss:$16 sps:$4 sm:$0xff]  }
 0x5db   : > { %2816 = vmatpush1.bf16.msra.mxu1 %v4218_v34  ;;  %2857 = vmatpush1.bf16.msra.mxu0 %v4221_v35  ;;  %v4259_v34 = vld [vmem:[#allocation17 + $0x6c] ss:$16 sps:$4 sm:$0xff]   ;;  %v4254_v35 = vld [vmem:[#allocation17 + $0x60] ss:$16 sps:$4 sm:$0xff]  }
 0x5dc   : > { %2817 = vmatprep.subr.bf16.mxu1 %v4226_v36  ;;  %2858 = vmatprep.subr.bf16.mxu0 %v4229_v37  ;;  %v4257_v36 = vld [vmem:[#allocation17 + $0x68] ss:$16 sps:$4 sm:$0xff]   ;;  %v4262_v37 = vld [vmem:[#allocation17 + $0x84] ss:$16 sps:$4 sm:$0xff]  }
 0x5df   : > { %2818 = vmatpush1.bf16.msra.mxu1 %v4224_v38  ;;  %2859 = vmatpush1.bf16.msra.mxu0 %v4227_v39  ;;  %v4265_v38 = vld [vmem:[#allocation17 + $0x8c] ss:$16 sps:$4 sm:$0xff]   ;;  %v4260_v39 = vld [vmem:[#allocation17 + $0x80] ss:$16 sps:$4 sm:$0xff]  }
 0x5e0   : > { %2819 = vmatprep.subr.bf16.mxu1 %v4232_v40  ;;  %2860 = vmatprep.subr.bf16.mxu0 %v4235_v41  ;;  %v4263_v40 = vld [vmem:[#allocation17 + $0x88] ss:$16 sps:$4 sm:$0xff]   ;;  %v4268_v41 = vld [vmem:[#allocation17 + $0xa4] ss:$16 sps:$4 sm:$0xff]  }
 0x5e3   : > { %2820 = vmatpush1.bf16.msra.mxu1 %v4230_v42  ;;  %2861 = vmatpush1.bf16.msra.mxu0 %v4233_v33  ;;  %v4271_v42 = vld [vmem:[#allocation17 + $0xac] ss:$16 sps:$4 sm:$0xff]   ;;  %v4266_v33 = vld [vmem:[#allocation17 + $0xa0] ss:$16 sps:$4 sm:$0xff]  }
 0x5e4   : > { %3122 = vmatprep.subr.bf16.mxu1 %v4238_v9  ;;  %3163 = vmatprep.subr.bf16.mxu0 %v4241_v29 }
 0x679   : > { %v2269_v44 = vpop.f32.mrb[0].mxu1  ;;  %v2351_v12 = vpop.f32.mrb[4].mxu0 }
 0x67a   : > { %v3757_v22 = vadd.f32 %v2269_v44, %v1537_v43  ;;  %v2271_v0 = vpop.f32.mrb[1].mxu1  ;;  %v2353_v13 = vpop.f32.mrb[5].mxu0  ;;  %v3759_v56 = vadd.f32 %v2351_v12, %v1545_v45  ;;  %v4274_v43 = vld [vmem:[#allocation17 + $0xc4] ss:$16 sps:$4 sm:$0xff]   ;;  %v4272_v44 = vld [vmem:[#allocation17 + $0xc0] ss:$16 sps:$4 sm:$0xff]  }
 0x67b   : > { %v3758_v46 = vadd.f32 %v2271_v0, %v1541_v57  ;;  %v2273_v4 = vpop.f32.mrb[2].mxu1  ;;  %v2355_v20 = vpop.f32.mrb[6].mxu0  ;;  %v3760_v54 = vadd.f32 %v2353_v13, %v1549_v8  ;;  %v4277_v57 = vld [vmem:[#allocation17 + $0xcc] ss:$16 sps:$4 sm:$0xff]   ;;  %v4275_v12 = vld [vmem:[#allocation17 + $0xc8] ss:$16 sps:$4 sm:$0xff]  }
 0x67c   : > { %v3596_v48 = vmul.f32 -1.442695, %v3757_v22  ;;  %v2274_v53 = vpop.f32.mrb[3].mxu1  ;;  %v2356_v19 = vpop.f32.mrb[7].mxu0  ;;  %v4280_v22 = vld [vmem:[#allocation17 + $0xe4] ss:$16 sps:$4 sm:$0xff]  }
 0x67d   : > { %v3597_v14 = vmul.f32 -1.442695, %v3758_v46  ;;  %v3598_v55 = vmul.f32 -1.442695, %v3760_v54  ;;  %v4283_v0 = vld [vmem:[#allocation17 + $0xec] ss:$16 sps:$4 sm:$0xff]  }
 0x67e   : > { %4332 = vpow2.f32 %v3596_v48  ;;  %v4278_v13 = vld [vmem:[#allocation17 + $0xe0] ss:$16 sps:$4 sm:$0xff]   ;;  %v4281_v46 = vld [vmem:[#allocation17 + $0xe8] ss:$16 sps:$4 sm:$0xff]   ;;  %v2447_v4 = vld [vmem:[#allocation16] sm:$0xf] }
 0x67f   : > { %4334 = vpow2.f32 %v3597_v14  ;;  %v2452_v20 = vrot.slane %v2447_v4, %v5248_v26  ;;  %v2456_v48 = vrot.slane %v2447_v4, %v5293_v50 }
 0x680   : > { %4336 = vpow2.f32 %v3598_v55 }
 0x681   : > { %4338 = vtanh.f32 %v3759_v56 }
 0x688   : > { %v4333_v23 = vpop.eup %4332 }
 0x689   : > { %v4335_v58 = vpop.eup %4334  ;;  %v2361_v59 = vadd.f32 1.0, %v4333_v23 }
 0x68a   : > { %v2367_v60 = vadd.f32 1.0, %v4335_v58  ;;  %v4337_v61 = vpop.eup %4336 }
 0x68b   : > { %4340 = vrcp.f32 %v2361_v59  ;;  %v4339_v62 = vpop.eup %4338  ;;  %v2374_v25 = vadd.f32 1.0, %v4337_v61  ;;  %v2464_v61 = vrot.slane %v2447_v4, %v5299_v52 }
 0x68c   : > { %4342 = vrcp.f32 %v2367_v60 }
 0x68d   : > { %4344 = vrcp.f32 %v2374_v25 }
 0x695   : > { %v4341_v63 = vpop.eup %4340 }
 0x696   : > { %v4343_v2 = vpop.eup %4342  ;;  %v2378_v3 = vmul.f32 %v4341_v63, %v4339_v62 }
 0x697   : > { %v2377_v28 = vmul.f32 %v4343_v2, %v672_v27  ;;  %v4345_v47 = vpop.eup %4344  ;;  %v2460_v27 = vrot.slane %v2447_v4, %v5296_v51 }
 0x699   : > { %v2379_v5 = vadd.f32 %v2378_v3, %v2377_v28 }
 0x69b   : > { %4346 = vtanh.f32 %v2379_v5  ;;  %2897 = vst [vmem:[#allocation3] sm:$0xff] %v2379_v5  ;;  %2904 = vst [vmem:[#allocation23] sm:$0xff] %v2379_v5 }
 0x6a5   : > { %v4347_v1 = vpop.eup %4346 }
 0x6a6   : > { %v2381_v6 = vmul.f32 %v4347_v1, %v4345_v47 }
 0x6a8   : > { %v2382_v7 = vpack.c.bf16 %v2381_v6, %v2381_v6  ;;  %2895 = vst [vmem:[#allocation2] sm:$0xff] %v2381_v6  ;;  %2901 = vst [vmem:[#allocation21] sm:$0xff] %v2381_v6  ;;  %v674_v6 = vld [vmem:[#allocation3 + $0x8] sm:$0xff] }
 0x6aa   : > { %2822 = vmatmul.mubr.bf16.vlgmr.msra.gmra.mrb[4].mxu1 %v2382_v7  ;;  %2863 = vmatmul.mubr.bf16.vlgmr.msra.gmra.mrb[8].mxu0 %v2382_v7 }
 0x6ab   : > { %3154 = vmatprep.mubr.bf16.mxu1 %v4792_v49  ;;  %3195 = vmatprep.mubr.bf16.mxu0 %v4792_v49  ;;  %v4251_v49 = vld [vmem:[#allocation17 + $0x48] ss:$16 sps:$4 sm:$0xff]  }
 0x6ac   : > { %3123 = vmatpush1.bf16.msra.mxu1 %v4236_v10  ;;  %3164 = vmatpush1.bf16.msra.mxu0 %v4239_v11 }
 0x6ad   : > { %3124 = vmatprep.subr.bf16.mxu1 %v4244_v15  ;;  %3165 = vmatprep.subr.bf16.mxu0 %v4247_v16 }
 0x6b0   : > { %3125 = vmatpush1.bf16.msra.mxu1 %v4242_v30  ;;  %3166 = vmatpush1.bf16.msra.mxu0 %v4245_v18 }
 0x6b1   : > { %3126 = vmatprep.subr.bf16.mxu1 %v4250_v21  ;;  %3167 = vmatprep.subr.bf16.mxu0 %v4253_v24 }
 0x6b4   : > { %3127 = vmatpush1.bf16.msra.mxu1 %v4248_v31  ;;  %3168 = vmatpush1.bf16.msra.mxu0 %v4251_v49 }
 0x6b5   : > { %3128 = vmatprep.subr.bf16.mxu1 %v4256_v32  ;;  %3169 = vmatprep.subr.bf16.mxu0 %v4259_v34 }
 0x6b8   : > { %3129 = vmatpush1.bf16.msra.mxu1 %v4254_v35  ;;  %3170 = vmatpush1.bf16.msra.mxu0 %v4257_v36 }
 0x6b9   : > { %3130 = vmatprep.subr.bf16.mxu1 %v4262_v37  ;;  %3171 = vmatprep.subr.bf16.mxu0 %v4265_v38 }
 0x6bc   : > { %3131 = vmatpush1.bf16.msra.mxu1 %v4260_v39  ;;  %3172 = vmatpush1.bf16.msra.mxu0 %v4263_v40 }
 0x6bd   : > { %3132 = vmatprep.subr.bf16.mxu1 %v4268_v41  ;;  %3173 = vmatprep.subr.bf16.mxu0 %v4271_v42 }
 0x6c0   : > { %3133 = vmatpush1.bf16.msra.mxu1 %v4266_v33  ;;  %3174 = vmatpush1.bf16.msra.mxu0 %v4269_v17 }
 0x6c1   : > { %3134 = vmatprep.subr.bf16.mxu1 %v4274_v43  ;;  %3175 = vmatprep.subr.bf16.mxu0 %v4277_v57 }
 0x6c4   : > { %3135 = vmatpush1.bf16.msra.mxu1 %v4272_v44  ;;  %3176 = vmatpush1.bf16.msra.mxu0 %v4275_v12 }
 0x6c5   : > { %3136 = vmatprep.subr.bf16.mxu1 %v4280_v22  ;;  %3177 = vmatprep.subr.bf16.mxu0 %v4283_v0 }
 0x6c8   : > { %3137 = vmatpush1.bf16.msra.mxu1 %v4278_v13  ;;  %3178 = vmatpush1.bf16.msra.mxu0 %v4281_v46 }
 0x77d   : > { %v2823_v53 = vpop.f32.mrb[4].mxu1  ;;  %v2864_v19 = vpop.f32.mrb[8].mxu0 }
 0x77e   : > { %v2824_v14 = vadd.f32 %v2823_v53, %v2452_v20  ;;  %v2825_v8 = vpop.f32.mrb[5].mxu1  ;;  %v2866_v54 = vpop.f32.mrb[9].mxu0  ;;  %v2865_v2 = vadd.f32 %v2864_v19, %v2460_v27 }
 0x77f   : > { %v2826_v45 = vadd.f32 %v2825_v8, %v2456_v48  ;;  %v2827_v55 = vpop.f32.mrb[6].mxu1  ;;  %v2868_v56 = vpop.f32.mrb[10].mxu0  ;;  %v2867_v62 = vadd.f32 %v2866_v54, %v2464_v61 }
 0x780   : > { %v3663_v23 = vmul.f32 -1.442695, %v2824_v14  ;;  %v2828_v58 = vpop.f32.mrb[7].mxu1  ;;  %v2869_v59 = vpop.f32.mrb[11].mxu0 }
 0x781   : > { %v3664_v60 = vmul.f32 -1.442695, %v2826_v45  ;;  %v3665_v63 = vmul.f32 -1.442695, %v2867_v62 }
 0x782   : > { %4348 = vpow2.f32 %v3663_v23 }
 0x783   : > { %4350 = vpow2.f32 %v3664_v60 }
 0x784   : > { %4352 = vpow2.f32 %v3665_v63 }
 0x785   : > { %4354 = vtanh.f32 %v2865_v2 }
 0x78c   : > { %v4349_v3 = vpop.eup %4348 }
 0x78d   : > { %v4351_v25 = vpop.eup %4350  ;;  %v2874_v28 = vadd.f32 1.0, %v4349_v3 }
 0x78e   : > { %v2880_v5 = vadd.f32 1.0, %v4351_v25  ;;  %v4353_v47 = vpop.eup %4352 }
 0x78f   : > { %4356 = vrcp.f32 %v2874_v28  ;;  %v4355_v1 = vpop.eup %4354  ;;  %v2887_v10 = vadd.f32 1.0, %v4353_v47 }
 0x790   : > { %4358 = vrcp.f32 %v2880_v5 }
 0x791   : > { %4360 = vrcp.f32 %v2887_v10 }
 0x799   : > { %v4357_v7 = vpop.eup %4356 }
 0x79a   : > { %v4359_v9 = vpop.eup %4358  ;;  %v2891_v29 = vmul.f32 %v4357_v7, %v4355_v1 }
 0x79b   : > { %v2890_v11 = vmul.f32 %v4359_v9, %v674_v6  ;;  %v4361_v16 = vpop.eup %4360 }
 0x79d   : > { %v2892_v15 = vadd.f32 %v2891_v29, %v2890_v11 }
 0x79f   : > { %4362 = vtanh.f32 %v2892_v15  ;;  %2898 = vst [vmem:[#allocation3 + $0x8] sm:$0xff] %v2892_v15  ;;  %2906 = vst [vmem:[#allocation23 + $0x8] sm:$0xff] %v2892_v15 }
 0x7a9   : > { %v4363_v30 = vpop.eup %4362 }
 0x7aa   : > { %v2894_v18 = vmul.f32 %v4363_v30, %v4361_v16 }
 0x7ac   : > { %2896 = vst [vmem:[#allocation2 + $0x8] sm:$0xff] %v2894_v18  ;;  %v2899_v21 = vpack.c.bf16 %v2894_v18, %v2894_v18  ;;  %2903 = vst [vmem:[#allocation21 + $0x8] sm:$0xff] %v2894_v18 }
 0x7ae   : > { %2900 = vst [vmem:[#allocation4] sm:$0xf] %v2899_v21 }
 0x7b5   : > { %v2907_v24 = vld [vmem:[#allocation4] sm:$0xf] }
 0x7b6   : > { %3155 = vmatmul.mubr.bf16.vlgmr.msra.gmra.mrb[8].mxu1 %v2907_v24  ;;  %3196 = vmatmul.mubr.bf16.vlgmr.msra.gmra.mrb[12].mxu0 %v2907_v24 }
 0x7b7   : > { %4631 = shalt.err (!%p4628_p3)
}
 0x7b8   : > { %s5617_s27 = sld [smem:[#allocation42_spill]] }
 0x7be   : > { %s4632_s21 = scalar_lea.hbm %s5617_s27, 256 }
 0x7bf   : > { %p4633_p6 = scmp.ne.s32.totalorder %s5617_s27, %s4632_s21  ;;  %p4638_p0 = scmp.lt.u32.totalorder %s4632_s21, %s5617_s27 }
 0x7c1   : > { %p4634_p9 = pnand %p4633_p6, %p5616_p4 }
 0x7c3   : > { %p4635_p10 = pneg %p4634_p9 }
 0x7c5   : > { %p4640_p5 = pnand %p4638_p0, %p4635_p10 }
 0x7c7   : > { %4643 = shalt.err (!%p4640_p5)
}
 0x7c8   : > { %s4794_s4 = smov 128   ;;  %s4795_s25 = smov 8  }
 0x7c9   : > { %3805 = dma.vmem_to_hbm [thread:$0]  (%p5616_p4), %s3236_s26, 256, %s5617_s27, [#allocation22], %s4794_s4, %s4794_s4, %s4795_s25  }
 0x7ca   : > { %s4796_s28 = smov [#allocation23]  }
 0x7cb   : > { %s3248_s15 = sshll.u32 %s4796_s28, 4  ;;  %s3249_s15 = int_to_ptr.vmem [resolvable:$true] %s3248_s15 }
 0x7cc   : > { %s4644_s0 = scalar_lea.vmem %s3249_s15, 256  ;;  %p4651_p8 = scmp.lt.s32.totalorder %s3249_s15, %s3249_s15 }
 0x7cd   : > { %p4645_p11 = scmp.ne.s32.totalorder %s3249_s15, %s4644_s0  ;;  %p4652_p13 = scmp.lt.s32.totalorder %s4644_s0, %s4644_s0 }
 0x7cf   : > { %p4646_p12 = pnand %p4645_p11, %p5616_p4  ;;  %p4653_p2 = por %p4652_p13, %p4651_p8 }
 0x7d1   : > { %p4647_p1 = pneg %p4646_p12 }
 0x7d3   : > { %p4654_p7 = pnand %p4653_p2, %p4647_p1 }
 0x7d5   : > { %4657 = shalt.err (!%p4654_p7)
}
 0x7d6   : > { %s5618_s1 = sld [smem:[#allocation43_spill]] }
 0x7dc   : > { %s4658_s7 = scalar_lea.hbm %s5618_s1, 256 }
 0x7dd   : > { %p4659_p3 = scmp.ne.s32.totalorder %s5618_s1, %s4658_s7  ;;  %p4664_p10 = scmp.lt.u32.totalorder %s4658_s7, %s5618_s1 }
 0x7df   : > { %p4660_p6 = pnand %p4659_p3, %p5616_p4 }
 0x7e1   : > { %p4661_p9 = pneg %p4660_p6 }
 0x7e3   : > { %p4666_p0 = pnand %p4664_p10, %p4661_p9 }
 0x7e5   : > { %4669 = shalt.err (!%p4666_p0)
}
 0x7e6   : > { %s5619_s21 = sld [smem:[#allocation31_spill]]  ;;  %v2940_v31 = vld [vmem:[#allocation19] sm:$0xf]  ;;  %s3225_s3 = sshll.u32 %s5235_s2, 4  ;;  %s5490_s3 = int_to_ptr.vmem [resolvable:$true] %s3225_s3 }
 0x7e7   : > { %3807 = dma.vmem_to_hbm [thread:$0]  (%p5616_p4), %s3249_s15, 256, %s5618_s1, [#allocation22], %s4794_s4, %s4794_s4, %s4795_s25   ;;  %v2945_v49 = vrot.slane %v2940_v31, %v5248_v26  ;;  %v2953_v32 = vrot.slane %v2940_v31, %v5296_v51  ;;  %v2949_v34 = vrot.slane %v2940_v31, %v5293_v50  ;;  %v2957_v35 = vrot.slane %v2940_v31, %v5299_v52 }
 0x7e8   : > { %s5620_s25 = sld [smem:[#allocation41_spill]]  ;;  %s3209_s16 = scalar_lea.sflag [#allocation7], %s5207_s5 }
 0x7e9   : > { %s4670_s26 = scalar_lea.vmem %s5490_s3, 512  ;;  %p5621_p11 = scmp.ne.s32.totalorder %s5605_s13, 0 }
 0x7ea   : > { %p4671_p5 = scmp.ne.s32.totalorder %s5490_s3, %s4670_s26  ;;  %s4797_s14 = smov [#allocation20]  }
 0x7eb   : > { %s4674_s28 = sshll.u32 %s4797_s14, 4  ;;  %s4675_s28 = int_to_ptr.vmem [resolvable:$false] %s4674_s28 }
 0x7ec   : > { %s3708_s7 = sshll.u32 %s5619_s21, 9  ;;  %p4672_p12 = pnand %p4671_p5, %p5621_p11 }
 0x7ed   : > { %s4676_s0 = scalar_lea.vmem %s4675_s28, 1024  ;;  %p4677_p8 = scmp.lt.s32.totalorder %s5490_s3, %s4675_s28 }
 0x7ee   : > { %s5488_s15 = scalar_lea.hbm %s5620_s25, %s3708_s7  ;;  %p4673_p1 = pneg %p4672_p12 }
 0x7ef   : > { %p4678_p13 = scmp.lt.s32.totalorder %s4676_s0, %s4670_s26 }
 0x7f1   : > { %p4679_p2 = por %p4678_p13, %p4677_p8 }
 0x7f3   : > { %p4680_p7 = pnand %p4679_p2, %p4673_p1 }
 0x889   : > { %v3156_v36 = vpop.f32.mrb[8].mxu1  ;;  %v3197_v37 = vpop.f32.mrb[12].mxu0 }
 0x88a   : > { %v3157_v38 = vadd.f32 %v3156_v36, %v2945_v49  ;;  %v3198_v39 = vadd.f32 %v3197_v37, %v2953_v32  ;;  %v3158_v40 = vpop.f32.mrb[9].mxu1  ;;  %v3199_v41 = vpop.f32.mrb[13].mxu0 }
 0x88b   : > { %v3159_v26 = vadd.f32 %v3158_v40, %v2949_v34  ;;  %v3200_v51 = vadd.f32 %v3199_v41, %v2957_v35  ;;  %v3160_v42 = vpop.f32.mrb[10].mxu1  ;;  %v3201_v50 = vpop.f32.mrb[14].mxu0 }
 0x88c   : > { %3204 = vst [vmem:[%s5235_s2] sm:$0xff] %v3157_v38  ;;  %3206 = vst [vmem:[%s5235_s2 + $0x10] sm:$0xff] %v3198_v39  ;;  %v3161_v52 = vpop.f32.mrb[11].mxu1  ;;  %v3202_v33 = vpop.f32.mrb[15].mxu0 }
 0x88d   : > { %3205 = vst [vmem:[%s5235_s2 + $0x8] sm:$0xff] %v3159_v26  ;;  %3207 = vst [vmem:[%s5235_s2 + $0x18] sm:$0xff] %v3200_v51 }
 0x88e   : > { %4683 = shalt.err (!%p4680_p7)
}
 0x88f   : > { %s4684_s5 = scalar_lea.hbm %s5488_s15, 512  ;;  %s4688_s7 = scalar_lea.hbm %s5620_s25, 1536 }
 0x890   : > { %p4685_p3 = scmp.ne.s32.totalorder %s5488_s15, %s4684_s5  ;;  %p4689_p10 = scmp.lt.u32.totalorder %s5488_s15, %s5620_s25 }
 0x891   : > { %p4690_p0 = scmp.lt.u32.totalorder %s4688_s7, %s4684_s5  ;;  %p4692_p12 = scmp.lt.u32.totalorder %s4684_s5, %s5488_s15 }
 0x892   : > { %p4686_p6 = pnand %p4685_p3, %p5621_p11 }
 0x893   : > { %p4691_p5 = por %p4690_p0, %p4689_p10 }
 0x894   : > { %p4687_p9 = pneg %p4686_p6 }
 0x895   : > { %p4693_p1 = por %p4692_p12, %p4691_p5 }
 0x897   : > { %p4694_p8 = pnand %p4693_p1, %p4687_p9 }
 0x899   : > { %4697 = shalt.err (!%p4694_p8)
}
 0x89a   : > { %3803 = dma.vmem_to_hbm [thread:$0]  (%p5621_p11), %s5490_s3, 512, %s5488_s15, %s3209_s16  }
 0x89b   : > { %4743 = dma.done.wait (%p5616_p4), [#allocation22], 512  }
 0x89c   : > { %4745 = vsyncadd (%p5616_p4), [#allocation22], 4294966784 }
 0x89d PF: > { %p3867_p13 = scmp.ge.s32.totalorder %s4772_s23, 2  ;;  %s3271_s26 = sand.u32 1, %s4752_s18  }
 0x89e   : > { %p5622_p2 = scmp.ne.s32.totalorder %s5606_s30, 0  ;;  %s3272_s14 = scalar_lea.sflag [#allocation7], %s3271_s26 }
 0x8a0   : > { %p3843_p7 = pnand %p3867_p13, %p5622_p2 }
 0x8a2   : > { %4747 = dma.done.wait (!%p3843_p7), %s3272_s14, 512  }
 0x8a3   : > { %4749 = vsyncadd (!%p3843_p7), %s3272_s14, 4294966784  ;;  %s37_s23 = sadd.s32 1, %s4772_s23   ;;  %s5623_s18 = smov %s4756_s19 }
 0x8a4   : > { %p34_p3 = scmp.ge.s32.totalorder %s37_s23, 5   ;;  %s5624_s19 = smov %s4760_s20 }
 0x8a5   : > { %s5625_s20 = smov %s5157_s6  ;;  %s5626_s21 = smov %s4768_s22 }
 0x8a6   : > { %s5627_s22 = smov %s5629_s17  ;;  %36 = sbr.rel (!%p34_p3) target bundleno = 24 (0x18), region = 179 }
 0x8ad   :  { %3277 = vsyncpa [#allocation6], 1 }
 0x8ae   :  { %3279 = vsyncpa [#allocation6 + $0x1], 1 }
 0x8af   :  { %3280 = vsyncpa [#allocation9], 1 }
 0x8b0   :  { %3281 = vsyncpa [#allocation12], 1 }
 0x8b1   :  { %3282 = vsyncpa [#allocation15], 1 }
 0x8b2   :  { %3283 = vsyncpa [#allocation18], 1 }
 0x8b3   :  { %3284 = vsyncpa [#allocation7], 1 }
 0x8b4   :  { %3286 = vsyncpa [#allocation7 + $0x1], 1 }
 0x8b5   :  { %3287 = vsyncpa [#allocation22], 1 }

</bundles_post_ra>
